<compile_context>
chip_gen: v7x
topology: tpu7x:2x2x1
jax: 0.10.0
libtpu: 0.0.40
codegen_flags: <defaults>
</compile_context>

<pallas_src>
import functools
import math

import jax
import jax.numpy as jnp
from jax.experimental import pallas as pl
from jax.experimental.pallas import tpu as pltpu

EPS = 1e-5


def _resblock2_kernel(x_ref, wmask_ref,
                      w1_ref, b1_ref, g1_ref, bt1_ref,
                      w2_ref, b2_ref, g2_ref, bt2_ref,
                      o_ref, xpf_ref, pt_ref, *, k, N, H, W, C, pad):
    """Fused ResBlock2 forward, everything VMEM-resident, (C, M) layout.

    x_ref    : (N, C, H*W)        f32   NCHW input, H*W flattened onto lanes
    wmask_ref: (k, 1, H*W)        f32   per-kw 0/1 validity mask (W direction)
    w*_ref   : (C, k*k*C)         bf16  conv weights, im2col ordering (kh,kw,cin)
    b*/g*/bt*: (C, 1)             f32   conv bias / BN gamma / BN beta
    o_ref    : (N, C, H*W)        f32   output
    xpf_ref  : (N, C, H*W + 2*pad) f32  zero-margined flat activation scratch
    pt_ref   : (k*k*C, N*H*W)     bf16  im2col patch matrix
    """
    p = (k - 1) // 2
    HW = H * W
    M = N * HW
    inv_m = 1.0 / M

    # Hoisted small parameter loads, (C, 1) -> lane broadcast later.
    b1, g1, bt1 = b1_ref[...], g1_ref[...], bt1_ref[...]
    b2, g2, bt2 = b2_ref[...], g2_ref[...], bt2_ref[...]

    # Zero the flat padded scratch ONCE; the zero margins serve both stages,
    # the interior is fully overwritten per stage.
    xpf_ref[...] = jnp.zeros_like(xpf_ref)

    def im2col(y_prev):
        # Fill the padded interior (lane-aligned store at offset `pad`).
        for n in range(N):
            if y_prev is None:
                xpf_ref[n, :, pl.ds(pad, HW)] = x_ref[n]
            else:
                xpf_ref[n, :, pl.ds(pad, HW)] = y_prev[:, n * HW:(n + 1) * HW]
        # Gather the k*k shifted taps into the (k*k*C, M) bf16 patch matrix.
        # Stores are sublane-aligned (tap*C multiple of 32) and 256-lane dense.
        for n in range(N):
            for kh in range(k):
                for kw in range(k):
                    tap = kh * k + kw
                    start = pad + (kh - p) * W + (kw - p)
                    v = xpf_ref[n, :, pl.ds(start, HW)]            # (C, HW) f32
                    if kw != p:
                        v = v * wmask_ref[kw]                       # W-edge mask
                    pt_ref[pl.ds(tap * C, C), pl.ds(n * HW, HW)] = (
                        v.astype(jnp.bfloat16))

    def conv_relu(w_ref, b):
        # One wide-K MXU matmul; pixels (M=512) on the output-column/lane axis.
        acc = jnp.dot(w_ref[...], pt_ref[...],
                      preferred_element_type=jnp.float32)           # (C, M) f32
        return jnp.maximum(acc + b, 0.0)

    def batchnorm(y, g, beta):
        # Training-mode BN (biased variance), two-pass stats (no cancellation),
        # per-channel reduce along the lane axis.
        mean = jnp.sum(y, axis=1, keepdims=True) * inv_m            # (C, 1)
        cen = y - mean
        var = jnp.sum(cen * cen, axis=1, keepdims=True) * inv_m
        return cen * (g * jax.lax.rsqrt(var + EPS)) + beta

    # Input in (C, M) layout for the residual add.
    xT = jnp.concatenate([x_ref[n] for n in range(N)], axis=-1)     # (C, M) f32

    # ---- stage 1: y = bn1(relu(conv1(x))) --------------------------------
    im2col(None)
    y = batchnorm(conv_relu(w1_ref, b1), g1, bt1)

    # ---- stage 2: out = bn2(relu(conv2(y)) + x) --------------------------
    im2col(y)
    y = conv_relu(w2_ref, b2) + xT
    y = batchnorm(y, g2, bt2)

    # Lane-dense output store (256 dense lanes per sample).
    for n in range(N):
        o_ref[n] = y[:, n * HW:(n + 1) * HW]


@functools.partial(jax.jit, static_argnames=("kernel_size",))
def resblock2_forward(x_nchw, params, *, kernel_size):
    k = kernel_size
    p = (k - 1) // 2
    N, C, H, W = x_nchw.shape
    HW = H * W
    KKC = k * k * C
    # Lane-aligned zero margin large enough for the max tap shift p*W + p.
    pad = ((p * W + p + 127) // 128) * 128

    x = x_nchw.reshape(N, C, HW).astype(jnp.float32)

    # OIHW weights -> (Cout, k*k*Cin) im2col matrix (tap-major), bf16 for MXU.
    def wmat(w):
        return jnp.transpose(w, (0, 2, 3, 1)).reshape(C, KKC).astype(jnp.bfloat16)

    # Per-kw 0/1 validity mask for the W direction (H handled by zero margin).
    w_of = jnp.arange(HW, dtype=jnp.int32).reshape(1, HW) % W
    wmask = jnp.stack(
        [((w_of + kw - p >= 0) & (w_of + kw - p < W)).astype(jnp.float32)
         for kw in range(k)], axis=0)                               # (k, 1, HW)

    def col(v):  # (C,) -> (C, 1) for lane broadcast
        return v.reshape(C, 1).astype(jnp.float32)

    vmem = pl.BlockSpec(memory_space=pltpu.MemorySpace.VMEM)
    out = pl.pallas_call(
        functools.partial(_resblock2_kernel, k=k, N=N, H=H, W=W, C=C, pad=pad),
        out_shape=jax.ShapeDtypeStruct((N, C, HW), jnp.float32),
        in_specs=[vmem] * 10,
        out_specs=vmem,
        scratch_shapes=[
            pltpu.VMEM((N, C, HW + 2 * pad), jnp.float32),   # padded flat acts
            pltpu.VMEM((KKC, N * HW), jnp.bfloat16),         # im2col patches
        ],
    )(x, wmask,
      wmat(params["w1"]), col(params["b1"]), col(params["g1"]), col(params["beta1"]),
      wmat(params["w2"]), col(params["b2"]), col(params["g2"]), col(params["beta2"]))

    return out.reshape(N, C, H, W)


def resblock2_reference(x, params, *, kernel_size):
    """Pure-JAX f32 reference (lax.conv) for correctness checking."""
    p = (kernel_size - 1) // 2
    x = x.astype(jnp.float32)

    def conv(a, w, b):
        y = jax.lax.conv_general_dilated(
            a, w, window_strides=(1, 1), padding=[(p, p), (p, p)],
            dimension_numbers=("NCHW", "OIHW", "NCHW"))
        return y + b.reshape(1, -1, 1, 1)

    def bn(y, g, beta):
        m = jnp.mean(y, axis=(0, 2, 3), keepdims=True)
        v = jnp.mean((y - m) ** 2, axis=(0, 2, 3), keepdims=True)
        return (g.reshape(1, -1, 1, 1) * (y - m) * jax.lax.rsqrt(v + EPS)
                + beta.reshape(1, -1, 1, 1))

    y = jax.nn.relu(conv(x, params["w1"], params["b1"]))
    y = bn(y, params["g1"], params["beta1"])
    y = jax.nn.relu(conv(y, params["w2"], params["b2"]))
    y = y + x
    y = bn(y, params["g2"], params["beta2"])
    return y


if __name__ == "__main__":
    ksize = 3                       # ResBlock2(kernel_size=3)
    N, C, H, W = 2, 32, 16, 16      # conv1 requires 32 input channels

    key = jax.random.PRNGKey(0)
    kx, kw1, kb1, kw2, kb2 = jax.random.split(key, 5)
    x_nchw = jax.random.normal(kx, (N, C, H, W), dtype=jnp.float32)

    # deterministic synthetic params (PyTorch-default-style uniform bound)
    fan_in = C * ksize * ksize
    bound = 1.0 / math.sqrt(fan_in)
    params = dict(
        w1=jax.random.uniform(kw1, (C, C, ksize, ksize), jnp.float32, -bound, bound),
        b1=jax.random.uniform(kb1, (C,), jnp.float32, -bound, bound),
        g1=jnp.ones((C,), jnp.float32),
        beta1=jnp.zeros((C,), jnp.float32),
        w2=jax.random.uniform(kw2, (C, C, ksize, ksize), jnp.float32, -bound, bound),
        b2=jax.random.uniform(kb2, (C,), jnp.float32, -bound, bound),
        g2=jnp.ones((C,), jnp.float32),
        beta2=jnp.zeros((C,), jnp.float32),
    )

    out = jax.block_until_ready(resblock2_forward(x_nchw, params, kernel_size=ksize))
    ref = jax.block_until_ready(resblock2_reference(x_nchw, params, kernel_size=ksize))

    assert out.shape == (N, C, H, W)
    if not bool(jnp.allclose(out, ref, atol=2e-2, rtol=2e-2)):
        raise AssertionError(
            f"mismatch vs reference, max abs err = {float(jnp.max(jnp.abs(out - ref)))}")
    print("KERNEL_OK")
</pallas_src>

<mosaic_0001>
module attributes {stable_mosaic.version = 11 : i64} {
  func.func @_resblock2_kernel(%arg0: memref<2x32x256xf32, #tpu.memory_space<vmem>>, %arg1: memref<3x1x256xf32, #tpu.memory_space<vmem>>, %arg2: memref<32x288xbf16, #tpu.memory_space<vmem>>, %arg3: memref<32x1xf32, #tpu.memory_space<vmem>>, %arg4: memref<32x1xf32, #tpu.memory_space<vmem>>, %arg5: memref<32x1xf32, #tpu.memory_space<vmem>>, %arg6: memref<32x288xbf16, #tpu.memory_space<vmem>>, %arg7: memref<32x1xf32, #tpu.memory_space<vmem>>, %arg8: memref<32x1xf32, #tpu.memory_space<vmem>>, %arg9: memref<32x1xf32, #tpu.memory_space<vmem>>, %arg10: memref<2x32x256xf32, #tpu.memory_space<vmem>>, %arg11: memref<2x32x512xf32, #tpu.memory_space<vmem>>, %arg12: memref<288x512xbf16, #tpu.memory_space<vmem>>) attributes {dimension_semantics = [], scalar_prefetch = 0 : i64, scratch_operands = 2 : i64, tpu.core_type = #tpu.core_type<tc>} {
    %c0 = arith.constant 0 : index
    %c0_0 = arith.constant 0 : index
    %0 = vector.load %arg3[%c0, %c0_0] : memref<32x1xf32, #tpu.memory_space<vmem>>, vector<32x1xf32>
    %c0_1 = arith.constant 0 : index
    %c0_2 = arith.constant 0 : index
    %1 = vector.load %arg4[%c0_1, %c0_2] : memref<32x1xf32, #tpu.memory_space<vmem>>, vector<32x1xf32>
    %c0_3 = arith.constant 0 : index
    %c0_4 = arith.constant 0 : index
    %2 = vector.load %arg5[%c0_3, %c0_4] : memref<32x1xf32, #tpu.memory_space<vmem>>, vector<32x1xf32>
    %c0_5 = arith.constant 0 : index
    %c0_6 = arith.constant 0 : index
    %3 = vector.load %arg7[%c0_5, %c0_6] : memref<32x1xf32, #tpu.memory_space<vmem>>, vector<32x1xf32>
    %c0_7 = arith.constant 0 : index
    %c0_8 = arith.constant 0 : index
    %4 = vector.load %arg8[%c0_7, %c0_8] : memref<32x1xf32, #tpu.memory_space<vmem>>, vector<32x1xf32>
    %c0_9 = arith.constant 0 : index
    %c0_10 = arith.constant 0 : index
    %5 = vector.load %arg9[%c0_9, %c0_10] : memref<32x1xf32, #tpu.memory_space<vmem>>, vector<32x1xf32>
    %cst = arith.constant 0.000000e+00 : f32
    %6 = vector.broadcast %cst : f32 to vector<2x32x512xf32>
    %c0_11 = arith.constant 0 : index
    %c0_12 = arith.constant 0 : index
    %c0_13 = arith.constant 0 : index
    %7 = vector.load %arg11[%c0_11, %c0_12, %c0_13] : memref<2x32x512xf32, #tpu.memory_space<vmem>>, vector<2x32x512xf32>
    tpu.vector_store %arg11[%c0_11, %c0_12, %c0_13], %6 {strides = array<i32>} : memref<2x32x512xf32, #tpu.memory_space<vmem>>, vector<2x32x512xf32>,
    %c0_14 = arith.constant 0 : index
    %c0_15 = arith.constant 0 : index
    %c0_16 = arith.constant 0 : index
    %8 = vector.load %arg0[%c0_14, %c0_15, %c0_16] : memref<2x32x256xf32, #tpu.memory_space<vmem>>, vector<1x32x256xf32>
    %9 = vector.shape_cast %8 : vector<1x32x256xf32> to vector<32x256xf32>
    %c1 = arith.constant 1 : index
    %c0_17 = arith.constant 0 : index
    %c0_18 = arith.constant 0 : index
    %10 = vector.load %arg0[%c1, %c0_17, %c0_18] : memref<2x32x256xf32, #tpu.memory_space<vmem>>, vector<1x32x256xf32>
    %11 = vector.shape_cast %10 : vector<1x32x256xf32> to vector<32x256xf32>
    %12 = tpu.concatenate %9, %11 in 1 : vector<32x256xf32>, vector<32x256xf32> -> vector<32x512xf32>
    %c0_19 = arith.constant 0 : index
    %c0_20 = arith.constant 0 : index
    %c0_21 = arith.constant 0 : index
    %13 = vector.load %arg0[%c0_19, %c0_20, %c0_21] : memref<2x32x256xf32, #tpu.memory_space<vmem>>, vector<1x32x256xf32>
    %14 = vector.shape_cast %13 : vector<1x32x256xf32> to vector<32x256xf32>
    %c0_22 = arith.constant 0 : index
    %c0_23 = arith.constant 0 : index
    %c128 = arith.constant 128 : index
    %15 = vector.load %arg11[%c0_22, %c0_23, %c128] : memref<2x32x512xf32, #tpu.memory_space<vmem>>, vector<1x32x256xf32>
    %16 = vector.shape_cast %15 : vector<1x32x256xf32> to vector<32x256xf32>
    %17 = vector.shape_cast %14 : vector<32x256xf32> to vector<1x32x256xf32>
    tpu.vector_store %arg11[%c0_22, %c0_23, %c128], %17 {strides = array<i32>} : memref<2x32x512xf32, #tpu.memory_space<vmem>>, vector<1x32x256xf32>,
    %c1_24 = arith.constant 1 : index
    %c0_25 = arith.constant 0 : index
    %c0_26 = arith.constant 0 : index
    %18 = vector.load %arg0[%c1_24, %c0_25, %c0_26] : memref<2x32x256xf32, #tpu.memory_space<vmem>>, vector<1x32x256xf32>
    %19 = vector.shape_cast %18 : vector<1x32x256xf32> to vector<32x256xf32>
    %c1_27 = arith.constant 1 : index
    %c0_28 = arith.constant 0 : index
    %c128_29 = arith.constant 128 : index
    %20 = vector.load %arg11[%c1_27, %c0_28, %c128_29] : memref<2x32x512xf32, #tpu.memory_space<vmem>>, vector<1x32x256xf32>
    %21 = vector.shape_cast %20 : vector<1x32x256xf32> to vector<32x256xf32>
    %22 = vector.shape_cast %19 : vector<32x256xf32> to vector<1x32x256xf32>
    tpu.vector_store %arg11[%c1_27, %c0_28, %c128_29], %22 {strides = array<i32>} : memref<2x32x512xf32, #tpu.memory_space<vmem>>, vector<1x32x256xf32>,
    %c0_30 = arith.constant 0 : index
    %c0_31 = arith.constant 0 : index
    %c111 = arith.constant 111 : index
    %23 = vector.load %arg11[%c0_30, %c0_31, %c111] : memref<2x32x512xf32, #tpu.memory_space<vmem>>, vector<1x32x256xf32>
    %24 = vector.shape_cast %23 : vector<1x32x256xf32> to vector<32x256xf32>
    %c0_32 = arith.constant 0 : index
    %c0_33 = arith.constant 0 : index
    %c0_34 = arith.constant 0 : index
    %25 = vector.load %arg1[%c0_32, %c0_33, %c0_34] : memref<3x1x256xf32, #tpu.memory_space<vmem>>, vector<1x1x256xf32>
    %26 = vector.shape_cast %25 : vector<1x1x256xf32> to vector<1x256xf32>
    %27 = vector.broadcast %26 : vector<1x256xf32> to vector<32x256xf32>
    %28 = arith.mulf %24, %27 : vector<32x256xf32>
    %29 = arith.truncf %28 : vector<32x256xf32> to vector<32x256xbf16>
    %c0_35 = arith.constant 0 : index
    %c0_36 = arith.constant 0 : index
    %30 = vector.load %arg12[%c0_35, %c0_36] : memref<288x512xbf16, #tpu.memory_space<vmem>>, vector<32x256xbf16>
    tpu.vector_store %arg12[%c0_35, %c0_36], %29 {strides = array<i32>} : memref<288x512xbf16, #tpu.memory_space<vmem>>, vector<32x256xbf16>,
    %c0_37 = arith.constant 0 : index
    %c0_38 = arith.constant 0 : index
    %c112 = arith.constant 112 : index
    %31 = vector.load %arg11[%c0_37, %c0_38, %c112] : memref<2x32x512xf32, #tpu.memory_space<vmem>>, vector<1x32x256xf32>
    %32 = vector.shape_cast %31 : vector<1x32x256xf32> to vector<32x256xf32>
    %33 = arith.truncf %32 : vector<32x256xf32> to vector<32x256xbf16>
    %c32 = arith.constant 32 : index
    %c0_39 = arith.constant 0 : index
    %34 = vector.load %arg12[%c32, %c0_39] : memref<288x512xbf16, #tpu.memory_space<vmem>>, vector<32x256xbf16>
    tpu.vector_store %arg12[%c32, %c0_39], %33 {strides = array<i32>} : memref<288x512xbf16, #tpu.memory_space<vmem>>, vector<32x256xbf16>,
    %c0_40 = arith.constant 0 : index
    %c0_41 = arith.constant 0 : index
    %c113 = arith.constant 113 : index
    %35 = vector.load %arg11[%c0_40, %c0_41, %c113] : memref<2x32x512xf32, #tpu.memory_space<vmem>>, vector<1x32x256xf32>
    %36 = vector.shape_cast %35 : vector<1x32x256xf32> to vector<32x256xf32>
    %c2 = arith.constant 2 : index
    %c0_42 = arith.constant 0 : index
    %c0_43 = arith.constant 0 : index
    %37 = vector.load %arg1[%c2, %c0_42, %c0_43] : memref<3x1x256xf32, #tpu.memory_space<vmem>>, vector<1x1x256xf32>
    %38 = vector.shape_cast %37 : vector<1x1x256xf32> to vector<1x256xf32>
    %39 = vector.broadcast %38 : vector<1x256xf32> to vector<32x256xf32>
    %40 = arith.mulf %36, %39 : vector<32x256xf32>
    %41 = arith.truncf %40 : vector<32x256xf32> to vector<32x256xbf16>
    %c64 = arith.constant 64 : index
    %c0_44 = arith.constant 0 : index
    %42 = vector.load %arg12[%c64, %c0_44] : memref<288x512xbf16, #tpu.memory_space<vmem>>, vector<32x256xbf16>
    tpu.vector_store %arg12[%c64, %c0_44], %41 {strides = array<i32>} : memref<288x512xbf16, #tpu.memory_space<vmem>>, vector<32x256xbf16>,
    %c0_45 = arith.constant 0 : index
    %c0_46 = arith.constant 0 : index
    %c127 = arith.constant 127 : index
    %43 = vector.load %arg11[%c0_45, %c0_46, %c127] : memref<2x32x512xf32, #tpu.memory_space<vmem>>, vector<1x32x256xf32>
    %44 = vector.shape_cast %43 : vector<1x32x256xf32> to vector<32x256xf32>
    %c0_47 = arith.constant 0 : index
    %c0_48 = arith.constant 0 : index
    %c0_49 = arith.constant 0 : index
    %45 = vector.load %arg1[%c0_47, %c0_48, %c0_49] : memref<3x1x256xf32, #tpu.memory_space<vmem>>, vector<1x1x256xf32>
    %46 = vector.shape_cast %45 : vector<1x1x256xf32> to vector<1x256xf32>
    %47 = vector.broadcast %46 : vector<1x256xf32> to vector<32x256xf32>
    %48 = arith.mulf %44, %47 : vector<32x256xf32>
    %49 = arith.truncf %48 : vector<32x256xf32> to vector<32x256xbf16>
    %c96 = arith.constant 96 : index
    %c0_50 = arith.constant 0 : index
    %50 = vector.load %arg12[%c96, %c0_50] : memref<288x512xbf16, #tpu.memory_space<vmem>>, vector<32x256xbf16>
    tpu.vector_store %arg12[%c96, %c0_50], %49 {strides = array<i32>} : memref<288x512xbf16, #tpu.memory_space<vmem>>, vector<32x256xbf16>,
    %c0_51 = arith.constant 0 : index
    %c0_52 = arith.constant 0 : index
    %c128_53 = arith.constant 128 : index
    %51 = vector.load %arg11[%c0_51, %c0_52, %c128_53] : memref<2x32x512xf32, #tpu.memory_space<vmem>>, vector<1x32x256xf32>
    %52 = vector.shape_cast %51 : vector<1x32x256xf32> to vector<32x256xf32>
    %53 = arith.truncf %52 : vector<32x256xf32> to vector<32x256xbf16>
    %c128_54 = arith.constant 128 : index
    %c0_55 = arith.constant 0 : index
    %54 = vector.load %arg12[%c128_54, %c0_55] : memref<288x512xbf16, #tpu.memory_space<vmem>>, vector<32x256xbf16>
    tpu.vector_store %arg12[%c128_54, %c0_55], %53 {strides = array<i32>} : memref<288x512xbf16, #tpu.memory_space<vmem>>, vector<32x256xbf16>,
    %c0_56 = arith.constant 0 : index
    %c0_57 = arith.constant 0 : index
    %c129 = arith.constant 129 : index
    %55 = vector.load %arg11[%c0_56, %c0_57, %c129] : memref<2x32x512xf32, #tpu.memory_space<vmem>>, vector<1x32x256xf32>
    %56 = vector.shape_cast %55 : vector<1x32x256xf32> to vector<32x256xf32>
    %c2_58 = arith.constant 2 : index
    %c0_59 = arith.constant 0 : index
    %c0_60 = arith.constant 0 : index
    %57 = vector.load %arg1[%c2_58, %c0_59, %c0_60] : memref<3x1x256xf32, #tpu.memory_space<vmem>>, vector<1x1x256xf32>
    %58 = vector.shape_cast %57 : vector<1x1x256xf32> to vector<1x256xf32>
    %59 = vector.broadcast %58 : vector<1x256xf32> to vector<32x256xf32>
    %60 = arith.mulf %56, %59 : vector<32x256xf32>
    %61 = arith.truncf %60 : vector<32x256xf32> to vector<32x256xbf16>
    %c160 = arith.constant 160 : index
    %c0_61 = arith.constant 0 : index
    %62 = vector.load %arg12[%c160, %c0_61] : memref<288x512xbf16, #tpu.memory_space<vmem>>, vector<32x256xbf16>
    tpu.vector_store %arg12[%c160, %c0_61], %61 {strides = array<i32>} : memref<288x512xbf16, #tpu.memory_space<vmem>>, vector<32x256xbf16>,
    %c0_62 = arith.constant 0 : index
    %c0_63 = arith.constant 0 : index
    %c143 = arith.constant 143 : index
    %63 = vector.load %arg11[%c0_62, %c0_63, %c143] : memref<2x32x512xf32, #tpu.memory_space<vmem>>, vector<1x32x256xf32>
    %64 = vector.shape_cast %63 : vector<1x32x256xf32> to vector<32x256xf32>
    %c0_64 = arith.constant 0 : index
    %c0_65 = arith.constant 0 : index
    %c0_66 = arith.constant 0 : index
    %65 = vector.load %arg1[%c0_64, %c0_65, %c0_66] : memref<3x1x256xf32, #tpu.memory_space<vmem>>, vector<1x1x256xf32>
    %66 = vector.shape_cast %65 : vector<1x1x256xf32> to vector<1x256xf32>
    %67 = vector.broadcast %66 : vector<1x256xf32> to vector<32x256xf32>
    %68 = arith.mulf %64, %67 : vector<32x256xf32>
    %69 = arith.truncf %68 : vector<32x256xf32> to vector<32x256xbf16>
    %c192 = arith.constant 192 : index
    %c0_67 = arith.constant 0 : index
    %70 = vector.load %arg12[%c192, %c0_67] : memref<288x512xbf16, #tpu.memory_space<vmem>>, vector<32x256xbf16>
    tpu.vector_store %arg12[%c192, %c0_67], %69 {strides = array<i32>} : memref<288x512xbf16, #tpu.memory_space<vmem>>, vector<32x256xbf16>,
    %c0_68 = arith.constant 0 : index
    %c0_69 = arith.constant 0 : index
    %c144 = arith.constant 144 : index
    %71 = vector.load %arg11[%c0_68, %c0_69, %c144] : memref<2x32x512xf32, #tpu.memory_space<vmem>>, vector<1x32x256xf32>
    %72 = vector.shape_cast %71 : vector<1x32x256xf32> to vector<32x256xf32>
    %73 = arith.truncf %72 : vector<32x256xf32> to vector<32x256xbf16>
    %c224 = arith.constant 224 : index
    %c0_70 = arith.constant 0 : index
    %74 = vector.load %arg12[%c224, %c0_70] : memref<288x512xbf16, #tpu.memory_space<vmem>>, vector<32x256xbf16>
    tpu.vector_store %arg12[%c224, %c0_70], %73 {strides = array<i32>} : memref<288x512xbf16, #tpu.memory_space<vmem>>, vector<32x256xbf16>,
    %c0_71 = arith.constant 0 : index
    %c0_72 = arith.constant 0 : index
    %c145 = arith.constant 145 : index
    %75 = vector.load %arg11[%c0_71, %c0_72, %c145] : memref<2x32x512xf32, #tpu.memory_space<vmem>>, vector<1x32x256xf32>
    %76 = vector.shape_cast %75 : vector<1x32x256xf32> to vector<32x256xf32>
    %c2_73 = arith.constant 2 : index
    %c0_74 = arith.constant 0 : index
    %c0_75 = arith.constant 0 : index
    %77 = vector.load %arg1[%c2_73, %c0_74, %c0_75] : memref<3x1x256xf32, #tpu.memory_space<vmem>>, vector<1x1x256xf32>
    %78 = vector.shape_cast %77 : vector<1x1x256xf32> to vector<1x256xf32>
    %79 = vector.broadcast %78 : vector<1x256xf32> to vector<32x256xf32>
    %80 = arith.mulf %76, %79 : vector<32x256xf32>
    %81 = arith.truncf %80 : vector<32x256xf32> to vector<32x256xbf16>
    %c256 = arith.constant 256 : index
    %c0_76 = arith.constant 0 : index
    %82 = vector.load %arg12[%c256, %c0_76] : memref<288x512xbf16, #tpu.memory_space<vmem>>, vector<32x256xbf16>
    tpu.vector_store %arg12[%c256, %c0_76], %81 {strides = array<i32>} : memref<288x512xbf16, #tpu.memory_space<vmem>>, vector<32x256xbf16>,
    %c1_77 = arith.constant 1 : index
    %c0_78 = arith.constant 0 : index
    %c111_79 = arith.constant 111 : index
    %83 = vector.load %arg11[%c1_77, %c0_78, %c111_79] : memref<2x32x512xf32, #tpu.memory_space<vmem>>, vector<1x32x256xf32>
    %84 = vector.shape_cast %83 : vector<1x32x256xf32> to vector<32x256xf32>
    %c0_80 = arith.constant 0 : index
    %c0_81 = arith.constant 0 : index
    %c0_82 = arith.constant 0 : index
    %85 = vector.load %arg1[%c0_80, %c0_81, %c0_82] : memref<3x1x256xf32, #tpu.memory_space<vmem>>, vector<1x1x256xf32>
    %86 = vector.shape_cast %85 : vector<1x1x256xf32> to vector<1x256xf32>
    %87 = vector.broadcast %86 : vector<1x256xf32> to vector<32x256xf32>
    %88 = arith.mulf %84, %87 : vector<32x256xf32>
    %89 = arith.truncf %88 : vector<32x256xf32> to vector<32x256xbf16>
    %c0_83 = arith.constant 0 : index
    %c256_84 = arith.constant 256 : index
    %90 = vector.load %arg12[%c0_83, %c256_84] : memref<288x512xbf16, #tpu.memory_space<vmem>>, vector<32x256xbf16>
    tpu.vector_store %arg12[%c0_83, %c256_84], %89 {strides = array<i32>} : memref<288x512xbf16, #tpu.memory_space<vmem>>, vector<32x256xbf16>,
    %c1_85 = arith.constant 1 : index
    %c0_86 = arith.constant 0 : index
    %c112_87 = arith.constant 112 : index
    %91 = vector.load %arg11[%c1_85, %c0_86, %c112_87] : memref<2x32x512xf32, #tpu.memory_space<vmem>>, vector<1x32x256xf32>
    %92 = vector.shape_cast %91 : vector<1x32x256xf32> to vector<32x256xf32>
    %93 = arith.truncf %92 : vector<32x256xf32> to vector<32x256xbf16>
    %c32_88 = arith.constant 32 : index
    %c256_89 = arith.constant 256 : index
    %94 = vector.load %arg12[%c32_88, %c256_89] : memref<288x512xbf16, #tpu.memory_space<vmem>>, vector<32x256xbf16>
    tpu.vector_store %arg12[%c32_88, %c256_89], %93 {strides = array<i32>} : memref<288x512xbf16, #tpu.memory_space<vmem>>, vector<32x256xbf16>,
    %c1_90 = arith.constant 1 : index
    %c0_91 = arith.constant 0 : index
    %c113_92 = arith.constant 113 : index
    %95 = vector.load %arg11[%c1_90, %c0_91, %c113_92] : memref<2x32x512xf32, #tpu.memory_space<vmem>>, vector<1x32x256xf32>
    %96 = vector.shape_cast %95 : vector<1x32x256xf32> to vector<32x256xf32>
    %c2_93 = arith.constant 2 : index
    %c0_94 = arith.constant 0 : index
    %c0_95 = arith.constant 0 : index
    %97 = vector.load %arg1[%c2_93, %c0_94, %c0_95] : memref<3x1x256xf32, #tpu.memory_space<vmem>>, vector<1x1x256xf32>
    %98 = vector.shape_cast %97 : vector<1x1x256xf32> to vector<1x256xf32>
    %99 = vector.broadcast %98 : vector<1x256xf32> to vector<32x256xf32>
    %100 = arith.mulf %96, %99 : vector<32x256xf32>
    %101 = arith.truncf %100 : vector<32x256xf32> to vector<32x256xbf16>
    %c64_96 = arith.constant 64 : index
    %c256_97 = arith.constant 256 : index
    %102 = vector.load %arg12[%c64_96, %c256_97] : memref<288x512xbf16, #tpu.memory_space<vmem>>, vector<32x256xbf16>
    tpu.vector_store %arg12[%c64_96, %c256_97], %101 {strides = array<i32>} : memref<288x512xbf16, #tpu.memory_space<vmem>>, vector<32x256xbf16>,
    %c1_98 = arith.constant 1 : index
    %c0_99 = arith.constant 0 : index
    %c127_100 = arith.constant 127 : index
    %103 = vector.load %arg11[%c1_98, %c0_99, %c127_100] : memref<2x32x512xf32, #tpu.memory_space<vmem>>, vector<1x32x256xf32>
    %104 = vector.shape_cast %103 : vector<1x32x256xf32> to vector<32x256xf32>
    %c0_101 = arith.constant 0 : index
    %c0_102 = arith.constant 0 : index
    %c0_103 = arith.constant 0 : index
    %105 = vector.load %arg1[%c0_101, %c0_102, %c0_103] : memref<3x1x256xf32, #tpu.memory_space<vmem>>, vector<1x1x256xf32>
    %106 = vector.shape_cast %105 : vector<1x1x256xf32> to vector<1x256xf32>
    %107 = vector.broadcast %106 : vector<1x256xf32> to vector<32x256xf32>
    %108 = arith.mulf %104, %107 : vector<32x256xf32>
    %109 = arith.truncf %108 : vector<32x256xf32> to vector<32x256xbf16>
    %c96_104 = arith.constant 96 : index
    %c256_105 = arith.constant 256 : index
    %110 = vector.load %arg12[%c96_104, %c256_105] : memref<288x512xbf16, #tpu.memory_space<vmem>>, vector<32x256xbf16>
    tpu.vector_store %arg12[%c96_104, %c256_105], %109 {strides = array<i32>} : memref<288x512xbf16, #tpu.memory_space<vmem>>, vector<32x256xbf16>,
    %c1_106 = arith.constant 1 : index
    %c0_107 = arith.constant 0 : index
    %c128_108 = arith.constant 128 : index
    %111 = vector.load %arg11[%c1_106, %c0_107, %c128_108] : memref<2x32x512xf32, #tpu.memory_space<vmem>>, vector<1x32x256xf32>
    %112 = vector.shape_cast %111 : vector<1x32x256xf32> to vector<32x256xf32>
    %113 = arith.truncf %112 : vector<32x256xf32> to vector<32x256xbf16>
    %c128_109 = arith.constant 128 : index
    %c256_110 = arith.constant 256 : index
    %114 = vector.load %arg12[%c128_109, %c256_110] : memref<288x512xbf16, #tpu.memory_space<vmem>>, vector<32x256xbf16>
    tpu.vector_store %arg12[%c128_109, %c256_110], %113 {strides = array<i32>} : memref<288x512xbf16, #tpu.memory_space<vmem>>, vector<32x256xbf16>,
    %c1_111 = arith.constant 1 : index
    %c0_112 = arith.constant 0 : index
    %c129_113 = arith.constant 129 : index
    %115 = vector.load %arg11[%c1_111, %c0_112, %c129_113] : memref<2x32x512xf32, #tpu.memory_space<vmem>>, vector<1x32x256xf32>
    %116 = vector.shape_cast %115 : vector<1x32x256xf32> to vector<32x256xf32>
    %c2_114 = arith.constant 2 : index
    %c0_115 = arith.constant 0 : index
    %c0_116 = arith.constant 0 : index
    %117 = vector.load %arg1[%c2_114, %c0_115, %c0_116] : memref<3x1x256xf32, #tpu.memory_space<vmem>>, vector<1x1x256xf32>
    %118 = vector.shape_cast %117 : vector<1x1x256xf32> to vector<1x256xf32>
    %119 = vector.broadcast %118 : vector<1x256xf32> to vector<32x256xf32>
    %120 = arith.mulf %116, %119 : vector<32x256xf32>
    %121 = arith.truncf %120 : vector<32x256xf32> to vector<32x256xbf16>
    %c160_117 = arith.constant 160 : index
    %c256_118 = arith.constant 256 : index
    %122 = vector.load %arg12[%c160_117, %c256_118] : memref<288x512xbf16, #tpu.memory_space<vmem>>, vector<32x256xbf16>
    tpu.vector_store %arg12[%c160_117, %c256_118], %121 {strides = array<i32>} : memref<288x512xbf16, #tpu.memory_space<vmem>>, vector<32x256xbf16>,
    %c1_119 = arith.constant 1 : index
    %c0_120 = arith.constant 0 : index
    %c143_121 = arith.constant 143 : index
    %123 = vector.load %arg11[%c1_119, %c0_120, %c143_121] : memref<2x32x512xf32, #tpu.memory_space<vmem>>, vector<1x32x256xf32>
    %124 = vector.shape_cast %123 : vector<1x32x256xf32> to vector<32x256xf32>
    %c0_122 = arith.constant 0 : index
    %c0_123 = arith.constant 0 : index
    %c0_124 = arith.constant 0 : index
    %125 = vector.load %arg1[%c0_122, %c0_123, %c0_124] : memref<3x1x256xf32, #tpu.memory_space<vmem>>, vector<1x1x256xf32>
    %126 = vector.shape_cast %125 : vector<1x1x256xf32> to vector<1x256xf32>
    %127 = vector.broadcast %126 : vector<1x256xf32> to vector<32x256xf32>
    %128 = arith.mulf %124, %127 : vector<32x256xf32>
    %129 = arith.truncf %128 : vector<32x256xf32> to vector<32x256xbf16>
    %c192_125 = arith.constant 192 : index
    %c256_126 = arith.constant 256 : index
    %130 = vector.load %arg12[%c192_125, %c256_126] : memref<288x512xbf16, #tpu.memory_space<vmem>>, vector<32x256xbf16>
    tpu.vector_store %arg12[%c192_125, %c256_126], %129 {strides = array<i32>} : memref<288x512xbf16, #tpu.memory_space<vmem>>, vector<32x256xbf16>,
    %c1_127 = arith.constant 1 : index
    %c0_128 = arith.constant 0 : index
    %c144_129 = arith.constant 144 : index
    %131 = vector.load %arg11[%c1_127, %c0_128, %c144_129] : memref<2x32x512xf32, #tpu.memory_space<vmem>>, vector<1x32x256xf32>
    %132 = vector.shape_cast %131 : vector<1x32x256xf32> to vector<32x256xf32>
    %133 = arith.truncf %132 : vector<32x256xf32> to vector<32x256xbf16>
    %c224_130 = arith.constant 224 : index
    %c256_131 = arith.constant 256 : index
    %134 = vector.load %arg12[%c224_130, %c256_131] : memref<288x512xbf16, #tpu.memory_space<vmem>>, vector<32x256xbf16>
    tpu.vector_store %arg12[%c224_130, %c256_131], %133 {strides = array<i32>} : memref<288x512xbf16, #tpu.memory_space<vmem>>, vector<32x256xbf16>,
    %c1_132 = arith.constant 1 : index
    %c0_133 = arith.constant 0 : index
    %c145_134 = arith.constant 145 : index
    %135 = vector.load %arg11[%c1_132, %c0_133, %c145_134] : memref<2x32x512xf32, #tpu.memory_space<vmem>>, vector<1x32x256xf32>
    %136 = vector.shape_cast %135 : vector<1x32x256xf32> to vector<32x256xf32>
    %c2_135 = arith.constant 2 : index
    %c0_136 = arith.constant 0 : index
    %c0_137 = arith.constant 0 : index
    %137 = vector.load %arg1[%c2_135, %c0_136, %c0_137] : memref<3x1x256xf32, #tpu.memory_space<vmem>>, vector<1x1x256xf32>
    %138 = vector.shape_cast %137 : vector<1x1x256xf32> to vector<1x256xf32>
    %139 = vector.broadcast %138 : vector<1x256xf32> to vector<32x256xf32>
    %140 = arith.mulf %136, %139 : vector<32x256xf32>
    %141 = arith.truncf %140 : vector<32x256xf32> to vector<32x256xbf16>
    %c256_138 = arith.constant 256 : index
    %c256_139 = arith.constant 256 : index
    %142 = vector.load %arg12[%c256_138, %c256_139] : memref<288x512xbf16, #tpu.memory_space<vmem>>, vector<32x256xbf16>
    tpu.vector_store %arg12[%c256_138, %c256_139], %141 {strides = array<i32>} : memref<288x512xbf16, #tpu.memory_space<vmem>>, vector<32x256xbf16>,
    %c0_140 = arith.constant 0 : index
    %c0_141 = arith.constant 0 : index
    %143 = vector.load %arg2[%c0_140, %c0_141] : memref<32x288xbf16, #tpu.memory_space<vmem>>, vector<32x288xbf16>
    %c0_142 = arith.constant 0 : index
    %c0_143 = arith.constant 0 : index
    %144 = vector.load %arg12[%c0_142, %c0_143] : memref<288x512xbf16, #tpu.memory_space<vmem>>, vector<288x512xbf16>
    %cst_144 = arith.constant dense<0.000000e+00> : vector<32x512xf32>
    %145 = tpu.matmul %143, %144, %cst_144 {dimension_numbers = #tpu.dot_dimension_numbers<[1], [0], [0], [1], [0, 0, 1, 1], [], []>} : vector<32x288xbf16>, vector<288x512xbf16>, vector<32x512xf32> -> vector<32x512xf32>
    %146 = vector.broadcast %0 : vector<32x1xf32> to vector<32x512xf32>
    %147 = arith.addf %145, %146 : vector<32x512xf32>
    %cst_145 = arith.constant 0.000000e+00 : f32
    %148 = vector.broadcast %cst_145 : f32 to vector<32x512xf32>
    %149 = arith.maximumf %147, %148 : vector<32x512xf32>
    %cst_146 = arith.constant dense<0.000000e+00> : vector<32xf32>
    %150 = vector.multi_reduction <add>, %149, %cst_146 [1] : vector<32x512xf32> to vector<32xf32>
    %151 = vector.shape_cast %150 : vector<32xf32> to vector<32x1xf32>
    %cst_147 = arith.constant 0.001953125 : f32
    %152 = vector.broadcast %cst_147 : f32 to vector<32x1xf32>
    %153 = arith.mulf %151, %152 : vector<32x1xf32>
    %154 = vector.broadcast %153 : vector<32x1xf32> to vector<32x512xf32>
    %155 = arith.subf %149, %154 : vector<32x512xf32>
    %156 = arith.mulf %155, %155 : vector<32x512xf32>
    %cst_148 = arith.constant dense<0.000000e+00> : vector<32xf32>
    %157 = vector.multi_reduction <add>, %156, %cst_148 [1] : vector<32x512xf32> to vector<32xf32>
    %158 = vector.shape_cast %157 : vector<32xf32> to vector<32x1xf32>
    %cst_149 = arith.constant 0.001953125 : f32
    %159 = vector.broadcast %cst_149 : f32 to vector<32x1xf32>
    %160 = arith.mulf %158, %159 : vector<32x1xf32>
    %cst_150 = arith.constant 9.99999974E-6 : f32
    %161 = vector.broadcast %cst_150 : f32 to vector<32x1xf32>
    %162 = arith.addf %160, %161 : vector<32x1xf32>
    %163 = math.rsqrt %162 : vector<32x1xf32>
    %164 = arith.mulf %1, %163 : vector<32x1xf32>
    %165 = vector.broadcast %164 : vector<32x1xf32> to vector<32x512xf32>
    %166 = arith.mulf %155, %165 : vector<32x512xf32>
    %167 = vector.broadcast %2 : vector<32x1xf32> to vector<32x512xf32>
    %168 = arith.addf %166, %167 : vector<32x512xf32>
    %169 = vector.extract_strided_slice %168 {offsets = [0, 0], sizes = [32, 256], strides = [1, 1]} : vector<32x512xf32> to vector<32x256xf32>
    %c0_151 = arith.constant 0 : index
    %c0_152 = arith.constant 0 : index
    %c128_153 = arith.constant 128 : index
    %170 = vector.load %arg11[%c0_151, %c0_152, %c128_153] : memref<2x32x512xf32, #tpu.memory_space<vmem>>, vector<1x32x256xf32>
    %171 = vector.shape_cast %170 : vector<1x32x256xf32> to vector<32x256xf32>
    %172 = vector.shape_cast %169 : vector<32x256xf32> to vector<1x32x256xf32>
    tpu.vector_store %arg11[%c0_151, %c0_152, %c128_153], %172 {strides = array<i32>} : memref<2x32x512xf32, #tpu.memory_space<vmem>>, vector<1x32x256xf32>,
    %173 = vector.extract_strided_slice %168 {offsets = [0, 256], sizes = [32, 256], strides = [1, 1]} : vector<32x512xf32> to vector<32x256xf32>
    %c1_154 = arith.constant 1 : index
    %c0_155 = arith.constant 0 : index
    %c128_156 = arith.constant 128 : index
    %174 = vector.load %arg11[%c1_154, %c0_155, %c128_156] : memref<2x32x512xf32, #tpu.memory_space<vmem>>, vector<1x32x256xf32>
    %175 = vector.shape_cast %174 : vector<1x32x256xf32> to vector<32x256xf32>
    %176 = vector.shape_cast %173 : vector<32x256xf32> to vector<1x32x256xf32>
    tpu.vector_store %arg11[%c1_154, %c0_155, %c128_156], %176 {strides = array<i32>} : memref<2x32x512xf32, #tpu.memory_space<vmem>>, vector<1x32x256xf32>,
    %c0_157 = arith.constant 0 : index
    %c0_158 = arith.constant 0 : index
    %c111_159 = arith.constant 111 : index
    %177 = vector.load %arg11[%c0_157, %c0_158, %c111_159] : memref<2x32x512xf32, #tpu.memory_space<vmem>>, vector<1x32x256xf32>
    %178 = vector.shape_cast %177 : vector<1x32x256xf32> to vector<32x256xf32>
    %c0_160 = arith.constant 0 : index
    %c0_161 = arith.constant 0 : index
    %c0_162 = arith.constant 0 : index
    %179 = vector.load %arg1[%c0_160, %c0_161, %c0_162] : memref<3x1x256xf32, #tpu.memory_space<vmem>>, vector<1x1x256xf32>
    %180 = vector.shape_cast %179 : vector<1x1x256xf32> to vector<1x256xf32>
    %181 = vector.broadcast %180 : vector<1x256xf32> to vector<32x256xf32>
    %182 = arith.mulf %178, %181 : vector<32x256xf32>
    %183 = arith.truncf %182 : vector<32x256xf32> to vector<32x256xbf16>
    %c0_163 = arith.constant 0 : index
    %c0_164 = arith.constant 0 : index
    %184 = vector.load %arg12[%c0_163, %c0_164] : memref<288x512xbf16, #tpu.memory_space<vmem>>, vector<32x256xbf16>
    tpu.vector_store %arg12[%c0_163, %c0_164], %183 {strides = array<i32>} : memref<288x512xbf16, #tpu.memory_space<vmem>>, vector<32x256xbf16>,
    %c0_165 = arith.constant 0 : index
    %c0_166 = arith.constant 0 : index
    %c112_167 = arith.constant 112 : index
    %185 = vector.load %arg11[%c0_165, %c0_166, %c112_167] : memref<2x32x512xf32, #tpu.memory_space<vmem>>, vector<1x32x256xf32>
    %186 = vector.shape_cast %185 : vector<1x32x256xf32> to vector<32x256xf32>
    %187 = arith.truncf %186 : vector<32x256xf32> to vector<32x256xbf16>
    %c32_168 = arith.constant 32 : index
    %c0_169 = arith.constant 0 : index
    %188 = vector.load %arg12[%c32_168, %c0_169] : memref<288x512xbf16, #tpu.memory_space<vmem>>, vector<32x256xbf16>
    tpu.vector_store %arg12[%c32_168, %c0_169], %187 {strides = array<i32>} : memref<288x512xbf16, #tpu.memory_space<vmem>>, vector<32x256xbf16>,
    %c0_170 = arith.constant 0 : index
    %c0_171 = arith.constant 0 : index
    %c113_172 = arith.constant 113 : index
    %189 = vector.load %arg11[%c0_170, %c0_171, %c113_172] : memref<2x32x512xf32, #tpu.memory_space<vmem>>, vector<1x32x256xf32>
    %190 = vector.shape_cast %189 : vector<1x32x256xf32> to vector<32x256xf32>
    %c2_173 = arith.constant 2 : index
    %c0_174 = arith.constant 0 : index
    %c0_175 = arith.constant 0 : index
    %191 = vector.load %arg1[%c2_173, %c0_174, %c0_175] : memref<3x1x256xf32, #tpu.memory_space<vmem>>, vector<1x1x256xf32>
    %192 = vector.shape_cast %191 : vector<1x1x256xf32> to vector<1x256xf32>
    %193 = vector.broadcast %192 : vector<1x256xf32> to vector<32x256xf32>
    %194 = arith.mulf %190, %193 : vector<32x256xf32>
    %195 = arith.truncf %194 : vector<32x256xf32> to vector<32x256xbf16>
    %c64_176 = arith.constant 64 : index
    %c0_177 = arith.constant 0 : index
    %196 = vector.load %arg12[%c64_176, %c0_177] : memref<288x512xbf16, #tpu.memory_space<vmem>>, vector<32x256xbf16>
    tpu.vector_store %arg12[%c64_176, %c0_177], %195 {strides = array<i32>} : memref<288x512xbf16, #tpu.memory_space<vmem>>, vector<32x256xbf16>,
    %c0_178 = arith.constant 0 : index
    %c0_179 = arith.constant 0 : index
    %c127_180 = arith.constant 127 : index
    %197 = vector.load %arg11[%c0_178, %c0_179, %c127_180] : memref<2x32x512xf32, #tpu.memory_space<vmem>>, vector<1x32x256xf32>
    %198 = vector.shape_cast %197 : vector<1x32x256xf32> to vector<32x256xf32>
    %c0_181 = arith.constant 0 : index
    %c0_182 = arith.constant 0 : index
    %c0_183 = arith.constant 0 : index
    %199 = vector.load %arg1[%c0_181, %c0_182, %c0_183] : memref<3x1x256xf32, #tpu.memory_space<vmem>>, vector<1x1x256xf32>
    %200 = vector.shape_cast %199 : vector<1x1x256xf32> to vector<1x256xf32>
    %201 = vector.broadcast %200 : vector<1x256xf32> to vector<32x256xf32>
    %202 = arith.mulf %198, %201 : vector<32x256xf32>
    %203 = arith.truncf %202 : vector<32x256xf32> to vector<32x256xbf16>
    %c96_184 = arith.constant 96 : index
    %c0_185 = arith.constant 0 : index
    %204 = vector.load %arg12[%c96_184, %c0_185] : memref<288x512xbf16, #tpu.memory_space<vmem>>, vector<32x256xbf16>
    tpu.vector_store %arg12[%c96_184, %c0_185], %203 {strides = array<i32>} : memref<288x512xbf16, #tpu.memory_space<vmem>>, vector<32x256xbf16>,
    %c0_186 = arith.constant 0 : index
    %c0_187 = arith.constant 0 : index
    %c128_188 = arith.constant 128 : index
    %205 = vector.load %arg11[%c0_186, %c0_187, %c128_188] : memref<2x32x512xf32, #tpu.memory_space<vmem>>, vector<1x32x256xf32>
    %206 = vector.shape_cast %205 : vector<1x32x256xf32> to vector<32x256xf32>
    %207 = arith.truncf %206 : vector<32x256xf32> to vector<32x256xbf16>
    %c128_189 = arith.constant 128 : index
    %c0_190 = arith.constant 0 : index
    %208 = vector.load %arg12[%c128_189, %c0_190] : memref<288x512xbf16, #tpu.memory_space<vmem>>, vector<32x256xbf16>
    tpu.vector_store %arg12[%c128_189, %c0_190], %207 {strides = array<i32>} : memref<288x512xbf16, #tpu.memory_space<vmem>>, vector<32x256xbf16>,
    %c0_191 = arith.constant 0 : index
    %c0_192 = arith.constant 0 : index
    %c129_193 = arith.constant 129 : index
    %209 = vector.load %arg11[%c0_191, %c0_192, %c129_193] : memref<2x32x512xf32, #tpu.memory_space<vmem>>, vector<1x32x256xf32>
    %210 = vector.shape_cast %209 : vector<1x32x256xf32> to vector<32x256xf32>
    %c2_194 = arith.constant 2 : index
    %c0_195 = arith.constant 0 : index
    %c0_196 = arith.constant 0 : index
    %211 = vector.load %arg1[%c2_194, %c0_195, %c0_196] : memref<3x1x256xf32, #tpu.memory_space<vmem>>, vector<1x1x256xf32>
    %212 = vector.shape_cast %211 : vector<1x1x256xf32> to vector<1x256xf32>
    %213 = vector.broadcast %212 : vector<1x256xf32> to vector<32x256xf32>
    %214 = arith.mulf %210, %213 : vector<32x256xf32>
    %215 = arith.truncf %214 : vector<32x256xf32> to vector<32x256xbf16>
    %c160_197 = arith.constant 160 : index
    %c0_198 = arith.constant 0 : index
    %216 = vector.load %arg12[%c160_197, %c0_198] : memref<288x512xbf16, #tpu.memory_space<vmem>>, vector<32x256xbf16>
    tpu.vector_store %arg12[%c160_197, %c0_198], %215 {strides = array<i32>} : memref<288x512xbf16, #tpu.memory_space<vmem>>, vector<32x256xbf16>,
    %c0_199 = arith.constant 0 : index
    %c0_200 = arith.constant 0 : index
    %c143_201 = arith.constant 143 : index
    %217 = vector.load %arg11[%c0_199, %c0_200, %c143_201] : memref<2x32x512xf32, #tpu.memory_space<vmem>>, vector<1x32x256xf32>
    %218 = vector.shape_cast %217 : vector<1x32x256xf32> to vector<32x256xf32>
    %c0_202 = arith.constant 0 : index
    %c0_203 = arith.constant 0 : index
    %c0_204 = arith.constant 0 : index
    %219 = vector.load %arg1[%c0_202, %c0_203, %c0_204] : memref<3x1x256xf32, #tpu.memory_space<vmem>>, vector<1x1x256xf32>
    %220 = vector.shape_cast %219 : vector<1x1x256xf32> to vector<1x256xf32>
    %221 = vector.broadcast %220 : vector<1x256xf32> to vector<32x256xf32>
    %222 = arith.mulf %218, %221 : vector<32x256xf32>
    %223 = arith.truncf %222 : vector<32x256xf32> to vector<32x256xbf16>
    %c192_205 = arith.constant 192 : index
    %c0_206 = arith.constant 0 : index
    %224 = vector.load %arg12[%c192_205, %c0_206] : memref<288x512xbf16, #tpu.memory_space<vmem>>, vector<32x256xbf16>
    tpu.vector_store %arg12[%c192_205, %c0_206], %223 {strides = array<i32>} : memref<288x512xbf16, #tpu.memory_space<vmem>>, vector<32x256xbf16>,
    %c0_207 = arith.constant 0 : index
    %c0_208 = arith.constant 0 : index
    %c144_209 = arith.constant 144 : index
    %225 = vector.load %arg11[%c0_207, %c0_208, %c144_209] : memref<2x32x512xf32, #tpu.memory_space<vmem>>, vector<1x32x256xf32>
    %226 = vector.shape_cast %225 : vector<1x32x256xf32> to vector<32x256xf32>
    %227 = arith.truncf %226 : vector<32x256xf32> to vector<32x256xbf16>
    %c224_210 = arith.constant 224 : index
    %c0_211 = arith.constant 0 : index
    %228 = vector.load %arg12[%c224_210, %c0_211] : memref<288x512xbf16, #tpu.memory_space<vmem>>, vector<32x256xbf16>
    tpu.vector_store %arg12[%c224_210, %c0_211], %227 {strides = array<i32>} : memref<288x512xbf16, #tpu.memory_space<vmem>>, vector<32x256xbf16>,
    %c0_212 = arith.constant 0 : index
    %c0_213 = arith.constant 0 : index
    %c145_214 = arith.constant 145 : index
    %229 = vector.load %arg11[%c0_212, %c0_213, %c145_214] : memref<2x32x512xf32, #tpu.memory_space<vmem>>, vector<1x32x256xf32>
    %230 = vector.shape_cast %229 : vector<1x32x256xf32> to vector<32x256xf32>
    %c2_215 = arith.constant 2 : index
    %c0_216 = arith.constant 0 : index
    %c0_217 = arith.constant 0 : index
    %231 = vector.load %arg1[%c2_215, %c0_216, %c0_217] : memref<3x1x256xf32, #tpu.memory_space<vmem>>, vector<1x1x256xf32>
    %232 = vector.shape_cast %231 : vector<1x1x256xf32> to vector<1x256xf32>
    %233 = vector.broadcast %232 : vector<1x256xf32> to vector<32x256xf32>
    %234 = arith.mulf %230, %233 : vector<32x256xf32>
    %235 = arith.truncf %234 : vector<32x256xf32> to vector<32x256xbf16>
    %c256_218 = arith.constant 256 : index
    %c0_219 = arith.constant 0 : index
    %236 = vector.load %arg12[%c256_218, %c0_219] : memref<288x512xbf16, #tpu.memory_space<vmem>>, vector<32x256xbf16>
    tpu.vector_store %arg12[%c256_218, %c0_219], %235 {strides = array<i32>} : memref<288x512xbf16, #tpu.memory_space<vmem>>, vector<32x256xbf16>,
    %c1_220 = arith.constant 1 : index
    %c0_221 = arith.constant 0 : index
    %c111_222 = arith.constant 111 : index
    %237 = vector.load %arg11[%c1_220, %c0_221, %c111_222] : memref<2x32x512xf32, #tpu.memory_space<vmem>>, vector<1x32x256xf32>
    %238 = vector.shape_cast %237 : vector<1x32x256xf32> to vector<32x256xf32>
    %c0_223 = arith.constant 0 : index
    %c0_224 = arith.constant 0 : index
    %c0_225 = arith.constant 0 : index
    %239 = vector.load %arg1[%c0_223, %c0_224, %c0_225] : memref<3x1x256xf32, #tpu.memory_space<vmem>>, vector<1x1x256xf32>
    %240 = vector.shape_cast %239 : vector<1x1x256xf32> to vector<1x256xf32>
    %241 = vector.broadcast %240 : vector<1x256xf32> to vector<32x256xf32>
    %242 = arith.mulf %238, %241 : vector<32x256xf32>
    %243 = arith.truncf %242 : vector<32x256xf32> to vector<32x256xbf16>
    %c0_226 = arith.constant 0 : index
    %c256_227 = arith.constant 256 : index
    %244 = vector.load %arg12[%c0_226, %c256_227] : memref<288x512xbf16, #tpu.memory_space<vmem>>, vector<32x256xbf16>
    tpu.vector_store %arg12[%c0_226, %c256_227], %243 {strides = array<i32>} : memref<288x512xbf16, #tpu.memory_space<vmem>>, vector<32x256xbf16>,
    %c1_228 = arith.constant 1 : index
    %c0_229 = arith.constant 0 : index
    %c112_230 = arith.constant 112 : index
    %245 = vector.load %arg11[%c1_228, %c0_229, %c112_230] : memref<2x32x512xf32, #tpu.memory_space<vmem>>, vector<1x32x256xf32>
    %246 = vector.shape_cast %245 : vector<1x32x256xf32> to vector<32x256xf32>
    %247 = arith.truncf %246 : vector<32x256xf32> to vector<32x256xbf16>
    %c32_231 = arith.constant 32 : index
    %c256_232 = arith.constant 256 : index
    %248 = vector.load %arg12[%c32_231, %c256_232] : memref<288x512xbf16, #tpu.memory_space<vmem>>, vector<32x256xbf16>
    tpu.vector_store %arg12[%c32_231, %c256_232], %247 {strides = array<i32>} : memref<288x512xbf16, #tpu.memory_space<vmem>>, vector<32x256xbf16>,
    %c1_233 = arith.constant 1 : index
    %c0_234 = arith.constant 0 : index
    %c113_235 = arith.constant 113 : index
    %249 = vector.load %arg11[%c1_233, %c0_234, %c113_235] : memref<2x32x512xf32, #tpu.memory_space<vmem>>, vector<1x32x256xf32>
    %250 = vector.shape_cast %249 : vector<1x32x256xf32> to vector<32x256xf32>
    %c2_236 = arith.constant 2 : index
    %c0_237 = arith.constant 0 : index
    %c0_238 = arith.constant 0 : index
    %251 = vector.load %arg1[%c2_236, %c0_237, %c0_238] : memref<3x1x256xf32, #tpu.memory_space<vmem>>, vector<1x1x256xf32>
    %252 = vector.shape_cast %251 : vector<1x1x256xf32> to vector<1x256xf32>
    %253 = vector.broadcast %252 : vector<1x256xf32> to vector<32x256xf32>
    %254 = arith.mulf %250, %253 : vector<32x256xf32>
    %255 = arith.truncf %254 : vector<32x256xf32> to vector<32x256xbf16>
    %c64_239 = arith.constant 64 : index
    %c256_240 = arith.constant 256 : index
    %256 = vector.load %arg12[%c64_239, %c256_240] : memref<288x512xbf16, #tpu.memory_space<vmem>>, vector<32x256xbf16>
    tpu.vector_store %arg12[%c64_239, %c256_240], %255 {strides = array<i32>} : memref<288x512xbf16, #tpu.memory_space<vmem>>, vector<32x256xbf16>,
    %c1_241 = arith.constant 1 : index
    %c0_242 = arith.constant 0 : index
    %c127_243 = arith.constant 127 : index
    %257 = vector.load %arg11[%c1_241, %c0_242, %c127_243] : memref<2x32x512xf32, #tpu.memory_space<vmem>>, vector<1x32x256xf32>
    %258 = vector.shape_cast %257 : vector<1x32x256xf32> to vector<32x256xf32>
    %c0_244 = arith.constant 0 : index
    %c0_245 = arith.constant 0 : index
    %c0_246 = arith.constant 0 : index
    %259 = vector.load %arg1[%c0_244, %c0_245, %c0_246] : memref<3x1x256xf32, #tpu.memory_space<vmem>>, vector<1x1x256xf32>
    %260 = vector.shape_cast %259 : vector<1x1x256xf32> to vector<1x256xf32>
    %261 = vector.broadcast %260 : vector<1x256xf32> to vector<32x256xf32>
    %262 = arith.mulf %258, %261 : vector<32x256xf32>
    %263 = arith.truncf %262 : vector<32x256xf32> to vector<32x256xbf16>
    %c96_247 = arith.constant 96 : index
    %c256_248 = arith.constant 256 : index
    %264 = vector.load %arg12[%c96_247, %c256_248] : memref<288x512xbf16, #tpu.memory_space<vmem>>, vector<32x256xbf16>
    tpu.vector_store %arg12[%c96_247, %c256_248], %263 {strides = array<i32>} : memref<288x512xbf16, #tpu.memory_space<vmem>>, vector<32x256xbf16>,
    %c1_249 = arith.constant 1 : index
    %c0_250 = arith.constant 0 : index
    %c128_251 = arith.constant 128 : index
    %265 = vector.load %arg11[%c1_249, %c0_250, %c128_251] : memref<2x32x512xf32, #tpu.memory_space<vmem>>, vector<1x32x256xf32>
    %266 = vector.shape_cast %265 : vector<1x32x256xf32> to vector<32x256xf32>
    %267 = arith.truncf %266 : vector<32x256xf32> to vector<32x256xbf16>
    %c128_252 = arith.constant 128 : index
    %c256_253 = arith.constant 256 : index
    %268 = vector.load %arg12[%c128_252, %c256_253] : memref<288x512xbf16, #tpu.memory_space<vmem>>, vector<32x256xbf16>
    tpu.vector_store %arg12[%c128_252, %c256_253], %267 {strides = array<i32>} : memref<288x512xbf16, #tpu.memory_space<vmem>>, vector<32x256xbf16>,
    %c1_254 = arith.constant 1 : index
    %c0_255 = arith.constant 0 : index
    %c129_256 = arith.constant 129 : index
    %269 = vector.load %arg11[%c1_254, %c0_255, %c129_256] : memref<2x32x512xf32, #tpu.memory_space<vmem>>, vector<1x32x256xf32>
    %270 = vector.shape_cast %269 : vector<1x32x256xf32> to vector<32x256xf32>
    %c2_257 = arith.constant 2 : index
    %c0_258 = arith.constant 0 : index
    %c0_259 = arith.constant 0 : index
    %271 = vector.load %arg1[%c2_257, %c0_258, %c0_259] : memref<3x1x256xf32, #tpu.memory_space<vmem>>, vector<1x1x256xf32>
    %272 = vector.shape_cast %271 : vector<1x1x256xf32> to vector<1x256xf32>
    %273 = vector.broadcast %272 : vector<1x256xf32> to vector<32x256xf32>
    %274 = arith.mulf %270, %273 : vector<32x256xf32>
    %275 = arith.truncf %274 : vector<32x256xf32> to vector<32x256xbf16>
    %c160_260 = arith.constant 160 : index
    %c256_261 = arith.constant 256 : index
    %276 = vector.load %arg12[%c160_260, %c256_261] : memref<288x512xbf16, #tpu.memory_space<vmem>>, vector<32x256xbf16>
    tpu.vector_store %arg12[%c160_260, %c256_261], %275 {strides = array<i32>} : memref<288x512xbf16, #tpu.memory_space<vmem>>, vector<32x256xbf16>,
    %c1_262 = arith.constant 1 : index
    %c0_263 = arith.constant 0 : index
    %c143_264 = arith.constant 143 : index
    %277 = vector.load %arg11[%c1_262, %c0_263, %c143_264] : memref<2x32x512xf32, #tpu.memory_space<vmem>>, vector<1x32x256xf32>
    %278 = vector.shape_cast %277 : vector<1x32x256xf32> to vector<32x256xf32>
    %c0_265 = arith.constant 0 : index
    %c0_266 = arith.constant 0 : index
    %c0_267 = arith.constant 0 : index
    %279 = vector.load %arg1[%c0_265, %c0_266, %c0_267] : memref<3x1x256xf32, #tpu.memory_space<vmem>>, vector<1x1x256xf32>
    %280 = vector.shape_cast %279 : vector<1x1x256xf32> to vector<1x256xf32>
    %281 = vector.broadcast %280 : vector<1x256xf32> to vector<32x256xf32>
    %282 = arith.mulf %278, %281 : vector<32x256xf32>
    %283 = arith.truncf %282 : vector<32x256xf32> to vector<32x256xbf16>
    %c192_268 = arith.constant 192 : index
    %c256_269 = arith.constant 256 : index
    %284 = vector.load %arg12[%c192_268, %c256_269] : memref<288x512xbf16, #tpu.memory_space<vmem>>, vector<32x256xbf16>
    tpu.vector_store %arg12[%c192_268, %c256_269], %283 {strides = array<i32>} : memref<288x512xbf16, #tpu.memory_space<vmem>>, vector<32x256xbf16>,
    %c1_270 = arith.constant 1 : index
    %c0_271 = arith.constant 0 : index
    %c144_272 = arith.constant 144 : index
    %285 = vector.load %arg11[%c1_270, %c0_271, %c144_272] : memref<2x32x512xf32, #tpu.memory_space<vmem>>, vector<1x32x256xf32>
    %286 = vector.shape_cast %285 : vector<1x32x256xf32> to vector<32x256xf32>
    %287 = arith.truncf %286 : vector<32x256xf32> to vector<32x256xbf16>
    %c224_273 = arith.constant 224 : index
    %c256_274 = arith.constant 256 : index
    %288 = vector.load %arg12[%c224_273, %c256_274] : memref<288x512xbf16, #tpu.memory_space<vmem>>, vector<32x256xbf16>
    tpu.vector_store %arg12[%c224_273, %c256_274], %287 {strides = array<i32>} : memref<288x512xbf16, #tpu.memory_space<vmem>>, vector<32x256xbf16>,
    %c1_275 = arith.constant 1 : index
    %c0_276 = arith.constant 0 : index
    %c145_277 = arith.constant 145 : index
    %289 = vector.load %arg11[%c1_275, %c0_276, %c145_277] : memref<2x32x512xf32, #tpu.memory_space<vmem>>, vector<1x32x256xf32>
    %290 = vector.shape_cast %289 : vector<1x32x256xf32> to vector<32x256xf32>
    %c2_278 = arith.constant 2 : index
    %c0_279 = arith.constant 0 : index
    %c0_280 = arith.constant 0 : index
    %291 = vector.load %arg1[%c2_278, %c0_279, %c0_280] : memref<3x1x256xf32, #tpu.memory_space<vmem>>, vector<1x1x256xf32>
    %292 = vector.shape_cast %291 : vector<1x1x256xf32> to vector<1x256xf32>
    %293 = vector.broadcast %292 : vector<1x256xf32> to vector<32x256xf32>
    %294 = arith.mulf %290, %293 : vector<32x256xf32>
    %295 = arith.truncf %294 : vector<32x256xf32> to vector<32x256xbf16>
    %c256_281 = arith.constant 256 : index
    %c256_282 = arith.constant 256 : index
    %296 = vector.load %arg12[%c256_281, %c256_282] : memref<288x512xbf16, #tpu.memory_space<vmem>>, vector<32x256xbf16>
    tpu.vector_store %arg12[%c256_281, %c256_282], %295 {strides = array<i32>} : memref<288x512xbf16, #tpu.memory_space<vmem>>, vector<32x256xbf16>,
    %c0_283 = arith.constant 0 : index
    %c0_284 = arith.constant 0 : index
    %297 = vector.load %arg6[%c0_283, %c0_284] : memref<32x288xbf16, #tpu.memory_space<vmem>>, vector<32x288xbf16>
    %c0_285 = arith.constant 0 : index
    %c0_286 = arith.constant 0 : index
    %298 = vector.load %arg12[%c0_285, %c0_286] : memref<288x512xbf16, #tpu.memory_space<vmem>>, vector<288x512xbf16>
    %cst_287 = arith.constant dense<0.000000e+00> : vector<32x512xf32>
    %299 = tpu.matmul %297, %298, %cst_287 {dimension_numbers = #tpu.dot_dimension_numbers<[1], [0], [0], [1], [0, 0, 1, 1], [], []>} : vector<32x288xbf16>, vector<288x512xbf16>, vector<32x512xf32> -> vector<32x512xf32>
    %300 = vector.broadcast %3 : vector<32x1xf32> to vector<32x512xf32>
    %301 = arith.addf %299, %300 : vector<32x512xf32>
    %cst_288 = arith.constant 0.000000e+00 : f32
    %302 = vector.broadcast %cst_288 : f32 to vector<32x512xf32>
    %303 = arith.maximumf %301, %302 : vector<32x512xf32>
    %304 = arith.addf %303, %12 : vector<32x512xf32>
    %cst_289 = arith.constant dense<0.000000e+00> : vector<32xf32>
    %305 = vector.multi_reduction <add>, %304, %cst_289 [1] : vector<32x512xf32> to vector<32xf32>
    %306 = vector.shape_cast %305 : vector<32xf32> to vector<32x1xf32>
    %cst_290 = arith.constant 0.001953125 : f32
    %307 = vector.broadcast %cst_290 : f32 to vector<32x1xf32>
    %308 = arith.mulf %306, %307 : vector<32x1xf32>
    %309 = vector.broadcast %308 : vector<32x1xf32> to vector<32x512xf32>
    %310 = arith.subf %304, %309 : vector<32x512xf32>
    %311 = arith.mulf %310, %310 : vector<32x512xf32>
    %cst_291 = arith.constant dense<0.000000e+00> : vector<32xf32>
    %312 = vector.multi_reduction <add>, %311, %cst_291 [1] : vector<32x512xf32> to vector<32xf32>
    %313 = vector.shape_cast %312 : vector<32xf32> to vector<32x1xf32>
    %cst_292 = arith.constant 0.001953125 : f32
    %314 = vector.broadcast %cst_292 : f32 to vector<32x1xf32>
    %315 = arith.mulf %313, %314 : vector<32x1xf32>
    %cst_293 = arith.constant 9.99999974E-6 : f32
    %316 = vector.broadcast %cst_293 : f32 to vector<32x1xf32>
    %317 = arith.addf %315, %316 : vector<32x1xf32>
    %318 = math.rsqrt %317 : vector<32x1xf32>
    %319 = arith.mulf %4, %318 : vector<32x1xf32>
    %320 = vector.broadcast %319 : vector<32x1xf32> to vector<32x512xf32>
    %321 = arith.mulf %310, %320 : vector<32x512xf32>
    %322 = vector.broadcast %5 : vector<32x1xf32> to vector<32x512xf32>
    %323 = arith.addf %321, %322 : vector<32x512xf32>
    %324 = vector.extract_strided_slice %323 {offsets = [0, 0], sizes = [32, 256], strides = [1, 1]} : vector<32x512xf32> to vector<32x256xf32>
    %c0_294 = arith.constant 0 : index
    %c0_295 = arith.constant 0 : index
    %c0_296 = arith.constant 0 : index
    %325 = vector.load %arg10[%c0_294, %c0_295, %c0_296] : memref<2x32x256xf32, #tpu.memory_space<vmem>>, vector<1x32x256xf32>
    %326 = vector.shape_cast %325 : vector<1x32x256xf32> to vector<32x256xf32>
    %327 = vector.shape_cast %324 : vector<32x256xf32> to vector<1x32x256xf32>
    tpu.vector_store %arg10[%c0_294, %c0_295, %c0_296], %327 {strides = array<i32>} : memref<2x32x256xf32, #tpu.memory_space<vmem>>, vector<1x32x256xf32>,
    %328 = vector.extract_strided_slice %323 {offsets = [0, 256], sizes = [32, 256], strides = [1, 1]} : vector<32x512xf32> to vector<32x256xf32>
    %c1_297 = arith.constant 1 : index
    %c0_298 = arith.constant 0 : index
    %c0_299 = arith.constant 0 : index
    %329 = vector.load %arg10[%c1_297, %c0_298, %c0_299] : memref<2x32x256xf32, #tpu.memory_space<vmem>>, vector<1x32x256xf32>
    %330 = vector.shape_cast %329 : vector<1x32x256xf32> to vector<32x256xf32>
    %331 = vector.shape_cast %328 : vector<32x256xf32> to vector<1x32x256xf32>
    tpu.vector_store %arg10[%c1_297, %c0_298, %c0_299], %331 {strides = array<i32>} : memref<2x32x256xf32, #tpu.memory_space<vmem>>, vector<1x32x256xf32>,
    return
  }
}

</mosaic_0001>

<bundles_post_ra>
// kernel: resblock2_forward.1
= control target key start
LH: loop header
LB: loop body
LE: loop exit
PB: predicated region body
PF: predicated region fallthrough
CT: control target
= control target key end

     0   :  { %v148_v0 = vlaneseq  ;;  %s3751_s17 = smov 111   ;;  %s3752_s22 = smov 113   ;;  %v5957_v44 = vmov 0.0|0.0   ;;  %vm160_vm0 = vcmask 908288   ;;  %vm290_vm1 = vcmask 924672   ;;  %s5946_s1 = inlined_call_operand.vmem [shape: f32[3,1,256], index: 1, kind: input, shape index: {}]   ;;  %s5947_s0 = inlined_call_operand.vmem [shape: f32[2,32,256], index: 0, kind: input, shape index: {}]   ;;  %s5948_s2 = inlined_call_operand.vmem [shape: bf16[32,288], index: 2, kind: input, shape index: {}]   ;;  %s5949_s3 = inlined_call_operand.vmem [shape: f32[32,1], index: 3, kind: input, shape index: {}]   ;;  %s5950_s5 = inlined_call_operand.vmem [shape: f32[32,1], index: 5, kind: input, shape index: {}]   ;;  %s5951_s4 = inlined_call_operand.vmem [shape: f32[32,1], index: 4, kind: input, shape index: {}]   ;;  %s5952_s6 = inlined_call_operand.vmem [shape: bf16[32,288], index: 6, kind: input, shape index: {}]   ;;  %s5953_s7 = inlined_call_operand.vmem [shape: f32[32,1], index: 7, kind: input, shape index: {}]   ;;  %s5954_s9 = inlined_call_operand.vmem [shape: f32[32,1], index: 9, kind: input, shape index: {}]   ;;  %s5955_s8 = inlined_call_operand.vmem [shape: f32[32,1], index: 8, kind: input, shape index: {}]   ;;  %s5956_s10 = inlined_call_operand.vmem [shape: f32[2,32,256], index: 10, kind: output, shape index: {}]  }
   0x1   :  { %v741_v2 = vld [vmem:[%s5946_s1] sm:$0x3]  ;;  %v3595_v10 = vld [vmem:[%s5946_s1 + $0x4] sm:$0x3]  ;;  %s3753_s27 = smov 127   ;;  %s3754_s12 = smov 1  }
   0x2   :  { %v149_v1 = vshrl.u32 %v148_v0, 7  ;;  %v146_v3 = vld [vmem:[%s5946_s1] sm:$0x3]  ;;  %v3598_v13 = vld [vmem:[%s5946_s1 + $0x4] sm:$0x3]  ;;  %s3755_s18 = smov 15  }
   0x3   :  { %v356_v16 = vld [vmem:[%s5946_s1] sm:$0x3]  ;;  %v3596_v22 = vld [vmem:[%s5946_s1 + $0x4] sm:$0x3]  ;;  %v3891_v34 = vld [vmem:[%s5947_s0 + $0x8] sm:$0xff]  ;;  %s3756_s11 = smov 16  }
   0x4   :  { %v3822_v4 = vsub.s32 0, %v149_v1  ;;  %v3824_v5 = vsub.s32 1, %v149_v1  ;;  %v945_v19 = vld [vmem:[%s5946_s1] sm:$0x3]  ;;  %v3599_v25 = vld [vmem:[%s5946_s1 + $0x4] sm:$0x3] }
   0x5   :  { %v532_v28 = vld [vmem:[%s5946_s1] sm:$0x3]  ;;  %v3896_v35 = vld [vmem:[%s5947_s0 + $0x18] sm:$0xff]  ;;  %v3906_v37 = vld [vmem:[%s5947_s0 + $0x10] sm:$0xff]  ;;  %s3758_s19 = smov 17   ;;  %vm370_vm2 = vcmask 1039360  }
   0x6   :  { %v746_v6 = vrot.slane %v741_v2, %v3822_v4  ;;  %v151_v7 = vrot.slane %v146_v3, %v3822_v4  ;;  %v750_v8 = vrot.slane %v741_v2, %v3824_v5  ;;  %v155_v9 = vrot.slane %v146_v3, %v3824_v5  ;;  %v1117_v31 = vld [vmem:[%s5946_s1] sm:$0x3]  ;;  %v3597_v40 = vld [vmem:[%s5946_s1 + $0x4] sm:$0x3]  ;;  %v3934_v43 = vld [vmem:[%s5947_s0 + $0x50] sm:$0xff]  ;;  %s3759_s13 = smov 112  }
   0x7   :  { %v285_v11 = vrot.slane %v3595_v10, %v3824_v5  ;;  %v281_v12 = vrot.slane %v3595_v10, %v3822_v4  ;;  %v876_v14 = vrot.slane %v3598_v13, %v3824_v5  ;;  %v872_v15 = vrot.slane %v3598_v13, %v3822_v4  ;;  %v3901_v36 = vld [vmem:[%s5947_s0] sm:$0xff]  ;;  %v3943_v46 = vld [vmem:[%s5947_s0 + $0x48] sm:$0xff]  ;;  %v3952_v48 = vld [vmem:[%s5947_s0 + $0x58] sm:$0xff] }
   0x8   :  { %751 = vrot.lane.b32.xlu1 %v746_v6, %s3751_s17  ;;  %156 = vrot.lane.b32.xlu0 %v151_v7, %s3751_s17  ;;  %v365_v17 = vrot.slane %v356_v16, %v3824_v5  ;;  %v361_v18 = vrot.slane %v356_v16, %v3822_v4  ;;  %v954_v20 = vrot.slane %v945_v19, %v3824_v5  ;;  %v3929_v42 = vld [vmem:[%s5947_s0 + $0x40] sm:$0xff]  ;;  %v3962_v50 = vld [vmem:[%s5947_s0 + $0x30] sm:$0xff]  ;;  %vm411_vm3 = vcmask 7168  }
   0x9   :  { %v950_v21 = vrot.slane %v945_v19, %v3822_v4  ;;  %v457_v23 = vrot.slane %v3596_v22, %v3822_v4  ;;  %v461_v24 = vrot.slane %v3596_v22, %v3824_v5  ;;  %v1044_v26 = vrot.slane %v3599_v25, %v3822_v4  ;;  %v3957_v49 = vld [vmem:[%s5947_s0 + $0x20] sm:$0xff]  ;;  %v3978_v53 = vld [vmem:[%s5947_s0 + $0x28] sm:$0xff]  ;;  %v3983_v54 = vld [vmem:[%s5947_s0 + $0x38] sm:$0xff] }
   0xa   :  { %v1048_v27 = vrot.slane %v3599_v25, %v3824_v5  ;;  %v537_v29 = vrot.slane %v532_v28, %v3822_v4  ;;  %v541_v30 = vrot.slane %v532_v28, %v3824_v5  ;;  %v1122_v32 = vrot.slane %v1117_v31, %v3822_v4  ;;  %v3600_v56 = vld [vmem:[%s5946_s1 + $0x4] sm:$0x3]  ;;  %v4010_v60 = vld [vmem:[%s5947_s0 + $0x70] sm:$0xff]  ;;  %v4021_v62 = vld [vmem:[%s5947_s0 + $0x68] sm:$0xff] }
   0xb   :  { %v1126_v33 = vrot.slane %v1117_v31, %v3824_v5  ;;  %v3912_v38 = vpack.c.bf16 %v3896_v35, %v3891_v34  ;;  %v3916_v39 = vpack.c.bf16 %v3906_v37, %v3901_v36  ;;  %v666_v41 = vrot.slane %v3597_v40, %v3822_v4  ;;  %v4005_v59 = vld [vmem:[%s5947_s0 + $0x60] sm:$0xff]  ;;  %v4026_v63 = vld [vmem:[%s5947_s0 + $0x78] sm:$0xff] }
   0xc   :  { %753 = vrot.lane.b32.xlu1 %v750_v8, %s3751_s17  ;;  %158 = vrot.lane.b32.xlu0 %v155_v9, %s3751_s17  ;;  %v670_v45 = vrot.slane %v3597_v40, %v3824_v5  ;;  %v3947_v47 = vpack.c.bf16 %v3934_v43, %v3929_v42  ;;  %v3967_v51 = vpack.c.bf16 %v3952_v48, %v3943_v46  ;;  %vm331_vm4 = vcmask 121856  }
   0xd   :  { %v3973_v52 = vpack.c.bf16 %v3962_v50, %v3957_v49  ;;  %v3989_v55 = vpack.c.bf16 %v3983_v54, %v3978_v53  ;;  %v1248_v57 = vrot.slane %v3600_v56, %v3822_v4  ;;  %v1252_v58 = vrot.slane %v3600_v56, %v3824_v5 }
   0xe   :  { %v4016_v61 = vpack.c.bf16 %v4010_v60, %v4005_v59  ;;  %v4034_v0 = vpack.c.bf16 %v4026_v63, %v4021_v62  ;;  %vm201_vm5 = vcmask 138240   ;;  %vm250_vm6 = vcmask 130048  }
   0xf   :  { %vm636_vm7 = vcmask 916480   ;;  %vm1439_vm8 = vcmask 261120  }
  0x10   :  { %288 = vrot.lane.b32.xlu1 %v285_v11, %s3752_s22  ;;  %286 = vrot.lane.b32.xlu0 %v281_v12, %s3752_s22 }
  0x14   :  { %879 = vrot.lane.b32.xlu1 %v876_v14, %s3752_s22  ;;  %877 = vrot.lane.b32.xlu0 %v872_v15, %s3752_s22 }
  0x18   :  { %368 = vrot.lane.b32.xlu1 %v365_v17, %s3753_s27  ;;  %366 = vrot.lane.b32.xlu0 %v361_v18, %s3753_s27 }
  0x1c   :  { %957 = vrot.lane.b32.xlu1 %v954_v20, %s3753_s27  ;;  %955 = vrot.lane.b32.xlu0 %v950_v21, %s3753_s27 }
  0x20   :  { %462 = vrot.lane.b32.xlu0 %v457_v23, %s3754_s12  ;;  %464 = vrot.lane.b32.xlu1 %v461_v24, %s3754_s12 }
  0x24   :  { %1049 = vrot.lane.b32.xlu0 %v1044_v26, %s3754_s12  ;;  %1051 = vrot.lane.b32.xlu1 %v1048_v27, %s3754_s12 }
  0x28   :  { %542 = vrot.lane.b32.xlu0 %v537_v29, %s3755_s18  ;;  %544 = vrot.lane.b32.xlu1 %v541_v30, %s3755_s18 }
  0x2c   :  { %1127 = vrot.lane.b32.xlu0 %v1122_v32, %s3755_s18  ;;  %1129 = vrot.lane.b32.xlu1 %v1126_v33, %s3755_s18 }
  0x30   :  { %242 = vrot.lane.b32.xlu0 %v3912_v38, %s3756_s11  ;;  %240 = vrot.lane.b32.xlu1 %v3916_v39, %s3756_s11 }
  0x34   :  { %238 = vrot.lane.b32.xlu0 %v5957_v44, %s3756_s11  ;;  %671 = vrot.lane.b32.xlu1 %v666_v41, %s3758_s19 }
  0x38   :  { %673 = vrot.lane.b32.xlu0 %v670_v45, %s3758_s19  ;;  %833 = vrot.lane.b32.xlu1 %v3947_v47, %s3756_s11 }
  0x3c   :  { %835 = vrot.lane.b32.xlu0 %v3967_v51, %s3756_s11  ;;  %246 = vrot.lane.b32.xlu1 %v3973_v52, %s3756_s11 }
  0x40   :  { %248 = vrot.lane.b32.xlu0 %v3989_v55, %s3756_s11  ;;  %831 = vrot.lane.b32.xlu1 %v5957_v44, %s3756_s11 }
  0x44   :  { %1253 = vrot.lane.b32.xlu0 %v1248_v57, %s3758_s19  ;;  %1255 = vrot.lane.b32.xlu1 %v1252_v58, %s3758_s19 }
  0x48   :  { %244 = vrot.lane.b32.xlu0 %v5957_v44, %s3756_s11  ;;  %839 = vrot.lane.b32.xlu1 %v4016_v61, %s3756_s11 }
  0x4c   :  { %841 = vrot.lane.b32.xlu0 %v4034_v0, %s3756_s11  ;;  %837 = vrot.lane.b32.xlu1 %v5957_v44, %s3756_s11 }
  0x7a   :  { %v752_v1 = vpop.permute.xlu1 %751  ;;  %v157_v2 = vpop.permute.xlu0 %156 }
  0x7b   :  { %v165_v3 = vmul.f32 0.0, %v157_v2  ;;  %v759_v13 = vmul.f32 0.0, %v752_v1 }
  0x7d   :  { %v177_v6 = vpack.c.bf16 %v165_v3, %v165_v3  ;;  %v771_v20 = vpack.c.bf16 %v759_v13, %v759_v13 }
  0x7e   :  { %v754_v7 = vpop.permute.xlu1 %753  ;;  %v159_v8 = vpop.permute.xlu0 %158 }
  0x7f   :  { %189 = vrot.lane.b32.xlu0 %v177_v6, %s3758_s19  ;;  %v761_v9 = vmul.f32 %v3943_v46, %v754_v7  ;;  %v764_v10 = vmul.f32 %v3952_v48, %v754_v7  ;;  %v167_v11 = vmul.f32 %v159_v8, %v3891_v34  ;;  %v170_v12 = vmul.f32 %v159_v8, %v3896_v35 }
  0x80   :  { %v173_v16 = vmul.f32 %v159_v8, %v3978_v53  ;;  %v176_v17 = vmul.f32 %v159_v8, %v3983_v54  ;;  %v767_v23 = vmul.f32 %v4021_v62, %v754_v7  ;;  %v770_v24 = vmul.f32 %v4026_v63, %v754_v7 }
  0x81   :  { %v773_v14 = vpack.c.bf16 %v764_v10, %v761_v9  ;;  %v179_v15 = vpack.c.bf16 %v170_v12, %v167_v11  ;;  %v755_v30 = vsel %vm160_vm0, %v752_v1, %v754_v7  ;;  %v4063_v45 = vsel %vm160_vm0, %v157_v2, %v159_v8 }
  0x82   :  { %v287_v18 = vpop.permute.xlu0 %286  ;;  %v182_v19 = vpack.c.bf16 %v176_v17, %v173_v16  ;;  %v289_v25 = vpop.permute.xlu1 %288  ;;  %v776_v29 = vpack.c.bf16 %v770_v24, %v767_v23  ;;  %v760_v33 = vmul.f32 %v3929_v42, %v755_v30  ;;  %v763_v40 = vmul.f32 %v3934_v43, %v755_v30 }
  0x83   :  { %787 = vrot.lane.b32.xlu0 %v773_v14, %s3758_s19  ;;  %193 = vrot.lane.b32.xlu1 %v179_v15, %s3758_s19  ;;  %v297_v27 = vmul.f32 %v289_v25, %v3891_v34  ;;  %v300_v28 = vmul.f32 %v289_v25, %v3896_v35  ;;  %v295_v32 = vmul.f32 0.0, %v287_v18  ;;  %v172_v3 = vmul.f32 %v4063_v45, %v3957_v49 }
  0x84   :  { %v772_v1 = vpack.c.bf16 %v763_v40, %v760_v33  ;;  %v291_v7 = vsel %vm290_vm1, %v287_v18, %v289_v25  ;;  %v303_v8 = vmul.f32 %v289_v25, %v3978_v53  ;;  %v306_v10 = vmul.f32 %v289_v25, %v3983_v54 }
  0x85   :  { %v309_v31 = vpack.c.bf16 %v300_v28, %v297_v27  ;;  %v307_v58 = vpack.c.bf16 %v295_v32, %v295_v32  ;;  %v766_v11 = vmul.f32 %v4005_v59, %v755_v30  ;;  %v769_v12 = vmul.f32 %v4010_v60, %v755_v30 }
  0x86   :  { %v878_v21 = vpop.permute.xlu0 %877  ;;  %v880_v41 = vpop.permute.xlu1 %879  ;;  %v296_v13 = vmul.f32 %v291_v7, %v3901_v36  ;;  %v299_v14 = vmul.f32 %v291_v7, %v3906_v37  ;;  %v312_v15 = vpack.c.bf16 %v306_v10, %v303_v8  ;;  %v305_v30 = vmul.f32 %v291_v7, %v3962_v50 }
  0x87   :  { %199 = vrot.lane.b32.xlu0 %v182_v19, %s3758_s19  ;;  %783 = vrot.lane.b32.xlu1 %v771_v20, %s3758_s19  ;;  %v885_v22 = vmul.f32 0.0, %v878_v21  ;;  %v887_v56 = vmul.f32 %v3943_v46, %v880_v41  ;;  %v890_v57 = vmul.f32 %v3952_v48, %v880_v41  ;;  %v775_v16 = vpack.c.bf16 %v769_v12, %v766_v11 }
  0x88   :  { %v881_v17 = vsel %vm290_vm1, %v878_v21, %v880_v41  ;;  %v308_v18 = vpack.c.bf16 %v299_v14, %v296_v13 }
  0x89   :  { %v897_v26 = vpack.c.bf16 %v885_v22, %v885_v22  ;;  %v899_v2 = vpack.c.bf16 %v890_v57, %v887_v56  ;;  %v896_v22 = vmul.f32 %v4026_v63, %v880_v41  ;;  %v886_v23 = vmul.f32 %v3929_v42, %v881_v17 }
  0x8a   :  { %v369_v19 = vpop.permute.xlu1 %368  ;;  %v889_v24 = vmul.f32 %v3934_v43, %v881_v17  ;;  %v367_v25 = vpop.permute.xlu0 %366  ;;  %v892_v56 = vmul.f32 %v4005_v59, %v881_v17  ;;  %v895_v57 = vmul.f32 %v4010_v60, %v881_v17 }
  0x8b   :  { %195 = vrot.lane.b32.xlu0 %v177_v6, %s3758_s19  ;;  %789 = vrot.lane.b32.xlu1 %v771_v20, %s3758_s19  ;;  %v175_v6 = vmul.f32 %v4063_v45, %v3962_v50  ;;  %v893_v20 = vmul.f32 %v4021_v62, %v880_v41  ;;  %v377_v21 = vmul.f32 %v369_v19, %v3891_v34 }
  0x8c   :  { %v898_v28 = vpack.c.bf16 %v889_v24, %v886_v23  ;;  %v901_v8 = vpack.c.bf16 %v895_v57, %v892_v56 }
  0x8d   :  { %v181_v9 = vpack.c.bf16 %v175_v6, %v172_v3  ;;  %v902_v27 = vpack.c.bf16 %v896_v22, %v893_v20 }
  0x8e   :  { %v956_v33 = vpop.permute.xlu0 %955  ;;  %v958_v40 = vpop.permute.xlu1 %957 }
  0x8f   :  { %793 = vrot.lane.b32.xlu0 %v776_v29, %s3758_s19  ;;  %909 = vrot.lane.b32.xlu1 %v897_v26, %s3755_s18  ;;  %v302_v29 = vmul.f32 %v291_v7, %v3957_v49  ;;  %v965_v3 = vmul.f32 %v3943_v46, %v958_v40  ;;  %v968_v6 = vmul.f32 %v3952_v48, %v958_v40 }
  0x90   :  { %v959_v7 = vsel %vm370_vm2, %v956_v33, %v958_v40  ;;  %v974_v56 = vmul.f32 %v4026_v63, %v958_v40 }
  0x91   :  { %v311_v41 = vpack.c.bf16 %v305_v30, %v302_v29  ;;  %v977_v11 = vpack.c.bf16 %v968_v6, %v965_v3  ;;  %v964_v12 = vmul.f32 %v3929_v42, %v959_v7  ;;  %v967_v13 = vmul.f32 %v3934_v43, %v959_v7 }
  0x92   :  { %v465_v17 = vpop.permute.xlu1 %464 }
  0x93   :  { %323 = vrot.lane.b32.xlu0 %v309_v31, %s3755_s18  ;;  %915 = vrot.lane.b32.xlu1 %v897_v26, %s3755_s18  ;;  %v380_v26 = vmul.f32 %v369_v19, %v3896_v35  ;;  %v375_v31 = vmul.f32 0.0, %v367_v25  ;;  %v976_v20 = vpack.c.bf16 %v967_v13, %v964_v12 }
  0x95   :  { %v389_v32 = vpack.c.bf16 %v380_v26, %v377_v21  ;;  %v386_v21 = vmul.f32 %v369_v19, %v3983_v54 }
  0x97   :  { %319 = vrot.lane.b32.xlu0 %v307_v58, %s3755_s18  ;;  %785 = vrot.lane.b32.xlu1 %v772_v1, %s3758_s19  ;;  %v387_v1 = vpack.c.bf16 %v375_v31, %v375_v31 }
  0x9b   :  { %913 = vrot.lane.b32.xlu0 %v899_v2, %s3755_s18  ;;  %197 = vrot.lane.b32.xlu1 %v181_v9, %s3758_s19  ;;  %v4106_v2 = vpop.permute.xlu0 %462 }
  0x9c   :  { %v467_v30 = vsel %vm411_vm3, %v4106_v2, %v465_v17  ;;  %v474_v12 = vmul.f32 %v4106_v2, %v3906_v37 }
  0x9d   :  { %v475_v3 = vmul.f32 %v467_v30, %v3896_v35 }
  0x9f   :  { %329 = vrot.lane.b32.xlu0 %v312_v15, %s3755_s18  ;;  %791 = vrot.lane.b32.xlu1 %v775_v16, %s3758_s19  ;;  %v166_v15 = vmul.f32 %v4063_v45, %v3901_v36  ;;  %v169_v16 = vmul.f32 %v4063_v45, %v3906_v37  ;;  %v1052_v45 = vpop.permute.xlu1 %1051 }
  0xa0   :  { %v1059_v13 = vmul.f32 0.0, %v1052_v45 }
  0xa1   :  { %v178_v23 = vpack.c.bf16 %v169_v16, %v166_v15 }
  0xa3   :  { %325 = vrot.lane.b32.xlu0 %v307_v58, %s3755_s18  ;;  %321 = vrot.lane.b32.xlu1 %v308_v18, %s3755_s18  ;;  %v371_v58 = vsel %vm370_vm2, %v367_v25, %v369_v19  ;;  %v4119_v18 = vpop.permute.xlu0 %1049  ;;  %v383_v25 = vmul.f32 %v369_v19, %v3978_v53  ;;  %v970_v19 = vmul.f32 %v4005_v59, %v959_v7 }
  0xa4   :  { %v376_v9 = vmul.f32 %v371_v58, %v3901_v36  ;;  %v379_v10 = vmul.f32 %v371_v58, %v3906_v37  ;;  %v382_v22 = vmul.f32 %v371_v58, %v3957_v49  ;;  %v385_v24 = vmul.f32 %v371_v58, %v3962_v50 }
  0xa5   :  { %v392_v29 = vpack.c.bf16 %v386_v21, %v383_v25  ;;  %v472_v58 = vmul.f32 %v467_v30, %v3891_v34  ;;  %v478_v25 = vmul.f32 %v467_v30, %v3978_v53  ;;  %v481_v21 = vmul.f32 %v467_v30, %v3983_v54 }
  0xa6   :  { %v388_v14 = vpack.c.bf16 %v379_v10, %v376_v9  ;;  %v1053_v10 = vsel %vm411_vm3, %v4119_v18, %v1052_v45  ;;  %v480_v30 = vmul.f32 %v4106_v2, %v3962_v50 }
  0xa7   :  { %919 = vrot.lane.b32.xlu0 %v902_v27, %s3755_s18  ;;  %911 = vrot.lane.b32.xlu1 %v898_v28, %s3755_s18  ;;  %v4129_v26 = vpop.permute.xlu0 %542  ;;  %v963_v27 = vmul.f32 0.0, %v956_v33  ;;  %v391_v28 = vpack.c.bf16 %v385_v24, %v382_v22  ;;  %v545_v33 = vpop.permute.xlu1 %544  ;;  %v1061_v15 = vmul.f32 %v3952_v48, %v1053_v10  ;;  %v1071_v24 = vpack.c.bf16 %v1059_v13, %v1059_v13 }
  0xa9   :  { %v975_v31 = vpack.c.bf16 %v963_v27, %v963_v27 }
  0xab   :  { %403 = vrot.lane.b32.xlu0 %v389_v32, %s3754_s12  ;;  %327 = vrot.lane.b32.xlu1 %v311_v41, %s3755_s18  ;;  %v973_v32 = vmul.f32 %v4010_v60, %v959_v7  ;;  %v971_v41 = vmul.f32 %v4021_v62, %v958_v40  ;;  %v4139_v57 = vpop.permute.xlu0 %1127  ;;  %v484_v7 = vpack.c.bf16 %v475_v3, %v472_v58  ;;  %v1130_v9 = vpop.permute.xlu1 %1129 }
  0xac   :  { %v1064_v3 = vmul.f32 %v4021_v62, %v1053_v10 }
  0xad   :  { %v979_v6 = vpack.c.bf16 %v973_v32, %v970_v19  ;;  %v1060_v19 = vmul.f32 %v3934_v43, %v4119_v18 }
  0xaf   :  { %399 = vrot.lane.b32.xlu0 %v387_v1, %s3754_s12  ;;  %917 = vrot.lane.b32.xlu1 %v901_v8, %s3755_s18  ;;  %v980_v8 = vpack.c.bf16 %v974_v56, %v971_v41  ;;  %v4147_v40 = vpop.permute.xlu0 %242 }
  0xb3   :  { %991 = vrot.lane.b32.xlu0 %v977_v11, %s3754_s12  ;;  %401 = vrot.lane.b32.xlu1 %v388_v14, %s3754_s12  ;;  %v473_v11 = vmul.f32 0.0, %v465_v17  ;;  %v1058_v14 = vmul.f32 %v3943_v46, %v1053_v10  ;;  %v4159_v22 = vpop.permute.xlu0 %238  ;;  %v4161_v17 = vpop.permute.xlu1 %240 }
  0xb5   :  { %v485_v16 = vpack.c.bf16 %v473_v11, %v473_v11 }
  0xb7   :  { %989 = vrot.lane.b32.xlu1 %v976_v20, %s3754_s12  ;;  %191 = vrot.lane.b32.xlu0 %v178_v23, %s3758_s19  ;;  %v1070_v23 = vpack.c.bf16 %v1061_v15, %v1058_v14  ;;  %v4169_v45 = vpop.permute.xlu0 %673  ;;  %v4171_v27 = vpop.permute.xlu1 %671  ;;  %v1066_v14 = vmul.f32 %v4010_v60, %v4119_v18 }
  0xbb   :  { %407 = vrot.lane.b32.xlu1 %v391_v28, %s3754_s12  ;;  %409 = vrot.lane.b32.xlu0 %v392_v29, %s3754_s12  ;;  %v477_v28 = vmul.f32 %v4106_v2, %v3957_v49  ;;  %v487_v29 = vpack.c.bf16 %v481_v21, %v478_v25  ;;  %v4183_v32 = vpop.permute.xlu0 %835  ;;  %v4185_v41 = vpop.permute.xlu1 %833  ;;  %v1137_v25 = vmul.f32 0.0, %v1130_v9 }
  0xbd   :  { %v486_v58 = vpack.c.bf16 %v480_v30, %v477_v28 }
  0xbf   :  { %987 = vrot.lane.b32.xlu1 %v975_v31, %s3754_s12  ;;  %405 = vrot.lane.b32.xlu0 %v387_v1, %s3754_s12  ;;  %v471_v1 = vmul.f32 %v4106_v2, %v3901_v36  ;;  %v553_v2 = vmul.f32 0.0, %v545_v33  ;;  %v4197_v13 = vpop.permute.xlu1 %246 }
  0xc1   :  { %v483_v20 = vpack.c.bf16 %v474_v12, %v471_v1  ;;  %v4195_v12 = vpop.permute.xlu0 %248  ;;  %v565_v15 = vpack.c.bf16 %v553_v2, %v553_v2 }
  0xc3   :  { %995 = vrot.lane.b32.xlu1 %v979_v6, %s3754_s12  ;;  %997 = vrot.lane.b32.xlu0 %v980_v8, %s3754_s12  ;;  %v1067_v6 = vmul.f32 %v4026_v63, %v1053_v10  ;;  %v547_v8 = vsel %vm331_vm4, %v4129_v26, %v545_v33  ;;  %v1063_v10 = vmul.f32 %v4005_v59, %v4119_v18 }
  0xc4   :  { %v552_v11 = vmul.f32 %v547_v8, %v3891_v34  ;;  %v555_v1 = vmul.f32 %v547_v8, %v3896_v35 }
  0xc5   :  { %v4213_v21 = vpop.permute.xlu0 %1253 }
  0xc6   :  { %v564_v33 = vpack.c.bf16 %v555_v1, %v552_v11  ;;  %v1138_v11 = vmul.f32 %v3934_v43, %v4139_v57  ;;  %v560_v1 = vmul.f32 %v4129_v26, %v3962_v50 }
  0xc7   :  { %993 = vrot.lane.b32.xlu1 %v975_v31, %s3754_s12  ;;  %497 = vrot.lane.b32.xlu0 %v484_v7, %s3753_s27  ;;  %v1057_v31 = vmul.f32 %v3929_v42, %v4119_v18  ;;  %v1073_v7 = vpack.c.bf16 %v1067_v6, %v1064_v3  ;;  %v4215_v18 = vpop.permute.xlu1 %831  ;;  %v557_v6 = vmul.f32 %v4129_v26, %v3957_v49 }
  0xc9   :  { %v1069_v56 = vpack.c.bf16 %v1060_v19, %v1057_v31  ;;  %v4225_v3 = vpop.permute.xlu0 %244 }
  0xcb   :  { %499 = vrot.lane.b32.xlu1 %v485_v16, %s3753_s27  ;;  %495 = vrot.lane.b32.xlu0 %v483_v20, %s3753_s27  ;;  %v554_v20 = vmul.f32 %v4129_v26, %v3906_v37  ;;  %v4221_v19 = vpop.permute.xlu1 %1255 }
  0xcf   :  { %1083 = vrot.lane.b32.xlu1 %v1070_v23, %s3753_s27  ;;  %1085 = vrot.lane.b32.xlu0 %v1071_v24, %s3753_s27  ;;  %v1131_v23 = vsel %vm331_vm4, %v4139_v57, %v1130_v9  ;;  %v561_v9 = vmul.f32 %v547_v8, %v3983_v54 }
  0xd0   :  { %v1139_v31 = vmul.f32 %v3952_v48, %v1131_v23 }
  0xd3   :  { %503 = vrot.lane.b32.xlu1 %v487_v29, %s3753_s27  ;;  %505 = vrot.lane.b32.xlu0 %v485_v16, %s3753_s27  ;;  %v551_v16 = vmul.f32 %v4129_v26, %v3901_v36  ;;  %v1136_v29 = vmul.f32 %v3943_v46, %v1131_v23 }
  0xd5   :  { %v563_v28 = vpack.c.bf16 %v554_v20, %v551_v16  ;;  %v1148_v30 = vpack.c.bf16 %v1139_v31, %v1136_v29  ;;  %v1142_v16 = vmul.f32 %v4021_v62, %v1131_v23  ;;  %v1145_v20 = vmul.f32 %v4026_v63, %v1131_v23 }
  0xd6   :  { %v1141_v29 = vmul.f32 %v4005_v59, %v4139_v57  ;;  %v1144_v23 = vmul.f32 %v4010_v60, %v4139_v57 }
  0xd7   :  { %1081 = vrot.lane.b32.xlu1 %v1069_v56, %s3753_s27  ;;  %501 = vrot.lane.b32.xlu0 %v486_v58, %s3753_s27  ;;  %v1149_v56 = vpack.c.bf16 %v1137_v25, %v1137_v25  ;;  %v558_v58 = vmul.f32 %v547_v8, %v3978_v53  ;;  %v4237_v8 = vpop.permute.xlu1 %839  ;;  %v1151_v25 = vpack.c.bf16 %v1145_v20, %v1142_v16 }
  0xd9   :  { %v567_v2 = vpack.c.bf16 %v561_v9, %v558_v58 }
  0xdb   :  { %1089 = vrot.lane.b32.xlu1 %v1073_v7, %s3753_s27  ;;  %1091 = vrot.lane.b32.xlu0 %v1071_v24, %s3753_s27  ;;  %v1072_v24 = vpack.c.bf16 %v1066_v14, %v1063_v10  ;;  %v1135_v7 = vmul.f32 %v3929_v42, %v4139_v57  ;;  %v4241_v10 = vpop.permute.xlu0 %841 }
  0xdd   :  { %v1147_v14 = vpack.c.bf16 %v1138_v11, %v1135_v7  ;;  %v3713_v11 = vld [vmem:[%s5948_s2 + $0x4] ss:$12 sps:$4 sm:$0xff]  }
  0xde   :  { %1478 = vmatprep.mubr.bf16.mxu0 %v3713_v11  ;;  %1584 = vmatprep.mubr.bf16.mxu1 %v3713_v11 }
  0xdf   :  { %577 = vrot.lane.b32.xlu1 %v564_v33, %s3752_s22  ;;  %579 = vrot.lane.b32.xlu0 %v565_v15, %s3752_s22  ;;  %v566_v33 = vpack.c.bf16 %v560_v1, %v557_v6  ;;  %v676_v1 = vsel %vm201_vm5, %v4171_v27, %v4169_v45 }
  0xe3   :  { %1087 = vrot.lane.b32.xlu1 %v1072_v24, %s3753_s27  ;;  %575 = vrot.lane.b32.xlu0 %v563_v28, %s3752_s22  ;;  %v4247_v24 = vpop.permute.xlu1 %837 }
  0xe7   :  { %1161 = vrot.lane.b32.xlu1 %v1148_v30, %s3752_s22  ;;  %1163 = vrot.lane.b32.xlu0 %v1149_v56, %s3752_s22 }
  0xeb   :  { %583 = vrot.lane.b32.xlu1 %v567_v2, %s3752_s22  ;;  %585 = vrot.lane.b32.xlu0 %v565_v15, %s3752_s22 }
  0xef   :  { %1159 = vrot.lane.b32.xlu1 %v1147_v14, %s3752_s22  ;;  %581 = vrot.lane.b32.xlu0 %v566_v33, %s3752_s22 }
  0xf1   :  { %v4249_v26 = vpop.permute.xlu0 %189 }
  0xf3   :  { %1167 = vrot.lane.b32.xlu1 %v1151_v25, %s3752_s22  ;;  %1169 = vrot.lane.b32.xlu0 %v1149_v56, %s3752_s22  ;;  %v1150_v56 = vpack.c.bf16 %v1144_v23, %v1141_v29  ;;  %v681_v25 = vmul.f32 %v676_v1, %v3891_v34  ;;  %v684_v29 = vmul.f32 %v676_v1, %v3896_v35  ;;  %v682_v23 = vmul.f32 0.0, %v4169_v45 }
  0xf4   :  { %v680_v35 = vmul.f32 %v4171_v27, %v3901_v36 }
  0xf5   :  { %v788_v15 = vpop.permute.xlu0 %787  ;;  %v4253_v28 = vpop.permute.xlu1 %193  ;;  %v693_v34 = vpack.c.bf16 %v684_v29, %v681_v25  ;;  %v694_v45 = vpack.c.bf16 %v682_v23, %v682_v23  ;;  %v1263_v25 = vmul.f32 0.0, %v4221_v19  ;;  %v687_v23 = vmul.f32 %v676_v1, %v3978_v53 }
  0xf6   :  { %v846_v53 = vsel %vm250_vm6, %v4237_v8, %v4241_v10  ;;  %v845_v10 = vsel %vm250_vm6, %v4247_v24, %v4237_v8 }
  0xf7   :  { %626 = vrot.lane.b32.xlu1 %v3912_v38, %s3759_s13  ;;  %628 = vrot.lane.b32.xlu0 %v5957_v44, %s3759_s13 }
  0xf9   :  { %v4263_v31 = vpop.permute.xlu0 %199  ;;  %v784_v30 = vpop.permute.xlu1 %783 }
  0xfb   :  { %1165 = vrot.lane.b32.xlu1 %v1150_v56, %s3752_s22  ;;  %624 = vrot.lane.b32.xlu0 %v3916_v39, %s3759_s13 }
  0xfd   :  { %v4268_v58 = vpop.permute.xlu0 %195  ;;  %v790_v9 = vpop.permute.xlu1 %789 }
  0xff   :  { %1209 = vrot.lane.b32.xlu1 %v3967_v51, %s3759_s13  ;;  %1211 = vrot.lane.b32.xlu0 %v5957_v44, %s3759_s13 }
 0x101   :  { %v794_v57 = vpop.permute.xlu0 %793  ;;  %v4274_v6 = vpop.permute.xlu1 %909 }
 0x103   :  { %632 = vrot.lane.b32.xlu1 %v3989_v55, %s3759_s13  ;;  %634 = vrot.lane.b32.xlu0 %v5957_v44, %s3759_s13 }
 0x105   :  { %v4280_v2 = vpop.permute.xlu0 %323  ;;  %v4282_v7 = vpop.permute.xlu1 %915 }
 0x107   :  { %1207 = vrot.lane.b32.xlu1 %v3947_v47, %s3759_s13  ;;  %630 = vrot.lane.b32.xlu0 %v3973_v52, %s3759_s13 }
 0x109   :  { %v4294_v14 = vpop.permute.xlu0 %319  ;;  %v786_v33 = vpop.permute.xlu1 %785 }
 0x10a   :  { %v796_v16 = vsel %vm201_vm5, %v786_v33, %v788_v15  ;;  %v795_v20 = vsel %vm201_vm5, %v784_v30, %v786_v33  ;;  %v1257_v15 = vsel %vm201_vm5, %v4213_v21, %v4221_v19  ;;  %v683_v30 = vmul.f32 %v4171_v27, %v3906_v37 }
 0x10b   :  { %1215 = vrot.lane.b32.xlu1 %v4034_v0, %s3759_s13  ;;  %1552 = vmatprep.subr.bf16.mxu1 %v796_v16  ;;  %v1262_v33 = vmul.f32 %v3943_v46, %v1257_v15  ;;  %v1265_v16 = vmul.f32 %v3952_v48, %v1257_v15  ;;  %v844_v46 = vsel %vm250_vm6, %v4185_v41, %v4183_v32 }
 0x10c   :  { %1217 = vrot.lane.b32.xlu0 %v5957_v44, %s3759_s13  ;;  %1553 = vmatpush1.bf16.msra.mxu1 %v795_v20  ;;  %v692_v29 = vpack.c.bf16 %v683_v30, %v680_v35  ;;  %v843_v32 = vsel %vm250_vm6, %v4215_v18, %v4185_v41  ;;  %v1261_v30 = vmul.f32 %v3929_v42, %v4213_v21 }
 0x10d   :  { %v914_v56 = vpop.permute.xlu0 %913  ;;  %v4305_v11 = vpop.permute.xlu1 %197  ;;  %v686_v41 = vmul.f32 %v4171_v27, %v3957_v49  ;;  %v689_v18 = vmul.f32 %v4171_v27, %v3962_v50 }
 0x10f   :  { %1213 = vrot.lane.b32.xlu1 %v4016_v61, %s3759_s13  ;;  %v695_v27 = vpack.c.bf16 %v689_v18, %v686_v41  ;;  %v1866_v41 = vld [vmem:[%s5946_s1] sm:$0x3] }
 0x110   :  { %706 = vrot.lane.b32.xlu0 %v693_v34, %s3751_s17  ;;  %v5959_v34 = vmov 0  }
 0x111   :  { %v4319_v20 = vpop.permute.xlu0 %329  ;;  %v792_v44 = vpop.permute.xlu1 %791  ;;  %3710 = vset.pattern.permute.xlu1 %v5959_v34  ;;  %3709 = vset.pattern.permute.xlu0 %v5959_v34 }
 0x112   :  { %v798_v36 = vsel %vm201_vm5, %v792_v44, %v794_v57  ;;  %v797_v37 = vsel %vm201_vm5, %v790_v9, %v792_v44  ;;  %v1274_v57 = vpack.c.bf16 %v1265_v16, %v1262_v33  ;;  %v690_v44 = vmul.f32 %v676_v1, %v3983_v54 }
 0x113   :  { %708 = vrot.lane.b32.xlu1 %v694_v45, %s3751_s17  ;;  %1554 = vmatprep.subr.bf16.mxu1 %v798_v36  ;;  %v1275_v9 = vpack.c.bf16 %v1263_v25, %v1263_v25  ;;  %v1264_v33 = vmul.f32 %v3934_v43, %v4213_v21  ;;  %v1268_v16 = vmul.f32 %v4021_v62, %v1257_v15 }
 0x114   :  { %704 = vrot.lane.b32.xlu0 %v692_v29, %s3751_s17  ;;  %1555 = vmatpush1.bf16.msra.mxu1 %v797_v37  ;;  %v696_v35 = vpack.c.bf16 %v690_v44, %v687_v23  ;;  %v1271_v43 = vmul.f32 %v4026_v63, %v1257_v15  ;;  %v1267_v63 = vmul.f32 %v4005_v59, %v4213_v21  ;;  %v36_v59 = vld [vmem:[%s5949_s3] sm:$0xff]  ;;  %v39_v44 = vld [vmem:[%s5949_s3 + $0x18] sm:$0xff] }
 0x115   :  { %v4329_v48 = vpop.permute.xlu0 %325  ;;  %1556 = vmatprep.subr.bf16.mxu1 %v844_v46  ;;  %v4331_v19 = vpop.permute.xlu1 %321  ;;  %v1273_v50 = vpack.c.bf16 %v1264_v33, %v1261_v30  ;;  %v1270_v15 = vmul.f32 %v4010_v60, %v4213_v21  ;;  %v44_v30 = vld [vmem:[%s5950_s5] sm:$0xff] }
 0x117   :  { %1287 = vrot.lane.b32.xlu1 %v1274_v57, %s3751_s17  ;;  %v1276_v37 = vpack.c.bf16 %v1270_v15, %v1267_v63 }
 0x118   :  { %1289 = vrot.lane.b32.xlu0 %v1275_v9, %s3751_s17  ;;  %1557 = vmatpush1.bf16.msra.mxu1 %v843_v32 }
 0x119   :  { %v920_v54 = vpop.permute.xlu0 %919  ;;  %1558 = vmatprep.subr.bf16.mxu1 %v846_v53  ;;  %v912_v1 = vpop.permute.xlu1 %911  ;;  %v45_v53 = vld [vmem:[%s5950_s5 + $0x8] sm:$0xff] }
 0x11a   :  { %v922_v42 = vsel %vm331_vm4, %v912_v1, %v914_v56  ;;  %v921_v8 = vsel %vm331_vm4, %v4274_v6, %v912_v1  ;;  %v1277_v56 = vpack.c.bf16 %v1271_v43, %v1268_v16  ;;  %v333_v16 = vsel %vm331_vm4, %v4331_v19, %v4280_v2 }
 0x11b   :  { %712 = vrot.lane.b32.xlu1 %v696_v35, %s3751_s17 }
 0x11c   :  { %714 = vrot.lane.b32.xlu0 %v694_v45, %s3751_s17  ;;  %1559 = vmatpush1.bf16.msra.mxu1 %v845_v10 }
 0x11d   :  { %v4361_v25 = vpop.permute.xlu0 %403  ;;  %1560 = vmatprep.subr.bf16.mxu1 %v922_v42  ;;  %v4363_v49 = vpop.permute.xlu1 %327  ;;  %v46_v42 = vld [vmem:[%s5950_s5 + $0x10] sm:$0xff] }
 0x11f   :  { %1285 = vrot.lane.b32.xlu1 %v1273_v50, %s3751_s17 }
 0x120   :  { %710 = vrot.lane.b32.xlu0 %v695_v27, %s3751_s17  ;;  %1561 = vmatpush1.bf16.msra.mxu1 %v921_v8  ;;  %v1871_v27 = vrot.slane %v1866_v41, %v3822_v4 }
 0x121   :  { %v4369_v24 = vpop.permute.xlu0 %399  ;;  %v918_v62 = vpop.permute.xlu1 %917 }
 0x122   :  { %v924_v45 = vsel %vm331_vm4, %v918_v62, %v920_v54  ;;  %v923_v36 = vsel %vm331_vm4, %v4282_v7, %v918_v62  ;;  %v37_v7 = vld [vmem:[%s5949_s3 + $0x8] sm:$0xff]  ;;  %v204_v54 = vsel %vm201_vm5, %v4268_v58, %v4305_v11  ;;  %v47_v58 = vld [vmem:[%s5950_s5 + $0x18] sm:$0xff]  ;;  %v4449_v62 = vld [vmem:[%s5946_s1] sm:$0x3] }
 0x123   :  { %1293 = vrot.lane.b32.xlu1 %v1277_v56, %s3751_s17  ;;  %1562 = vmatprep.subr.bf16.mxu1 %v924_v45  ;;  %v2451_v63 = vrot.slane %v4449_v62, %v3822_v4 }
 0x124   :  { %1295 = vrot.lane.b32.xlu0 %v1275_v9, %s3751_s17  ;;  %1563 = vmatpush1.bf16.msra.mxu1 %v923_v36  ;;  %v205_v9 = vsel %vm201_vm5, %v4305_v11, %v4263_v31  ;;  %v252_v31 = vsel %vm250_vm6, %v4161_v17, %v4147_v40  ;;  %v251_v40 = vsel %vm250_vm6, %v4159_v22, %v4161_v17 }
 0x125   :  { %v992_v6 = vpop.permute.xlu0 %991  ;;  %v4380_v29 = vpop.permute.xlu1 %401  ;;  %v254_v11 = vsel %vm250_vm6, %v4197_v13, %v4195_v12  ;;  %v1875_v22 = vrot.slane %v1866_v41, %v3824_v5  ;;  %v253_v12 = vsel %vm250_vm6, %v4225_v3, %v4197_v13  ;;  %v332_v13 = vsel %vm331_vm4, %v4294_v14, %v4331_v19 }
 0x126   :  { %v335_v3 = vsel %vm331_vm4, %v4363_v49, %v4319_v20  ;;  %v334_v14 = vsel %vm331_vm4, %v4329_v48, %v4363_v49  ;;  %v413_v20 = vsel %vm411_vm3, %v4380_v29, %v4361_v25 }
 0x127   :  { %1291 = vrot.lane.b32.xlu1 %v1276_v37, %s3751_s17 }
 0x128   :  { %1391 = vperm.xlu0 %3709, %v36_v59  }
 0x129   :  { %v990_v60 = vpop.permute.xlu1 %989  ;;  %v192_v21 = vpop.permute.xlu0 %191 }
 0x12a   :  { %v203_v46 = vsel %vm201_vm5, %v192_v21, %v4253_v28  ;;  %v1000_v57 = vsel %vm411_vm3, %v990_v60, %v992_v6  ;;  %v202_v23 = vsel %vm201_vm5, %v4249_v26, %v192_v21  ;;  %v38_v26 = vld [vmem:[%s5949_s3 + $0x10] sm:$0xff] }
 0x12b   :  { %1446 = vmatprep.subr.bf16.mxu0 %v203_v46  ;;  %1564 = vmatprep.subr.bf16.mxu1 %v1000_v57 }
 0x12c   :  { %1447 = vmatpush1.bf16.msra.mxu0 %v202_v23  ;;  %1396 = vperm.xlu1 %3710, %v37_v7  }
 0x12d   :  { %v4400_v32 = vpop.permute.xlu1 %407  ;;  %1448 = vmatprep.subr.bf16.mxu0 %v205_v9  ;;  %v4402_v28 = vpop.permute.xlu0 %409  ;;  %1406 = vperm.xlu0 %3709, %v39_v44  }
 0x12e   :  { %v415_v48 = vsel %vm411_vm3, %v4400_v32, %v4402_v28 }
 0x130   :  { %1449 = vmatpush1.bf16.msra.mxu0 %v204_v54  ;;  %1401 = vperm.xlu1 %3710, %v38_v26  }
 0x131   :  { %v988_v1 = vpop.permute.xlu1 %987  ;;  %1450 = vmatprep.subr.bf16.mxu0 %v252_v31  ;;  %v406_v35 = vpop.permute.xlu0 %405  ;;  %1809 = vperm.xlu0 %3709, %v45_v53  }
 0x132   :  { %v999_v33 = vsel %vm411_vm3, %v988_v1, %v990_v60  ;;  %v414_v49 = vsel %vm411_vm3, %v406_v35, %v4400_v32 }
 0x133   :  { %1565 = vmatpush1.bf16.msra.mxu1 %v999_v33 }
 0x134   :  { %1451 = vmatpush1.bf16.msra.mxu0 %v251_v40  ;;  %1804 = vperm.xlu1 %3710, %v44_v30  }
 0x135   :  { %v996_v18 = vpop.permute.xlu1 %995  ;;  %1452 = vmatprep.subr.bf16.mxu0 %v254_v11  ;;  %v998_v10 = vpop.permute.xlu0 %997  ;;  %1819 = vperm.xlu0 %3709, %v47_v58  }
 0x136   :  { %v1002_v17 = vsel %vm411_vm3, %v996_v18, %v998_v10 }
 0x137   :  { %1566 = vmatprep.subr.bf16.mxu1 %v1002_v17 }
 0x138   :  { %1453 = vmatpush1.bf16.msra.mxu0 %v253_v12  ;;  %1814 = vperm.xlu1 %3710, %v46_v42  }
 0x139   :  { %v994_v43 = vpop.permute.xlu1 %993  ;;  %1454 = vmatprep.subr.bf16.mxu0 %v333_v16  ;;  %v498_v50 = vpop.permute.xlu0 %497  ;;  %1878 = vrot.lane.b32.xlu0 %v1875_v22, %s3751_s17 }
 0x13a   :  { %v1001_v8 = vsel %vm411_vm3, %v994_v43, %v996_v18 }
 0x13b   :  { %1567 = vmatpush1.bf16.msra.mxu1 %v1001_v8 }
 0x13c   :  { %1455 = vmatpush1.bf16.msra.mxu0 %v332_v13  ;;  %1568 = vmatprep.subr.bf16.mxu1 %v3967_v51 }
 0x13d   :  { %v500_v2 = vpop.permute.xlu1 %499  ;;  %1456 = vmatprep.subr.bf16.mxu0 %v335_v3  ;;  %v496_v56 = vpop.permute.xlu0 %495  ;;  %1876 = vrot.lane.b32.xlu1 %v1871_v27, %s3751_s17 }
 0x13e   :  { %v509_v37 = vsel %vm370_vm2, %v498_v50, %v500_v2  ;;  %v3711_v2 = vld [vmem:[%s5948_s2] ss:$12 sps:$4 sm:$0xff]  }
 0x13f   :  { %1569 = vmatpush1.bf16.msra.mxu1 %v3947_v47  ;;  %v412_v47 = vsel %vm411_vm3, %v4369_v24, %v4380_v29 }
 0x140   :  { %1457 = vmatpush1.bf16.msra.mxu0 %v334_v14  ;;  %1570 = vmatprep.subr.bf16.mxu1 %v4034_v0 }
 0x141   :  { %v1084_v51 = vpop.permute.xlu1 %1083  ;;  %1458 = vmatprep.subr.bf16.mxu0 %v413_v20  ;;  %v1086_v19 = vpop.permute.xlu0 %1085  ;;  %2456 = vrot.lane.b32.xlu1 %v2451_v63, %s3751_s17 }
 0x142   :  { %v1094_v15 = vsel %vm370_vm2, %v1084_v51, %v1086_v19 }
 0x143   :  { %1571 = vmatpush1.bf16.msra.mxu1 %v4016_v61 }
 0x144   :  { %1459 = vmatpush1.bf16.msra.mxu0 %v412_v47  ;;  %1572 = vmatprep.subr.bf16.mxu1 %v1094_v15  ;;  %v3716_v47 = vld [vmem:[%s5948_s2 + $0x18] ss:$12 sps:$4 sm:$0xff]  }
 0x145   :  { %v504_v0 = vpop.permute.xlu1 %503  ;;  %1460 = vmatprep.subr.bf16.mxu0 %v415_v48  ;;  %v506_v25 = vpop.permute.xlu0 %505 }
 0x146   :  { %v511_v21 = vsel %vm370_vm2, %v504_v0, %v506_v25 }
 0x148   :  { %1461 = vmatpush1.bf16.msra.mxu0 %v414_v49 }
 0x149   :  { %v1082_v45 = vpop.permute.xlu1 %1081  ;;  %v502_v36 = vpop.permute.xlu0 %501  ;;  %1462 = vmatprep.subr.bf16.mxu0 %v3912_v38  ;;  %v508_v38 = vsel %vm370_vm2, %v496_v56, %v498_v50  ;;  %v3714_v56 = vld [vmem:[%s5948_s2 + $0x1c] ss:$12 sps:$4 sm:$0xff]  }
 0x14a   :  { %v1093_v61 = vsel %vm370_vm2, %v1082_v45, %v1084_v51  ;;  %v510_v46 = vsel %vm370_vm2, %v502_v36, %v504_v0 }
 0x14b   :  { %1573 = vmatpush1.bf16.msra.mxu1 %v1093_v61 }
 0x14c   :  { %1463 = vmatpush1.bf16.msra.mxu0 %v3916_v39 }
 0x14d   :  { %v1090_v24 = vpop.permute.xlu1 %1089  ;;  %v1092_v6 = vpop.permute.xlu0 %1091  ;;  %1464 = vmatprep.subr.bf16.mxu0 %v3989_v55 }
 0x14e   :  { %v1096_v29 = vsel %vm370_vm2, %v1090_v24, %v1092_v6 }
 0x14f   :  { %1574 = vmatprep.subr.bf16.mxu1 %v1096_v29 }
 0x150   :  { %1465 = vmatpush1.bf16.msra.mxu0 %v3973_v52 }
 0x151   :  { %v578_v59 = vpop.permute.xlu1 %577  ;;  %1466 = vmatprep.subr.bf16.mxu0 %v509_v37  ;;  %v580_v60 = vpop.permute.xlu0 %579 }
 0x152   :  { %v589_v52 = vsel %vm290_vm1, %v578_v59, %v580_v60 }
 0x154   :  { %1467 = vmatpush1.bf16.msra.mxu0 %v508_v38 }
 0x155   :  { %v1088_v39 = vpop.permute.xlu1 %1087  ;;  %1468 = vmatprep.subr.bf16.mxu0 %v511_v21  ;;  %v576_v7 = vpop.permute.xlu0 %575  ;;  %v3717_v21 = vld [vmem:[%s5948_s2 + $0x8] ss:$12 sps:$4 sm:$0xff]  }
 0x156   :  { %v1095_v55 = vsel %vm370_vm2, %v1088_v39, %v1090_v24  ;;  %v588_v9 = vsel %vm290_vm1, %v576_v7, %v578_v59 }
 0x157   :  { %1575 = vmatpush1.bf16.msra.mxu1 %v1095_v55 }
 0x158   :  { %1469 = vmatpush1.bf16.msra.mxu0 %v510_v46 }
 0x159   :  { %v1162_v57 = vpop.permute.xlu1 %1161  ;;  %1470 = vmatprep.subr.bf16.mxu0 %v589_v52  ;;  %v1164_v23 = vpop.permute.xlu0 %1163 }
 0x15a   :  { %v1172_v44 = vsel %vm290_vm1, %v1162_v57, %v1164_v23 }
 0x15b   :  { %1576 = vmatprep.subr.bf16.mxu1 %v1172_v44 }
 0x15c   :  { %1471 = vmatpush1.bf16.msra.mxu0 %v588_v9 }
 0x15d   :  { %v584_v32 = vpop.permute.xlu1 %583  ;;  %v586_v28 = vpop.permute.xlu0 %585 }
 0x15e   :  { %v591_v26 = vsel %vm290_vm1, %v584_v32, %v586_v28 }
 0x15f   :  { %1472 = vmatprep.subr.bf16.mxu0 %v591_v26 }
 0x161   :  { %v1160_v53 = vpop.permute.xlu1 %1159  ;;  %v582_v54 = vpop.permute.xlu0 %581 }
 0x162   :  { %v590_v31 = vsel %vm290_vm1, %v582_v54, %v584_v32  ;;  %v1171_v1 = vsel %vm290_vm1, %v1160_v53, %v1162_v57  ;;  %v3718_v57 = vld [vmem:[%s5948_s2 + $0x20] ss:$12 sps:$4 sm:$0xff]  }
 0x163   :  { %1473 = vmatpush1.bf16.msra.mxu0 %v590_v31  ;;  %1577 = vmatpush1.bf16.msra.mxu1 %v1171_v1 }
 0x165   :  { %v1168_v35 = vpop.permute.xlu1 %1167  ;;  %v1170_v30 = vpop.permute.xlu0 %1169 }
 0x166   :  { %v1174_v33 = vsel %vm290_vm1, %v1168_v35, %v1170_v30 }
 0x167   :  { %1578 = vmatprep.subr.bf16.mxu1 %v1174_v33 }
 0x169   :  { %v627_v58 = vpop.permute.xlu1 %626  ;;  %v629_v40 = vpop.permute.xlu0 %628 }
 0x16a   :  { %v638_v11 = vsel %vm636_vm7, %v627_v58, %v629_v40 }
 0x16b   :  { %1474 = vmatprep.subr.bf16.mxu0 %v638_v11 }
 0x16d   :  { %v1166_v41 = vpop.permute.xlu1 %1165  ;;  %v625_v18 = vpop.permute.xlu0 %624 }
 0x16e   :  { %v637_v10 = vsel %vm636_vm7, %v625_v18, %v627_v58  ;;  %v1173_v42 = vsel %vm290_vm1, %v1166_v41, %v1168_v35 }
 0x16f   :  { %1475 = vmatpush1.bf16.msra.mxu0 %v637_v10  ;;  %1579 = vmatpush1.bf16.msra.mxu1 %v1173_v42 }
 0x171   :  { %v1210_v22 = vpop.permute.xlu1 %1209  ;;  %v1212_v17 = vpop.permute.xlu0 %1211 }
 0x172   :  { %v1220_v12 = vsel %vm636_vm7, %v1210_v22, %v1212_v17 }
 0x173   :  { %1580 = vmatprep.subr.bf16.mxu1 %v1220_v12 }
 0x175   :  { %v633_v16 = vpop.permute.xlu1 %632  ;;  %v635_v43 = vpop.permute.xlu0 %634 }
 0x176   :  { %v640_v50 = vsel %vm636_vm7, %v633_v16, %v635_v43 }
 0x177   :  { %1476 = vmatprep.subr.bf16.mxu0 %v640_v50 }
 0x179   :  { %v1208_v27 = vpop.permute.xlu1 %1207  ;;  %v631_v8 = vpop.permute.xlu0 %630 }
 0x17a   :  { %v639_v13 = vsel %vm636_vm7, %v631_v8, %v633_v16  ;;  %v1219_v3 = vsel %vm636_vm7, %v1208_v27, %v1210_v22 }
 0x17b   :  { %1477 = vmatpush1.bf16.msra.mxu0 %v639_v13  ;;  %1581 = vmatpush1.bf16.msra.mxu1 %v1219_v3 }
 0x17d   :  { %v1216_v63 = vpop.permute.xlu1 %1215 }
 0x17e   :  { %v1218_v14 = vpop.permute.xlu0 %1217  ;;  %1479 = vmatmul.mubr.bf16.vlgmr.msra.gmra.mrb[0].mxu0 %v3711_v2 }
 0x17f   :  { %v1222_v20 = vsel %vm636_vm7, %v1216_v63, %v1218_v14  ;;  %1488 = vmatprep.mubr.bf16.mxu0 %v3714_v56 }
 0x180   :  { %1582 = vmatprep.subr.bf16.mxu1 %v1222_v20 }
 0x181   :  { %v1214_v51 = vpop.permute.xlu1 %1213 }
 0x182   :  { %v707_v19 = vpop.permute.xlu0 %706  ;;  %v1221_v15 = vsel %vm636_vm7, %v1214_v51, %v1216_v63 }
 0x183   :  { %1583 = vmatpush1.bf16.msra.mxu1 %v1221_v15 }
 0x185   :  { %v709_v48 = vpop.permute.xlu1 %708 }
 0x186   :  { %v705_v0 = vpop.permute.xlu0 %704  ;;  %v718_v25 = vsel %vm160_vm0, %v707_v19, %v709_v48  ;;  %1489 = vmatmul.mubr.bf16.gmra.mrb[4].mxu0 %v3716_v47  ;;  %1585 = vmatmul.mubr.bf16.vlgmr.msra.gmra.mrb[0].mxu1 %v3711_v2 }
 0x187   :  { %v717_v49 = vsel %vm160_vm0, %v705_v0, %v707_v19  ;;  %1499 = vmatprep.subr.bf16.mxu0 %v718_v25  ;;  %1531 = vmatprep.mubr.bf16.mxu0 %v5959_v34 }
 0x188   :  { %1500 = vmatpush1.bf16.msra.mxu0 %v717_v49  ;;  %1594 = vmatprep.mubr.bf16.mxu1 %v3714_v56 }
 0x189   :  { %v1288_v45 = vpop.permute.xlu1 %1287 }
 0x18a   :  { %v1290_v36 = vpop.permute.xlu0 %1289 }
 0x18b   :  { %v1298_v61 = vsel %vm160_vm0, %v1288_v45, %v1290_v36 }
 0x18c   :  { %1605 = vmatprep.subr.bf16.mxu1 %v1298_v61 }
 0x18d   :  { %v713_v24 = vpop.permute.xlu1 %712 }
 0x18e   :  { %v715_v6 = vpop.permute.xlu0 %714  ;;  %1595 = vmatmul.mubr.bf16.gmra.mrb[4].mxu1 %v3716_v47 }
 0x18f   :  { %v720_v29 = vsel %vm160_vm0, %v713_v24, %v715_v6  ;;  %1637 = vmatprep.mubr.bf16.mxu1 %v5959_v34 }
 0x190   :  { %1501 = vmatprep.subr.bf16.mxu0 %v720_v29 }
 0x191   :  { %v1286_v37 = vpop.permute.xlu1 %1285 }
 0x192   :  { %v1297_v59 = vsel %vm160_vm0, %v1286_v37, %v1288_v45  ;;  %v711_v60 = vpop.permute.xlu0 %710 }
 0x193   :  { %v719_v38 = vsel %vm160_vm0, %v711_v60, %v713_v24  ;;  %1606 = vmatpush1.bf16.msra.mxu1 %v1297_v59 }
 0x194   :  { %1502 = vmatpush1.bf16.msra.mxu0 %v719_v38  ;;  %v3611_v38 = vld [vmem:[%s5946_s1 + $0x4] sm:$0x3] }
 0x195   :  { %v1294_v39 = vpop.permute.xlu1 %1293 }
 0x196   :  { %v1296_v7 = vpop.permute.xlu0 %1295 }
 0x197   :  { %3607 = vmatmul.mubr.msk.bf16.vlgmr.msra.gmra.mrb[0].mxu0 %vm1439_vm8, %v3717_v21  ;;  %v1300_v55 = vsel %vm160_vm0, %v1294_v39, %v1296_v7  ;;  %v2001_v7 = vrot.slane %v3611_v38, %v3824_v5 }
 0x198   :  { %1607 = vmatprep.subr.bf16.mxu1 %v1300_v55  ;;  %1541 = vmatprep.mubr.bf16.mxu0 %v5959_v34  ;;  %v3614_v55 = vld [vmem:[%s5946_s1 + $0x4] sm:$0x3] }
 0x199   :  { %v1292_v46 = vpop.permute.xlu1 %1291 }
 0x19a   :  { %v1299_v52 = vsel %vm160_vm0, %v1292_v46, %v1294_v39  ;;  %v2455_v39 = vrot.slane %v4449_v62, %v3824_v5  ;;  %v2581_v46 = vrot.slane %v3614_v55, %v3824_v5  ;;  %v2070_v62 = vld [vmem:[%s5946_s1] sm:$0x3] }
 0x19b   :  { %1608 = vmatpush1.bf16.msra.mxu1 %v1299_v52 }
 0x19e   :  { %3609 = vmatmul.mubr.msk.bf16.vlgmr.msra.gmra.mrb[0].mxu1 %vm1439_vm8, %v3717_v21  ;;  %v1997_v21 = vrot.slane %v3611_v38, %v3822_v4 }
 0x19f   :  { %3608 = vmatmul.mubr.msk.bf16.gmra.mrb[4].mxu0 %vm1439_vm8, %v3718_v57  ;;  %1647 = vmatprep.mubr.bf16.mxu1 %v5959_v34 }
 0x1a6   :  { %3610 = vmatmul.mubr.msk.bf16.gmra.mrb[4].mxu1 %vm1439_vm8, %v3718_v57 }
 0x1a7   :  { %v1392_v23 = vpop.permute.xlu0 %1391 }
 0x1ab   :  { %v1397_v9 = vpop.permute.xlu1 %1396 }
 0x1ac   :  { %v1407_v52 = vpop.permute.xlu0 %1406 }
 0x1af   :  { %v1402_v33 = vpop.permute.xlu1 %1401 }
 0x26a   :  { %v1533_v44 = vpop.f32.mrb[0].mxu0 }
 0x26b   :  { %v4538_v32 = vadd.f32 %v1533_v44, %v1392_v23  ;;  %v1535_v28 = vpop.f32.mrb[1].mxu0  ;;  %v2079_v44 = vrot.slane %v2070_v62, %v3824_v5 }
 0x26c   :  { %v4540_v26 = vadd.f32 %v1535_v28, %v1392_v23  ;;  %v1537_v53 = vpop.f32.mrb[2].mxu0 }
 0x26d   :  { %v1539_v54 = vpop.f32.mrb[3].mxu0  ;;  %v4542_v31 = vadd.f32 %v1537_v53, %v1397_v9  ;;  %v1658_v35 = vmax.f32 %v4538_v32, 0.0 }
 0x26e   :  { %v4544_v1 = vadd.f32 %v1539_v54, %v1397_v9  ;;  %v1659_v30 = vmax.f32 %v4540_v26, 0.0  ;;  %v2650_v54 = vld [vmem:[%s5946_s1] sm:$0x3] }
 0x26f   :  { %v1662_v40 = vmax.f32 %v4542_v31, 0.0 }
 0x270   :  { %v1663_v11 = vmax.f32 %v4544_v1, 0.0  ;;  %v1674_v42 = vadd.f32 %v1659_v30, %v1658_v35 }
 0x271   :  { %v1639_v58 = vpop.f32.mrb[0].mxu1 }
 0x272   :  { %v1543_v41 = vpop.f32.mrb[4].mxu0  ;;  %v4550_v18 = vadd.f32 %v1639_v58, %v1392_v23  ;;  %v1641_v10 = vpop.f32.mrb[1].mxu1  ;;  %v1679_v63 = vadd.f32 %v1663_v11, %v1662_v40 }
 0x273   :  { %v1545_v22 = vpop.f32.mrb[5].mxu0  ;;  %v4556_v17 = vadd.f32 %v1641_v10, %v1392_v23  ;;  %v1643_v12 = vpop.f32.mrb[2].mxu1  ;;  %v4558_v16 = vadd.f32 %v1543_v41, %v1402_v33  ;;  %v3612_v10 = vld [vmem:[%s5946_s1 + $0x4] sm:$0x3] }
 0x274   :  { %v1660_v43 = vmax.f32 %v4550_v18, 0.0  ;;  %v4561_v50 = vadd.f32 %v1545_v22, %v1402_v33  ;;  %v1547_v27 = vpop.f32.mrb[6].mxu0  ;;  %v4563_v8 = vadd.f32 %v1643_v12, %v1397_v9  ;;  %v1645_v13 = vpop.f32.mrb[3].mxu1  ;;  %v2173_v22 = vrot.slane %v3612_v10, %v3824_v5 }
 0x275   :  { %v1661_v3 = vmax.f32 %v4556_v17, 0.0  ;;  %v1549_v2 = vpop.f32.mrb[7].mxu0  ;;  %v4566_v56 = vadd.f32 %v1645_v13, %v1397_v9  ;;  %v1666_v19 = vmax.f32 %v4558_v16, 0.0  ;;  %v4612_v57 = vadd.f32 %v1547_v27, %v1407_v52  ;;  %v3615_v13 = vld [vmem:[%s5946_s1 + $0x4] sm:$0x3] }
 0x276   :  { %v1675_v14 = vadd.f32 %v1674_v42, %v1660_v43  ;;  %v1664_v20 = vmax.f32 %v4563_v8, 0.0  ;;  %v1667_v15 = vmax.f32 %v4561_v50, 0.0  ;;  %v4614_v23 = vadd.f32 %v1549_v2, %v1407_v52 }
 0x277   :  { %v1665_v51 = vmax.f32 %v4566_v56, 0.0  ;;  %v1670_v28 = vmax.f32 %v4612_v57, 0.0  ;;  %v2753_v2 = vrot.slane %v3615_v13, %v3824_v5 }
 0x278   :  { %v1676_v47 = vadd.f32 %v1675_v14, %v1661_v3  ;;  %v1680_v48 = vadd.f32 %v1679_v63, %v1664_v20  ;;  %v1684_v24 = vadd.f32 %v1667_v15, %v1666_v19  ;;  %v1671_v53 = vmax.f32 %v4614_v23, 0.0  ;;  %v2242_v14 = vld [vmem:[%s5946_s1] sm:$0x3] }
 0x279   :  { %v1649_v0 = vpop.f32.mrb[4].mxu1 }
 0x27a   :  { %v1681_v25 = vadd.f32 %v1680_v48, %v1665_v51  ;;  %v4584_v49 = vadd.f32 %v1649_v0, %v1402_v33  ;;  %v1651_v45 = vpop.f32.mrb[5].mxu1  ;;  %1677 = vadd.xlane.f32.xlu1 %v1676_v47  ;;  %v1689_v42 = vadd.f32 %v1671_v53, %v1670_v28  ;;  %v2251_v47 = vrot.slane %v2242_v14, %v3824_v5 }
 0x27b   :  { %v4586_v36 = vadd.f32 %v1651_v45, %v1402_v33  ;;  %v1653_v61 = vpop.f32.mrb[6].mxu1  ;;  %v2659_v33 = vrot.slane %v2650_v54, %v3824_v5  ;;  %v2577_v48 = vrot.slane %v3614_v55, %v3822_v4  ;;  %v2075_v0 = vrot.slane %v2070_v62, %v3822_v4 }
 0x27c   :  { %v1668_v6 = vmax.f32 %v4584_v49, 0.0  ;;  %v1655_v29 = vpop.f32.mrb[7].mxu1  ;;  %1682 = vadd.xlane.f32.xlu0 %v1681_v25  ;;  %v4621_v9 = vadd.f32 %v1653_v61, %v1407_v52  ;;  %v2655_v25 = vrot.slane %v2650_v54, %v3822_v4  ;;  %v2169_v45 = vrot.slane %v3612_v10, %v3822_v4 }
 0x27d   :  { %v1669_v37 = vmax.f32 %v4586_v36, 0.0  ;;  %v4631_v41 = vadd.f32 %v1655_v29, %v1407_v52  ;;  %v2749_v61 = vrot.slane %v3615_v13, %v3822_v4  ;;  %v2822_v29 = vld [vmem:[%s5946_s1] sm:$0x3] }
 0x27e   :  { %v1685_v59 = vadd.f32 %v1684_v24, %v1668_v6  ;;  %v1672_v58 = vmax.f32 %v4621_v9, 0.0  ;;  %v2247_v24 = vrot.slane %v2242_v14, %v3822_v4  ;;  %v2831_v36 = vrot.slane %v2822_v29, %v3824_v5 }
 0x27f   :  { %v1673_v27 = vmax.f32 %v4631_v41, 0.0  ;;  %v5969_v9 = vmov 0.0|0.0  }
 0x280   :  { %v1686_v60 = vadd.f32 %v1685_v59, %v1669_v37  ;;  %v1690_v12 = vadd.f32 %v1689_v42, %v1672_v58  ;;  %v2827_v59 = vrot.slane %v2822_v29, %v3822_v4 }
 0x282   :  { %1687 = vadd.xlane.f32.xlu0 %v1686_v60  ;;  %v1691_v63 = vadd.f32 %v1690_v12, %v1673_v27  ;;  %v4675_v60 = vpop.permute.xlu1 %1804 }
 0x286   :  { %v4677_v38 = vpop.permute.xlu1 %1814 }
 0x28b   :  { %2002 = vrot.lane.b32.xlu1 %v1997_v21, %s3752_s22  ;;  %v4679_v21 = vpop.permute.xlu0 %1809 }
 0x298   :  { %2458 = vrot.lane.b32.xlu0 %v2455_v39, %s3751_s17  ;;  %v4681_v39 = vpop.permute.xlu1 %1876 }
 0x29c   :  { %2004 = vrot.lane.b32.xlu0 %v2001_v7, %s3752_s22  ;;  %v4683_v7 = vpop.permute.xlu0 %1819  ;;  %v4685_v55 = vpop.permute.xlu1 %2456 }
 0x2a0   :  { %2584 = vrot.lane.b32.xlu0 %v2581_v46, %s3752_s22  ;;  %v4687_v46 = vpop.permute.xlu0 %1878 }
 0x2a4   :  { %2082 = vrot.lane.b32.xlu0 %v2079_v44, %s3753_s27 }
 0x2a8   :  { %2662 = vrot.lane.b32.xlu0 %v2659_v33, %s3753_s27 }
 0x2ac   :  { %2176 = vrot.lane.b32.xlu0 %v2173_v22, %s3754_s12 }
 0x2af   :  { %1692 = vadd.xlane.f32.xlu1 %v1691_v63 }
 0x2b0   :  { %2756 = vrot.lane.b32.xlu0 %v2753_v2, %s3754_s12 }
 0x2b4   :  { %2254 = vrot.lane.b32.xlu0 %v2251_v47, %s3755_s18 }
 0x2c0   :  { %2582 = vrot.lane.b32.xlu1 %v2577_v48, %s3752_s22 }
 0x2c4   :  { %2080 = vrot.lane.b32.xlu1 %v2075_v0, %s3753_s27 }
 0x2c8   :  { %2660 = vrot.lane.b32.xlu1 %v2655_v25, %s3753_s27 }
 0x2cc   :  { %2174 = vrot.lane.b32.xlu1 %v2169_v45, %s3754_s12 }
 0x2d0   :  { %2754 = vrot.lane.b32.xlu1 %v2749_v61, %s3754_s12  ;;  %v3613_v61 = vld [vmem:[%s5946_s1 + $0x4] sm:$0x3] }
 0x2d4   :  { %2252 = vrot.lane.b32.xlu1 %v2247_v24, %s3755_s18 }
 0x2d8   :  { %2832 = vrot.lane.b32.xlu1 %v2827_v59, %s3755_s18 }
 0x307   :  { %v1678_v52 = vpop.xlane.xlu1 %1677 }
 0x308   :  { %v1694_v62 = vmul.f32 0.001953125, %v1678_v52  ;;  %v2373_v52 = vrot.slane %v3613_v61, %v3822_v4 }
 0x309   :  { %v1683_v44 = vpop.xlane.xlu0 %1682 }
 0x30a   :  { %v4691_v54 = vsub.f32 %v1658_v35, %v1694_v62  ;;  %v4695_v33 = vsub.f32 %v1659_v30, %v1694_v62  ;;  %v1695_v10 = vmul.f32 0.001953125, %v1683_v44  ;;  %v4699_v42 = vsub.f32 %v1660_v43, %v1694_v62 }
 0x30b   :  { %v4715_v26 = vsub.f32 %v1661_v3, %v1694_v62  ;;  %v4768_v24 = vpop.permute.xlu1 %2002 }
 0x30c   :  { %v4703_v22 = vsub.f32 %v1662_v40, %v1695_v10  ;;  %v4707_v12 = vsub.f32 %v1663_v11, %v1695_v10  ;;  %v4711_v32 = vsub.f32 %v1664_v20, %v1695_v10  ;;  %v1714_v35 = vmul.f32 %v4691_v54, %v4691_v54 }
 0x30d   :  { %v1715_v31 = vmul.f32 %v4695_v33, %v4695_v33  ;;  %v4723_v30 = vsub.f32 %v1665_v51, %v1695_v10  ;;  %v1716_v18 = vmul.f32 %v4699_v42, %v4699_v42  ;;  %v1717_v56 = vmul.f32 %v4715_v26, %v4715_v26 }
 0x30e   :  { %v1718_v1 = vmul.f32 %v4703_v22, %v4703_v22  ;;  %v1719_v40 = vmul.f32 %v4707_v12, %v4707_v12  ;;  %v1720_v8 = vmul.f32 %v4711_v32, %v4711_v32 }
 0x30f   :  { %v1688_v11 = vpop.xlane.xlu0 %1687  ;;  %v1730_v17 = vadd.f32 %v1715_v31, %v1714_v35  ;;  %v1721_v51 = vmul.f32 %v4723_v30, %v4723_v30 }
 0x310   :  { %v1696_v43 = vmul.f32 0.001953125, %v1688_v11  ;;  %v1735_v3 = vadd.f32 %v1719_v40, %v1718_v1  ;;  %v3616_v1 = vld [vmem:[%s5946_s1 + $0x4] sm:$0x3] }
 0x311   :  { %v1731_v20 = vadd.f32 %v1730_v17, %v1716_v18 }
 0x312   :  { %v4739_v13 = vsub.f32 %v1666_v19, %v1696_v43  ;;  %v4743_v2 = vsub.f32 %v1667_v15, %v1696_v43  ;;  %v4747_v63 = vsub.f32 %v1668_v6, %v1696_v43  ;;  %v1736_v14 = vadd.f32 %v1735_v3, %v1720_v8 }
 0x313   :  { %v1732_v47 = vadd.f32 %v1731_v20, %v1717_v56  ;;  %v4751_v0 = vsub.f32 %v1669_v37, %v1696_v43  ;;  %v2464_v37 = vmul.f32 0.0, %v4685_v55  ;;  %v4770_v59 = vpop.permute.xlu0 %2458 }
 0x314   :  { %v1737_v48 = vadd.f32 %v1736_v14, %v1721_v51  ;;  %v1722_v16 = vmul.f32 %v4739_v13, %v4739_v13  ;;  %v1723_v19 = vmul.f32 %v4743_v2, %v4743_v2  ;;  %v1724_v50 = vmul.f32 %v4747_v63, %v4747_v63 }
 0x315   :  { %1733 = vadd.xlane.f32.xlu0 %v1732_v47  ;;  %v1725_v49 = vmul.f32 %v4751_v0, %v4751_v0  ;;  %v2476_v45 = vpack.c.bf16 %v2464_v37, %v2464_v37 }
 0x316   :  { %1738 = vadd.xlane.f32.xlu1 %v1737_v48  ;;  %v1740_v15 = vadd.f32 %v1723_v19, %v1722_v16  ;;  %v1884_v48 = vmul.f32 0.0, %v4681_v39 }
 0x317   :  { %v4775_v44 = vpop.permute.xlu0 %2004 }
 0x318   :  { %v1741_v6 = vadd.f32 %v1740_v15, %v1724_v50  ;;  %v1896_v50 = vpack.c.bf16 %v1884_v48, %v1884_v48 }
 0x31a   :  { %v1742_v25 = vadd.f32 %v1741_v6, %v1725_v49  ;;  %v2377_v49 = vrot.slane %v3613_v61, %v3824_v5  ;;  %v2953_v6 = vrot.slane %v3616_v1, %v3822_v4 }
 0x31b   :  { %v4807_v18 = vpop.permute.xlu0 %2584 }
 0x31c   :  { %1743 = vadd.xlane.f32.xlu0 %v1742_v25  ;;  %v2010_v25 = vmul.f32 0.0, %v4768_v24 }
 0x31f   :  { %v4815_v3 = vpop.permute.xlu0 %2082 }
 0x323   :  { %v4823_v14 = vpop.permute.xlu0 %2662 }
 0x327   :  { %v4827_v16 = vpop.permute.xlu0 %2176 }
 0x328   :  { %v2184_v19 = vmul.f32 0.0, %v4827_v16 }
 0x32a   :  { %v2196_v15 = vpack.c.bf16 %v2184_v19, %v2184_v19 }
 0x332   :  { %2834 = vrot.lane.b32.xlu0 %v2831_v36, %s3755_s18  ;;  %v2022_v36 = vpack.c.bf16 %v2010_v25, %v2010_v25 }
 0x336   :  { %2488 = vrot.lane.b32.xlu0 %v2476_v45, %s3758_s19 }
 0x33a   :  { %2494 = vrot.lane.b32.xlu0 %v2476_v45, %s3758_s19 }
 0x33c   :  { %v1693_v29 = vpop.xlane.xlu1 %1692 }
 0x33d   :  { %v1697_v62 = vmul.f32 0.001953125, %v1693_v29 }
 0x33e   :  { %2378 = vrot.lane.b32.xlu0 %v2373_v52, %s3758_s19 }
 0x33f   :  { %v4779_v10 = vsub.f32 %v1670_v28, %v1697_v62  ;;  %v4783_v35 = vsub.f32 %v1671_v53, %v1697_v62  ;;  %v4787_v31 = vsub.f32 %v1672_v58, %v1697_v62  ;;  %v4796_v11 = vsub.f32 %v1673_v27, %v1697_v62 }
 0x340   :  { %v4792_v40 = vpop.permute.xlu1 %2582  ;;  %v2957_v28 = vrot.slane %v3616_v1, %v3824_v5  ;;  %v4848_v5 = vpop.permute.xlu0 %2756 }
 0x341   :  { %v1726_v57 = vmul.f32 %v4779_v10, %v4779_v10  ;;  %v1727_v23 = vmul.f32 %v4783_v35, %v4783_v35  ;;  %v1728_v53 = vmul.f32 %v4787_v31, %v4787_v31  ;;  %v1729_v41 = vmul.f32 %v4796_v11, %v4796_v11 }
 0x342   :  { %2536 = vrot.lane.b32.xlu0 %v5969_v9, %s3756_s11  ;;  %v2590_v43 = vmul.f32 0.0, %v4792_v40  ;;  %v2764_v4 = vmul.f32 0.0, %v4848_v5 }
 0x343   :  { %v1745_v58 = vadd.f32 %v1727_v23, %v1726_v57 }
 0x344   :  { %v4811_v17 = vpop.permute.xlu1 %2080  ;;  %v2602_v56 = vpack.c.bf16 %v2590_v43, %v2590_v43  ;;  %v2776_v61 = vpack.c.bf16 %v2764_v4, %v2764_v4  ;;  %v4861_v1 = vpop.permute.xlu0 %2254 }
 0x345   :  { %v1746_v27 = vadd.f32 %v1745_v58, %v1728_v53  ;;  %v2088_v37 = vmul.f32 0.0, %v4811_v17  ;;  %v2262_v25 = vmul.f32 0.0, %v4861_v1 }
 0x346   :  { %2960 = vrot.lane.b32.xlu0 %v2957_v28, %s3758_s19 }
 0x347   :  { %v1747_v8 = vadd.f32 %v1746_v27, %v1729_v41  ;;  %v2100_v45 = vpack.c.bf16 %v2088_v37, %v2088_v37  ;;  %v2274_v4 = vpack.c.bf16 %v2262_v25, %v2262_v25 }
 0x348   :  { %v4819_v20 = vpop.permute.xlu1 %2660 }
 0x349   :  { %1748 = vadd.xlane.f32.xlu1 %v1747_v8  ;;  %v2668_v51 = vmul.f32 0.0, %v4819_v20 }
 0x34a   :  { %2542 = vrot.lane.b32.xlu0 %v5969_v9, %s3756_s11 }
 0x34b   :  { %v2680_v47 = vpack.c.bf16 %v2668_v51, %v2668_v51  ;;  %v40_v51 = vld [vmem:[%s5951_s4] sm:$0xff] }
 0x34c   :  { %v4855_v52 = vpop.permute.xlu1 %2174 }
 0x34e   :  { %2614 = vrot.lane.b32.xlu0 %v2602_v56, %s3755_s18 }
 0x350   :  { %v4857_v29 = vpop.permute.xlu1 %2754 }
 0x352   :  { %2620 = vrot.lane.b32.xlu0 %v2602_v56, %s3755_s18 }
 0x354   :  { %v4859_v62 = vpop.permute.xlu1 %2252 }
 0x356   :  { %2692 = vrot.lane.b32.xlu0 %v2680_v47, %s3754_s12 }
 0x358   :  { %v4863_v57 = vpop.permute.xlu1 %2832 }
 0x35a   :  { %1908 = vrot.lane.b32.xlu1 %v1896_v50, %s3758_s19  ;;  %2698 = vrot.lane.b32.xlu0 %v2680_v47, %s3754_s12  ;;  %v41_v47 = vld [vmem:[%s5951_s4 + $0x8] sm:$0xff] }
 0x35e   :  { %1914 = vrot.lane.b32.xlu1 %v1896_v50, %s3758_s19  ;;  %2210 = vrot.lane.b32.xlu0 %v2196_v15, %s3753_s27 }
 0x362   :  { %1956 = vrot.lane.b32.xlu1 %v5969_v9, %s3756_s11 }
 0x366   :  { %2380 = vrot.lane.b32.xlu1 %v2377_v49, %s3758_s19  ;;  %v42_v49 = vld [vmem:[%s5951_s4 + $0x10] sm:$0xff] }
 0x36a   :  { %2958 = vrot.lane.b32.xlu1 %v2953_v6, %s3758_s19 }
 0x36e   :  { %1962 = vrot.lane.b32.xlu1 %v5969_v9, %s3756_s11 }
 0x372   :  { %2034 = vrot.lane.b32.xlu1 %v2022_v36, %s3755_s18 }
 0x376   :  { %2040 = vrot.lane.b32.xlu1 %v2022_v36, %s3755_s18 }
 0x37a   :  { %2112 = vrot.lane.b32.xlu1 %v2100_v45, %s3754_s12 }
 0x37e   :  { %2118 = vrot.lane.b32.xlu1 %v2100_v45, %s3754_s12 }
 0x382   :  { %2790 = vrot.lane.b32.xlu1 %v2776_v61, %s3753_s27 }
 0x386   :  { %2216 = vrot.lane.b32.xlu1 %v2196_v15, %s3753_s27 }
 0x38a   :  { %2796 = vrot.lane.b32.xlu1 %v2776_v61, %s3753_s27 }
 0x3a2   :  { %v1734_v23 = vpop.xlane.xlu0 %1733 }
 0x3a3   :  { %v1750_v28 = vmul.f32 0.001953125, %v1734_v23  ;;  %v1739_v53 = vpop.xlane.xlu1 %1738 }
 0x3a4   :  { %v1751_v58 = vmul.f32 0.001953125, %v1739_v53 }
 0x3a5   :  { %v1754_v41 = vadd.f32 1e-05, %v1750_v28 }
 0x3a6   :  { %v1755_v27 = vadd.f32 1e-05, %v1751_v58  ;;  %v43_v58 = vld [vmem:[%s5951_s4 + $0x18] sm:$0xff] }
 0x3a7   :  { %3727 = vrsqrt.f32 %v1754_v41 }
 0x3a8   :  { %3729 = vrsqrt.f32 %v1755_v27 }
 0x3a9   :  { %v1744_v43 = vpop.xlane.xlu0 %1743 }
 0x3aa   :  { %v1752_v8 = vmul.f32 0.001953125, %v1744_v43 }
 0x3ac   :  { %v1756_v56 = vadd.f32 1e-05, %v1752_v8 }
 0x3ad   :  { %v4875_v37 = vpop.permute.xlu0 %2834 }
 0x3ae   :  { %3731 = vrsqrt.f32 %v1756_v56  ;;  %v2842_v45 = vmul.f32 0.0, %v4875_v37 }
 0x3b0   :  { %v2854_v61 = vpack.c.bf16 %v2842_v45, %v2842_v45 }
 0x3b1   :  { %v3728_v48 = vpop.eup %3727  ;;  %v4889_v56 = vpop.permute.xlu0 %2488 }
 0x3b2   :  { %v3730_v19 = vpop.eup %3729  ;;  %v1762_v50 = vmul.f32 %v3728_v48, %v40_v51  ;;  %5972 = vst [vmem:[#allocation6_spill] sm:$0xff] %v4889_v56 }
 0x3b3   :  { %v1763_v15 = vmul.f32 %v3730_v19, %v41_v47 }
 0x3b4   :  { %1768 = vperm.xlu0 %3709, %v1762_v50  }
 0x3b5   :  { %1773 = vperm.xlu1 %3710, %v1763_v15   ;;  %v4893_v47 = vpop.permute.xlu0 %2494 }
 0x3b6   :  { %5974 = vst [vmem:[#allocation8_spill] sm:$0xff] %v4893_v47 }
 0x3b8   :  { %v3732_v6 = vpop.eup %3731 }
 0x3b9   :  { %v1764_v36 = vmul.f32 %v3732_v6, %v42_v49  ;;  %v4897_v19 = vpop.permute.xlu0 %2378 }
 0x3bb   :  { %1778 = vperm.xlu1 %3710, %v1764_v36  }
 0x3bd   :  { %v4901_v15 = vpop.permute.xlu0 %2536 }
 0x3be   :  { %5976 = vst [vmem:[#allocation10_spill] sm:$0xff] %v4901_v15 }
 0x3bf   :  { %2288 = vrot.lane.b32.xlu1 %v2274_v4, %s3752_s22 }
 0x3c1   :  { %v4905_v6 = vpop.permute.xlu0 %2960 }
 0x3c2   :  { %5978 = vst [vmem:[#allocation12_spill] sm:$0xff] %v4905_v6 }
 0x3c3   :  { %2868 = vrot.lane.b32.xlu1 %v2854_v61, %s3752_s22 }
 0x3c5   :  { %v4909_v36 = vpop.permute.xlu0 %2542 }
 0x3c6   :  { %5980 = vst [vmem:[#allocation14_spill] sm:$0xff] %v4909_v36 }
 0x3c7   :  { %2294 = vrot.lane.b32.xlu1 %v2274_v4, %s3752_s22 }
 0x3c9   :  { %v4913_v4 = vpop.permute.xlu0 %2614 }
 0x3ca   :  { %5982 = vst [vmem:[#allocation16_spill] sm:$0xff] %v4913_v4 }
 0x3cb   :  { %2874 = vrot.lane.b32.xlu1 %v2854_v61, %s3752_s22 }
 0x3d6   :  { %v1749_v23 = vpop.xlane.xlu1 %1748 }
 0x3d7   :  { %v1753_v28 = vmul.f32 0.001953125, %v1749_v23  ;;  %v4917_v23 = vpop.permute.xlu0 %2620 }
 0x3d8   :  { %5984 = vst [vmem:[#allocation18_spill] sm:$0xff] %v4917_v23 }
 0x3d9   :  { %v1757_v53 = vadd.f32 1e-05, %v1753_v28 }
 0x3da   :  { %v4885_v43 = vpop.permute.xlu1 %1908 }
 0x3db   :  { %3733 = vrsqrt.f32 %v1757_v53  ;;  %5970 = vst [vmem:[#allocation4_spill] sm:$0xff] %v4885_v43  ;;  %v4921_v53 = vpop.permute.xlu0 %2692 }
 0x3dc   :  { %5986 = vst [vmem:[#allocation20_spill] sm:$0xff] %v4921_v53 }
 0x3de   :  { %v4887_v8 = vpop.permute.xlu1 %1914 }
 0x3df   :  { %5971 = vst [vmem:[#allocation5_spill] sm:$0xff] %v4887_v8 }
 0x3e2   :  { %v4891_v51 = vpop.permute.xlu1 %1956 }
 0x3e3   :  { %5973 = vst [vmem:[#allocation7_spill] sm:$0xff] %v4891_v51 }
 0x3e5   :  { %v3734_v41 = vpop.eup %3733 }
 0x3e6   :  { %v1765_v27 = vmul.f32 %v3734_v41, %v43_v58  ;;  %v4895_v48 = vpop.permute.xlu1 %2380  ;;  %v4925_v41 = vpop.permute.xlu0 %2698 }
 0x3e7   :  { %5975 = vst [vmem:[#allocation9_spill] sm:$0xff] %v4895_v48  ;;  %5988 = vst [vmem:[#allocation22_spill] sm:$0xff] %v4925_v41 }
 0x3e8   :  { %1783 = vperm.xlu0 %3709, %v1765_v27  }
 0x3ea   :  { %v4899_v50 = vpop.permute.xlu1 %2958  ;;  %v4929_v34 = vpop.permute.xlu0 %2210 }
 0x3eb   :  { %5990 = vst [vmem:[#allocation24_spill] sm:$0xff] %v4929_v34 }
 0x3ee   :  { %v4903_v49 = vpop.permute.xlu1 %1962 }
 0x3ef   :  { %5977 = vst [vmem:[#allocation11_spill] sm:$0xff] %v4903_v49 }
 0x3f2   :  { %v4907_v25 = vpop.permute.xlu1 %2034 }
 0x3f3   :  { %5979 = vst [vmem:[#allocation13_spill] sm:$0xff] %v4907_v25 }
 0x3f6   :  { %v4911_v45 = vpop.permute.xlu1 %2040 }
 0x3f7   :  { %5981 = vst [vmem:[#allocation15_spill] sm:$0xff] %v4911_v45 }
 0x3fa   :  { %v4915_v61 = vpop.permute.xlu1 %2112 }
 0x3fb   :  { %5983 = vst [vmem:[#allocation17_spill] sm:$0xff] %v4915_v61 }
 0x3fe   :  { %v4919_v28 = vpop.permute.xlu1 %2118 }
 0x3ff   :  { %5985 = vst [vmem:[#allocation19_spill] sm:$0xff] %v4919_v28 }
 0x402   :  { %v4923_v58 = vpop.permute.xlu1 %2790 }
 0x403   :  { %5987 = vst [vmem:[#allocation21_spill] sm:$0xff] %v4923_v58 }
 0x406   :  { %v4927_v27 = vpop.permute.xlu1 %2216 }
 0x407   :  { %5989 = vst [vmem:[#allocation23_spill] sm:$0xff] %v4927_v27 }
 0x40a   :  { %v4931_v36 = vpop.permute.xlu1 %2796 }
 0x40b   :  { %5991 = vst [vmem:[#allocation25_spill] sm:$0xff] %v4931_v36 }
 0x433   :  { %v1769_v45 = vpop.permute.xlu0 %1768 }
 0x434   :  { %v1786_v4 = vmul.f32 %v1769_v45, %v4691_v54  ;;  %v1787_v61 = vmul.f32 %v1769_v45, %v4695_v33  ;;  %v1774_v23 = vpop.permute.xlu1 %1773  ;;  %v1789_v41 = vmul.f32 %v1769_v45, %v4715_v26 }
 0x435   :  { %v1790_v28 = vmul.f32 %v1774_v23, %v4703_v22  ;;  %v1791_v53 = vmul.f32 %v1774_v23, %v4707_v12  ;;  %v1793_v58 = vmul.f32 %v1774_v23, %v4723_v30  ;;  %v1792_v27 = vmul.f32 %v1774_v23, %v4711_v32 }
 0x436   :  { %v4941_v34 = vadd.f32 %v4675_v60, %v1786_v4  ;;  %v4944_v36 = vadd.f32 %v4675_v60, %v1787_v61  ;;  %v1788_v22 = vmul.f32 %v1769_v45, %v4699_v42  ;;  %v4968_v4 = vadd.f32 %v4675_v60, %v1789_v41 }
 0x437   :  { %v4947_v54 = vadd.f32 %v4679_v21, %v1790_v28  ;;  %v4950_v33 = vadd.f32 %v4679_v21, %v1791_v53  ;;  %v4954_v12 = vadd.f32 %v4679_v21, %v1793_v58  ;;  %v4965_v30 = vadd.f32 %v4679_v21, %v1792_v27 }
 0x438   :  { %v4975_v42 = vsel %vm160_vm0, %v4681_v39, %v4687_v46  ;;  %v4978_v45 = vadd.f32 %v4675_v60, %v1788_v22  ;;  %v2466_v41 = vmul.f32 %v4770_v59, %v4968_v4  ;;  %v1886_v27 = vmul.f32 %v4687_v46, %v4944_v36 }
 0x439   :  { %v4958_v32 = vpack.c.bf16 %v4950_v33, %v4944_v36  ;;  %v4962_v26 = vpack.c.bf16 %v4947_v54, %v4941_v34  ;;  %v4984_v21 = vpack.c.bf16 %v4954_v12, %v4968_v4  ;;  %v1888_v61 = vmul.f32 %v4975_v42, %v4947_v54 }
 0x43a   :  { %v4990_v23 = vpack.c.bf16 %v4965_v30, %v4978_v45  ;;  %v1885_v60 = vmul.f32 %v4975_v42, %v4941_v34  ;;  %v2469_v28 = vmul.f32 %v4770_v59, %v4954_v12  ;;  %v1889_v53 = vmul.f32 %v4687_v46, %v4950_v33  ;;  %v5002_v58 = vpop.permute.xlu1 %1778 }
 0x43b   :  { %5992 = vst [vmem:[#allocation26_spill] sm:$0xff] %v4958_v32  ;;  %1960 = vrot.lane.b32.xlu1 %v4958_v32, %s3756_s11  ;;  %1958 = vrot.lane.b32.xlu0 %v4962_v26, %s3756_s11  ;;  %v5014_v22 = vsel %vm160_vm0, %v4685_v55, %v4770_v59  ;;  %v2012_v55 = vmul.f32 %v4775_v44, %v4944_v36 }
 0x43c   :  { %v1897_v39 = vpack.c.bf16 %v1888_v61, %v1885_v60  ;;  %v2478_v61 = vpack.c.bf16 %v2469_v28, %v2466_v41  ;;  %v2015_v60 = vmul.f32 %v4775_v44, %v4950_v33  ;;  %v1898_v25 = vpack.c.bf16 %v1889_v53, %v1886_v27 }
 0x43d   :  { %v2468_v49 = vmul.f32 %v5014_v22, %v4965_v30  ;;  %v5030_v28 = vsel %vm290_vm1, %v4768_v24, %v4775_v44  ;;  %v5042_v27 = vsel %vm290_vm1, %v4792_v40, %v4807_v18  ;;  %v2592_v40 = vmul.f32 %v4807_v18, %v4968_v4 }
 0x43e   :  { %v2024_v53 = vpack.c.bf16 %v2015_v60, %v2012_v55  ;;  %v2014_v41 = vmul.f32 %v5030_v28, %v4947_v54  ;;  %v2011_v55 = vmul.f32 %v5030_v28, %v4941_v34  ;;  %v2090_v15 = vmul.f32 %v4815_v3, %v4944_v36 }
 0x43f   :  { %2540 = vrot.lane.b32.xlu1 %v4984_v21, %s3756_s11  ;;  %2538 = vrot.lane.b32.xlu0 %v4990_v23, %s3756_s11 }
 0x443   :  { %1910 = vrot.lane.b32.xlu1 %v1897_v39, %s3758_s19  ;;  %2334 = vrot.lane.b32.xlu0 %v4958_v32, %s3759_s13  ;;  %v1795_v39 = vmul.f32 %v5002_v58, %v4743_v2  ;;  %v1797_v32 = vmul.f32 %v5002_v58, %v4751_v0  ;;  %v2465_v2 = vmul.f32 %v5014_v22, %v4978_v45 }
 0x444   :  { %v2595_v0 = vmul.f32 %v4807_v18, %v4954_v12 }
 0x445   :  { %v5045_v24 = vadd.f32 %v4677_v38, %v1795_v39  ;;  %v5053_v60 = vadd.f32 %v4677_v38, %v1797_v32  ;;  %v5073_v32 = vsel %vm201_vm5, %v4897_v19, %v4895_v48  ;;  %v2093_v39 = vmul.f32 %v4815_v3, %v4950_v33 }
 0x446   :  { %v5089_v51 = vmul.f32 %v5073_v32, %v4944_v36  ;;  %v2673_v48 = vmul.f32 %v4823_v14, %v4954_v12 }
 0x447   :  { %2492 = vrot.lane.b32.xlu1 %v2478_v61, %s3758_s19  ;;  %1912 = vrot.lane.b32.xlu0 %v1898_v25, %s3758_s19  ;;  %v2477_v61 = vpack.c.bf16 %v2468_v49, %v2465_v2  ;;  %v5050_v25 = vsel %vm370_vm2, %v4811_v17, %v4815_v3  ;;  %v5063_v49 = vsel %vm331_vm4, %v4859_v62, %v4861_v1 }
 0x448   :  { %v5068_v17 = vsel %vm331_vm4, %v4863_v57, %v4875_v37  ;;  %v5081_v1 = vsel %vm201_vm5, %v4899_v50, %v4905_v6  ;;  %v2023_v2 = vpack.c.bf16 %v2014_v41, %v2011_v55  ;;  %v2594_v37 = vmul.f32 %v5042_v27, %v4965_v30  ;;  %5993 = vst [vmem:[#allocation27_spill] sm:$0xff] %v5089_v51 }
 0x449   :  { %v5097_v47 = vmul.f32 %v5063_v49, %v5045_v24  ;;  %v2591_v41 = vmul.f32 %v5042_v27, %v4978_v45  ;;  %v5108_v55 = vmul.f32 %v4897_v19, %v4947_v54  ;;  %v2102_v8 = vpack.c.bf16 %v2093_v39, %v2090_v15 }
 0x44a   :  { %v5119_v56 = vmul.f32 %v5081_v1, %v4968_v4  ;;  %v5123_v43 = vmul.f32 %v5081_v1, %v4954_v12  ;;  %v5131_v15 = vmul.f32 %v4899_v50, %v4978_v45  ;;  %v5135_v39 = vmul.f32 %v4899_v50, %v4965_v30 }
 0x44b   :  { %2038 = vrot.lane.b32.xlu1 %v2024_v53, %s3755_s18  ;;  %2490 = vrot.lane.b32.xlu0 %v2477_v61, %s3758_s19  ;;  %v2604_v53 = vpack.c.bf16 %v2595_v0, %v2592_v40  ;;  %v5093_v61 = vmul.f32 %v5073_v32, %v4950_v33  ;;  %v5104_v0 = vmul.f32 %v4897_v19, %v4941_v34 }
 0x44c   :  { %5995 = vst [vmem:[#allocation29_spill] sm:$0xff] %v5108_v55  ;;  %v5112_v40 = vmul.f32 %v5068_v17, %v5053_v60  ;;  %5996 = vst [vmem:[#allocation30_spill] sm:$0xff] %v5131_v15  ;;  %v2670_v6 = vmul.f32 %v4823_v14, %v4968_v4  ;;  %v5149_v55 = vsel %vm411_vm3, %v4855_v52, %v4827_v16 }
 0x44d   :  { %5994 = vst [vmem:[#allocation28_spill] sm:$0xff] %v5104_v0  ;;  %5997 = vst [vmem:[#allocation31_spill] sm:$0xff] %v5135_v39  ;;  %v2186_v51 = vmul.f32 %v5149_v55, %v4950_v33  ;;  %v2183_v16 = vmul.f32 %v5149_v55, %v4944_v36 }
 0x44f   :  { %2618 = vrot.lane.b32.xlu1 %v2604_v53, %s3755_s18  ;;  %2036 = vrot.lane.b32.xlu0 %v2023_v2, %s3755_s18  ;;  %v2603_v2 = vpack.c.bf16 %v2594_v37, %v2591_v41  ;;  %v2092_v53 = vmul.f32 %v5050_v25, %v4947_v54  ;;  %v2089_v37 = vmul.f32 %v5050_v25, %v4941_v34 }
 0x450   :  { %v2682_v41 = vpack.c.bf16 %v2673_v48, %v2670_v6  ;;  %v2195_v48 = vpack.c.bf16 %v2186_v51, %v2183_v16  ;;  %v2185_v6 = vmul.f32 %v4855_v52, %v4947_v54  ;;  %v2263_v51 = vmul.f32 %v4859_v62, %v4947_v54 }
 0x451   :  { %v2101_v0 = vpack.c.bf16 %v2092_v53, %v2089_v37  ;;  %v2261_v54 = vmul.f32 %v5063_v49, %v4944_v36 }
 0x453   :  { %2116 = vrot.lane.b32.xlu1 %v2102_v8, %s3754_s12  ;;  %2616 = vrot.lane.b32.xlu0 %v2603_v2, %s3755_s18  ;;  %v5157_v8 = vsel %vm370_vm2, %v4819_v20, %v4823_v14  ;;  %v5172_v20 = vsel %vm411_vm3, %v4857_v29, %v4848_v5 }
 0x454   :  { %v2672_v15 = vmul.f32 %v5157_v8, %v4965_v30  ;;  %v2669_v2 = vmul.f32 %v5157_v8, %v4978_v45  ;;  %v2766_v37 = vmul.f32 %v5172_v20, %v4954_v12 }
 0x456   :  { %v2681_v53 = vpack.c.bf16 %v2672_v15, %v2669_v2  ;;  %v2765_v15 = vmul.f32 %v4857_v29, %v4965_v30  ;;  %v2260_v2 = vmul.f32 %v4859_v62, %v4941_v34 }
 0x457   :  { %2696 = vrot.lane.b32.xlu1 %v2682_v41, %s3754_s12  ;;  %2114 = vrot.lane.b32.xlu0 %v2101_v0, %s3754_s12  ;;  %v2182_v0 = vmul.f32 %v4855_v52, %v4941_v34  ;;  %v2763_v41 = vmul.f32 %v5172_v20, %v4968_v4  ;;  %v2844_v34 = vmul.f32 %v5068_v17, %v4954_v12 }
 0x458   :  { %v1794_v12 = vmul.f32 %v5002_v58, %v4739_v13 }
 0x459   :  { %v2194_v5 = vpack.c.bf16 %v2185_v6, %v2182_v0  ;;  %v2775_v16 = vpack.c.bf16 %v2766_v37, %v2763_v41  ;;  %v2264_v6 = vmul.f32 %v5063_v49, %v4950_v33  ;;  %v2841_v33 = vmul.f32 %v5068_v17, %v4968_v4 }
 0x45a   :  { %v2840_v4 = vmul.f32 %v4863_v57, %v4978_v45 }
 0x45b   :  { %2208 = vrot.lane.b32.xlu1 %v2195_v48, %s3753_s27  ;;  %2694 = vrot.lane.b32.xlu0 %v2681_v53, %s3754_s12  ;;  %v2762_v48 = vmul.f32 %v4857_v29, %v4978_v45  ;;  %v2272_v53 = vpack.c.bf16 %v2263_v51, %v2260_v2  ;;  %v2273_v37 = vpack.c.bf16 %v2264_v6, %v2261_v54 }
 0x45c   :  { %v2853_v36 = vpack.c.bf16 %v2844_v34, %v2841_v33 }
 0x45d   :  { %v2774_v39 = vpack.c.bf16 %v2765_v15, %v2762_v48 }
 0x45f   :  { %2206 = vrot.lane.b32.xlu1 %v2194_v5, %s3753_s27  ;;  %2788 = vrot.lane.b32.xlu0 %v2775_v16, %s3753_s27  ;;  %v2843_v16 = vmul.f32 %v4863_v57, %v4965_v30 }
 0x461   :  { %v2852_v13 = vpack.c.bf16 %v2843_v16, %v2840_v4 }
 0x463   :  { %2284 = vrot.lane.b32.xlu1 %v2272_v53, %s3752_s22  ;;  %2786 = vrot.lane.b32.xlu0 %v2774_v39, %s3753_s27  ;;  %v2472_v53 = vmul.f32 %v4770_v59, %v5053_v60 }
 0x467   :  { %v1784_v0 = vpop.permute.xlu0 %1783  ;;  %2286 = vrot.lane.b32.xlu0 %v2273_v37, %s3752_s22  ;;  %v5271_v37 = vmul.f32 %v5073_v32, %v5045_v24 }
 0x468   :  { %v1799_v41 = vmul.f32 %v1784_v0, %v4783_v35  ;;  %v1801_v5 = vmul.f32 %v1784_v0, %v4796_v11  ;;  %v1798_v51 = vmul.f32 %v1784_v0, %v4779_v10  ;;  %v1796_v35 = vmul.f32 %v5002_v58, %v4747_v63 }
 0x469   :  { %v1800_v30 = vmul.f32 %v1784_v0, %v4787_v31  ;;  %v5234_v63 = vadd.f32 %v4677_v38, %v1794_v12  ;;  %v5279_v0 = vmul.f32 %v5081_v1, %v5053_v60 }
 0x46a   :  { %v5209_v39 = vadd.f32 %v4683_v7, %v1799_v41  ;;  %v5218_v11 = vadd.f32 %v4683_v7, %v1801_v5  ;;  %v5229_v15 = vadd.f32 %v4683_v7, %v1798_v51  ;;  %v5237_v58 = vadd.f32 %v4677_v38, %v1796_v35 }
 0x46b   :  { %2866 = vrot.lane.b32.xlu0 %v2853_v36, %s3752_s22  ;;  %v5247_v2 = vadd.f32 %v4683_v7, %v1800_v30  ;;  %v1892_v38 = vmul.f32 %v4687_v46, %v5045_v24  ;;  %v1891_v6 = vmul.f32 %v4975_v42, %v5234_v63  ;;  %v5267_v54 = vmul.f32 %v4897_v19, %v5234_v63 }
 0x46c   :  { %v5223_v10 = vpack.c.bf16 %v5209_v39, %v5045_v24  ;;  %v5242_v45 = vpack.c.bf16 %v5218_v11, %v5053_v60  ;;  %v1895_v31 = vmul.f32 %v4687_v46, %v5209_v39  ;;  %v5253_v48 = vpack.c.bf16 %v5229_v15, %v5234_v63 }
 0x46d   :  { %v5263_v7 = vmul.f32 %v4863_v57, %v5237_v58  ;;  %v2475_v34 = vmul.f32 %v4770_v59, %v5218_v11  ;;  %v5283_v41 = vmul.f32 %v4899_v50, %v5237_v58  ;;  %v5287_v5 = vpack.c.bf16 %v5247_v2, %v5237_v58 }
 0x46e   :  { %1966 = vrot.lane.b32.xlu1 %v5223_v10, %s3756_s11  ;;  %v1901_v46 = vpack.c.bf16 %v1895_v31, %v1892_v38  ;;  %v5291_v33 = vmul.f32 %v5063_v49, %v5209_v39  ;;  %v5295_v51 = vmul.f32 %v5068_v17, %v5218_v11  ;;  %v5299_v59 = vmul.f32 %v4863_v57, %v5247_v2 }
 0x46f   :  { %2864 = vrot.lane.b32.xlu0 %v2852_v13, %s3752_s22  ;;  %v1894_v36 = vmul.f32 %v4975_v42, %v5229_v15  ;;  %v5306_v16 = vmul.f32 %v4897_v19, %v5229_v15  ;;  %v5310_v49 = vmul.f32 %v5073_v32, %v5209_v39  ;;  %v5314_v17 = vmul.f32 %v5081_v1, %v5218_v11 }
 0x470   :  { %v2276_v57 = vpack.c.bf16 %v5291_v33, %v5097_v47  ;;  %v2856_v12 = vpack.c.bf16 %v5295_v51, %v5112_v40  ;;  %v2855_v42 = vpack.c.bf16 %v5299_v59, %v5263_v7  ;;  %v5324_v19 = vmul.f32 %v4899_v50, %v5247_v2  ;;  %v3721_v47 = vld [vmem:[%s5952_s6 + $0x4] ss:$12 sps:$4 sm:$0xff]  }
 0x471   :  { %v2481_v32 = vpack.c.bf16 %v2475_v34, %v2472_v53  ;;  %v2401_v1 = vpack.c.bf16 %v5306_v16, %v5267_v54  ;;  %v2402_v35 = vpack.c.bf16 %v5310_v49, %v5271_v37  ;;  %v2982_v4 = vpack.c.bf16 %v5314_v17, %v5279_v0  ;;  %3182 = vmatprep.mubr.bf16.mxu0 %v3721_v47  ;;  %v6006_v51 = vld [vmem:[#allocation6_spill] sm:$0xff]  ;;  %v48_v54 = vld [vmem:[%s5953_s7] sm:$0xff]  ;;  %v49_v37 = vld [vmem:[%s5953_s7 + $0x8] sm:$0xff] }
 0x472   :  { %2546 = vrot.lane.b32.xlu1 %v5242_v45, %s3756_s11  ;;  %v2981_v30 = vpack.c.bf16 %v5324_v19, %v5283_v41  ;;  %v1900_v50 = vpack.c.bf16 %v1894_v36, %v1891_v6  ;;  %v2474_v13 = vmul.f32 %v5014_v22, %v5247_v2  ;;  %v2471_v31 = vmul.f32 %v5014_v22, %v5237_v58  ;;  %v51_v0 = vld [vmem:[%s5953_s7 + $0x18] sm:$0xff] }
 0x473   :  { %1964 = vrot.lane.b32.xlu0 %v5253_v48, %s3756_s11  ;;  %v2021_v53 = vmul.f32 %v4775_v44, %v5209_v39  ;;  %v2018_v6 = vmul.f32 %v4775_v44, %v5045_v24  ;;  %v2017_v34 = vmul.f32 %v5030_v28, %v5234_v63  ;;  %v2601_v36 = vmul.f32 %v4807_v18, %v5218_v11 }
 0x474   :  { %v2480_v38 = vpack.c.bf16 %v2474_v13, %v2471_v31  ;;  %v2600_v44 = vmul.f32 %v5042_v27, %v5247_v2  ;;  %v2597_v31 = vmul.f32 %v5042_v27, %v5237_v58  ;;  %v2679_v27 = vmul.f32 %v4823_v14, %v5218_v11  ;;  %3288 = vmatprep.mubr.bf16.mxu1 %v3721_v47 }
 0x475   :  { %v2027_v22 = vpack.c.bf16 %v2021_v53, %v2018_v6  ;;  %v2096_v53 = vmul.f32 %v4815_v3, %v5045_v24  ;;  %v6007_v16 = vpack.c.bf16 %v5123_v43, %v5119_v56 }
 0x476   :  { %1918 = vrot.lane.b32.xlu1 %v1901_v46, %s3758_s19  ;;  %v2020_v46 = vmul.f32 %v5030_v28, %v5229_v15  ;;  %v2099_v28 = vmul.f32 %v4815_v3, %v5209_v39  ;;  %v2678_v3 = vmul.f32 %v5157_v8, %v5247_v2 }
 0x477   :  { %2544 = vrot.lane.b32.xlu0 %v5287_v5, %s3756_s11 }
 0x478   :  { %v2105_v6 = vpack.c.bf16 %v2099_v28, %v2096_v53  ;;  %v2772_v53 = vmul.f32 %v5172_v20, %v5218_v11 }
 0x47a   :  { %2498 = vrot.lane.b32.xlu1 %v2481_v32, %s3758_s19  ;;  %v2026_v32 = vpack.c.bf16 %v2020_v46, %v2017_v34  ;;  %v2095_v46 = vmul.f32 %v5050_v25, %v5234_v63  ;;  %v2676_v34 = vmul.f32 %v4823_v14, %v5053_v60  ;;  %v2191_v14 = vmul.f32 %v4855_v52, %v5229_v15 }
 0x47b   :  { %1916 = vrot.lane.b32.xlu0 %v1900_v50, %s3758_s19  ;;  %v2598_v50 = vmul.f32 %v4807_v18, %v5053_v60  ;;  %v2098_v18 = vmul.f32 %v5050_v25, %v5229_v15 }
 0x47d   :  { %v2607_v13 = vpack.c.bf16 %v2601_v36, %v2598_v50  ;;  %v2685_v36 = vpack.c.bf16 %v2679_v27, %v2676_v34  ;;  %v5395_v50 = vpop.permute.xlu1 %2288  ;;  %v6000_v27 = vld [vmem:[#allocation12_spill] sm:$0xff] }
 0x47e   :  { %2336 = vrot.lane.b32.xlu1 %v5969_v9, %s3759_s13  ;;  %v6002_v34 = vld [vmem:[#allocation28_spill] sm:$0xff] }
 0x47f   :  { %2496 = vrot.lane.b32.xlu0 %v2480_v38, %s3758_s19  ;;  %v2606_v38 = vpack.c.bf16 %v2600_v44, %v2597_v31  ;;  %v2192_v44 = vmul.f32 %v5149_v55, %v5209_v39  ;;  %v2189_v31 = vmul.f32 %v5149_v55, %v5045_v24  ;;  %v2266_v39 = vmul.f32 %v4859_v62, %v5234_v63 }
 0x480   :  { %v2769_v55 = vmul.f32 %v5172_v20, %v5053_v60 }
 0x481   :  { %v2198_v28 = vpack.c.bf16 %v2192_v44, %v2189_v31 }
 0x482   :  { %2332 = vrot.lane.b32.xlu1 %v4962_v26, %s3759_s13 }
 0x483   :  { %2914 = vrot.lane.b32.xlu0 %v4984_v21, %s3759_s13 }
 0x486   :  { %2044 = vrot.lane.b32.xlu1 %v2027_v22, %s3755_s18  ;;  %v2104_v22 = vpack.c.bf16 %v2098_v18, %v2095_v46 }
 0x487   :  { %2042 = vrot.lane.b32.xlu0 %v2026_v32, %s3755_s18  ;;  %v2675_v32 = vmul.f32 %v5157_v8, %v5237_v58  ;;  %v2188_v8 = vmul.f32 %v4855_v52, %v5234_v63  ;;  %v2269_v52 = vmul.f32 %v4859_v62, %v5229_v15  ;;  %v2778_v15 = vpack.c.bf16 %v2772_v53, %v2769_v55  ;;  %v6008_v53 = vld [vmem:[#allocation31_spill] sm:$0xff] }
 0x488   :  { %v2768_v62 = vmul.f32 %v4857_v29, %v5237_v58  ;;  %v6001_v58 = vld [vmem:[#allocation29_spill] sm:$0xff] }
 0x489   :  { %v2684_v25 = vpack.c.bf16 %v2678_v3, %v2675_v32  ;;  %v2275_v24 = vpack.c.bf16 %v2269_v52, %v2266_v39  ;;  %v6003_v3 = vpack.c.bf16 %v6001_v58, %v6002_v34  ;;  %v6004_v32 = vld [vmem:[#allocation9_spill] sm:$0xff]  ;;  %v50_v39 = vld [vmem:[%s5953_s7 + $0x10] sm:$0xff] }
 0x48a   :  { %2624 = vrot.lane.b32.xlu1 %v2607_v13, %s3755_s18  ;;  %v2197_v13 = vpack.c.bf16 %v2191_v14, %v2188_v8 }
 0x48b   :  { %2622 = vrot.lane.b32.xlu0 %v2606_v38, %s3755_s18  ;;  %v5408_v38 = vpop.permute.xlu1 %2868 }
 0x48e   :  { %2122 = vrot.lane.b32.xlu1 %v2105_v6, %s3754_s12  ;;  %v2771_v6 = vmul.f32 %v4857_v29, %v5247_v2  ;;  %v5998_v2 = vld [vmem:[#allocation27_spill] sm:$0xff] }
 0x48f   :  { %2120 = vrot.lane.b32.xlu0 %v2104_v22, %s3754_s12  ;;  %v5423_v18 = vpop.permute.xlu1 %2294  ;;  %v5999_v46 = vpack.c.bf16 %v5093_v61, %v5998_v2  ;;  %v2968_v22 = vmul.f32 0.0, %v6000_v27  ;;  %v2388_v61 = vmul.f32 0.0, %v6004_v32 }
 0x490   :  { %v2777_v63 = vpack.c.bf16 %v2771_v6, %v2768_v62 }
 0x492   :  { %2702 = vrot.lane.b32.xlu1 %v2685_v36, %s3754_s12  ;;  %v2980_v36 = vpack.c.bf16 %v2968_v22, %v2968_v22 }
 0x493   :  { %2700 = vrot.lane.b32.xlu0 %v2684_v25, %s3754_s12  ;;  %v5431_v11 = vpop.permute.xlu1 %2874  ;;  %v2400_v25 = vpack.c.bf16 %v2388_v61, %v2388_v61 }
 0x496   :  { %2916 = vrot.lane.b32.xlu1 %v5969_v9, %s3759_s13 }
 0x497   :  { %2340 = vrot.lane.b32.xlu0 %v5223_v10, %s3759_s13 }
 0x49a   :  { %2342 = vrot.lane.b32.xlu1 %v5969_v9, %s3759_s13 }
 0x49b   :  { %2912 = vrot.lane.b32.xlu0 %v4990_v23, %s3759_s13 }
 0x49e   :  { %2212 = vrot.lane.b32.xlu1 %v2197_v13, %s3753_s27  ;;  %v6005_v13 = vld [vmem:[#allocation4_spill] sm:$0xff] }
 0x49f   :  { %2214 = vrot.lane.b32.xlu0 %v2198_v28, %s3753_s27 }
 0x4a2   :  { %2338 = vrot.lane.b32.xlu1 %v5253_v48, %s3759_s13 }
 0x4a3   :  { %2920 = vrot.lane.b32.xlu0 %v5242_v45, %s3759_s13 }
 0x4a6   :  { %2290 = vrot.lane.b32.xlu1 %v2275_v24, %s3752_s22  ;;  %v6009_v24 = vld [vmem:[#allocation30_spill] sm:$0xff] }
 0x4a7   :  { %2794 = vrot.lane.b32.xlu0 %v2778_v15, %s3753_s27  ;;  %v6010_v55 = vpack.c.bf16 %v6008_v53, %v6009_v24 }
 0x4aa   :  { %2922 = vrot.lane.b32.xlu1 %v5969_v9, %s3759_s13 }
 0x4ab   :  { %2792 = vrot.lane.b32.xlu0 %v2777_v63, %s3753_s27 }
 0x4ad   :  { %v5436_v60 = vpop.permute.xlu1 %1960  ;;  %v5438_v20 = vpop.permute.xlu0 %1958 }
 0x4ae   :  { %2412 = vrot.lane.b32.xlu1 %v5999_v46, %s3751_s17 }
 0x4af   :  { %2292 = vrot.lane.b32.xlu0 %v2276_v57, %s3752_s22 }
 0x4b1   :  { %v5449_v9 = vpop.permute.xlu1 %2540  ;;  %v5451_v29 = vpop.permute.xlu0 %2538 }
 0x4b2   :  { %2410 = vrot.lane.b32.xlu1 %v6003_v3, %s3751_s17 }
 0x4b3   :  { %2918 = vrot.lane.b32.xlu0 %v5287_v5, %s3759_s13 }
 0x4b5   :  { %v1911_v33 = vpop.permute.xlu1 %1910  ;;  %v5463_v57 = vpop.permute.xlu0 %2334 }
 0x4b6   :  { %2994 = vrot.lane.b32.xlu1 %v2980_v36, %s3751_s17  ;;  %v1920_v31 = vsel %vm201_vm5, %v6005_v13, %v1911_v33  ;;  %v6013_v13 = vld [vmem:[#allocation7_spill] sm:$0xff] }
 0x4b7   :  { %2872 = vrot.lane.b32.xlu0 %v2856_v12, %s3752_s22 }
 0x4b9   :  { %v2493_v14 = vpop.permute.xlu1 %2492  ;;  %v1913_v8 = vpop.permute.xlu0 %1912 }
 0x4ba   :  { %2420 = vrot.lane.b32.xlu1 %v2400_v25, %s3751_s17  ;;  %v1921_v44 = vsel %vm201_vm5, %v1911_v33, %v1913_v8  ;;  %v1969_v33 = vsel %vm250_vm6, %v5438_v20, %v5436_v60  ;;  %v2549_v60 = vsel %vm250_vm6, %v5451_v29, %v5449_v9 }
 0x4bb   :  { %2870 = vrot.lane.b32.xlu0 %v2855_v42, %s3752_s22  ;;  %3150 = vmatprep.subr.bf16.mxu0 %v1921_v44 }
 0x4bc   :  { %3151 = vmatpush1.bf16.msra.mxu0 %v1920_v31  ;;  %v1968_v31 = vsel %vm250_vm6, %v6013_v13, %v5438_v20  ;;  %v6015_v20 = vld [vmem:[#allocation11_spill] sm:$0xff] }
 0x4bd   :  { %v5478_v28 = vpop.permute.xlu1 %2038  ;;  %v2491_v40 = vpop.permute.xlu0 %2490 }
 0x4be   :  { %2416 = vrot.lane.b32.xlu1 %v2401_v1, %s3751_s17  ;;  %v2500_v12 = vsel %vm201_vm5, %v6006_v51, %v2491_v40  ;;  %v2501_v52 = vsel %vm201_vm5, %v2491_v40, %v2493_v14  ;;  %v6012_v14 = vld [vmem:[#allocation8_spill] sm:$0xff] }
 0x4bf   :  { %2414 = vrot.lane.b32.xlu0 %v2400_v25, %s3751_s17  ;;  %3256 = vmatprep.subr.bf16.mxu1 %v2501_v52  ;;  %v6014_v52 = vld [vmem:[#allocation10_spill] sm:$0xff] }
 0x4c0   :  { %3257 = vmatpush1.bf16.msra.mxu1 %v2500_v12 }
 0x4c1   :  { %v5488_v7 = vpop.permute.xlu1 %2618  ;;  %v5490_v59 = vpop.permute.xlu0 %2036 }
 0x4c2   :  { %3000 = vrot.lane.b32.xlu1 %v2980_v36, %s3751_s17  ;;  %v6011_v36 = vld [vmem:[#allocation5_spill] sm:$0xff]  ;;  %v2047_v53 = vsel %vm331_vm4, %v5490_v59, %v5478_v28 }
 0x4c3   :  { %2992 = vrot.lane.b32.xlu0 %v6007_v16, %s3751_s17 }
 0x4c5   :  { %v5500_v42 = vpop.permute.xlu1 %2116  ;;  %v5502_v1 = vpop.permute.xlu0 %2616 }
 0x4c6   :  { %3096 = vperm.xlu1 %3710, %v48_v54   ;;  %v2548_v54 = vsel %vm250_vm6, %v6014_v52, %v5451_v29  ;;  %v6017_v29 = vld [vmem:[#allocation14_spill] sm:$0xff]  ;;  %v2627_v28 = vsel %vm331_vm4, %v5502_v1, %v5488_v7 }
 0x4c7   :  { %2990 = vrot.lane.b32.xlu0 %v6010_v55, %s3751_s17  ;;  %v6016_v55 = vld [vmem:[#allocation13_spill] sm:$0xff]  ;;  %v6025_v52 = vld [vmem:[#allocation22_spill] sm:$0xff] }
 0x4c9   :  { %v5511_v15 = vpop.permute.xlu1 %2696  ;;  %v5513_v6 = vpop.permute.xlu0 %2114 }
 0x4ca   :  { %3106 = vperm.xlu1 %3710, %v50_v39  }
 0x4cb   :  { %2418 = vrot.lane.b32.xlu0 %v2402_v35, %s3751_s17 }
 0x4cd   :  { %v5519_v43 = vpop.permute.xlu0 %2694  ;;  %v5521_v56 = vpop.permute.xlu1 %2208 }
 0x4cf   :  { %2998 = vrot.lane.b32.xlu0 %v2982_v4, %s3751_s17 }
 0x4d1   :  { %v5527_v62 = vpop.permute.xlu0 %2788  ;;  %v5536_v49 = vpop.permute.xlu1 %2206 }
 0x4d3   :  { %2996 = vrot.lane.b32.xlu0 %v2981_v30, %s3751_s17 }
 0x4d5   :  { %v2787_v35 = vpop.permute.xlu0 %2786  ;;  %v5547_v41 = vpop.permute.xlu1 %2284 }
 0x4d6   :  { %v5540_v63 = vsel %vm370_vm2, %v2787_v35, %v5527_v62 }
 0x4d7   :  { %3101 = vperm.xlu0 %3709, %v49_v37   ;;  %v2046_v37 = vsel %vm331_vm4, %v6016_v55, %v5490_v59  ;;  %v6019_v59 = vld [vmem:[#allocation15_spill] sm:$0xff] }
 0x4d9   :  { %v5545_v17 = vpop.permute.xlu0 %2286 }
 0x4db   :  { %3111 = vperm.xlu0 %3709, %v51_v0  }
 0x4dd   :  { %v5549_v19 = vpop.permute.xlu0 %2866 }
 0x4e0   :  { %v1967_v4 = vpop.permute.xlu1 %1966 }
 0x4e1   :  { %v2865_v30 = vpop.permute.xlu0 %2864 }
 0x4e2   :  { %v5553_v2 = vsel %vm290_vm1, %v2865_v30, %v5549_v19 }
 0x4e4   :  { %v2547_v46 = vpop.permute.xlu1 %2546 }
 0x4e5   :  { %v1965_v27 = vpop.permute.xlu0 %1964 }
 0x4e6   :  { %v1971_v51 = vsel %vm250_vm6, %v1965_v27, %v1967_v4  ;;  %v1970_v16 = vsel %vm250_vm6, %v6015_v20, %v1965_v27 }
 0x4e8   :  { %v1919_v22 = vpop.permute.xlu1 %1918 }
 0x4e9   :  { %v2545_v58 = vpop.permute.xlu0 %2544 }
 0x4ea   :  { %v2551_v9 = vsel %vm250_vm6, %v2545_v58, %v2547_v46  ;;  %v2550_v35 = vsel %vm250_vm6, %v6017_v29, %v2545_v58  ;;  %v6018_v46 = vld [vmem:[#allocation16_spill] sm:$0xff] }
 0x4eb   :  { %v2626_v27 = vsel %vm331_vm4, %v6018_v46, %v5502_v1  ;;  %v6021_v1 = vld [vmem:[#allocation18_spill] sm:$0xff] }
 0x4ec   :  { %v2499_v34 = vpop.permute.xlu1 %2498 }
 0x4ed   :  { %v1917_v3 = vpop.permute.xlu0 %1916 }
 0x4ee   :  { %v1922_v32 = vsel %vm201_vm5, %v6011_v36, %v1917_v3  ;;  %v1923_v61 = vsel %vm201_vm5, %v1917_v3, %v1919_v22  ;;  %v6020_v36 = vld [vmem:[#allocation17_spill] sm:$0xff] }
 0x4ef   :  { %3152 = vmatprep.subr.bf16.mxu0 %v1923_v61 }
 0x4f0   :  { %v5558_v47 = vpop.permute.xlu1 %2336  ;;  %3153 = vmatpush1.bf16.msra.mxu0 %v1922_v32  ;;  %v2124_v32 = vsel %vm411_vm3, %v6020_v36, %v5513_v6 }
 0x4f1   :  { %3154 = vmatprep.subr.bf16.mxu0 %v1969_v33  ;;  %v2497_v25 = vpop.permute.xlu0 %2496 }
 0x4f2   :  { %v2502_v8 = vsel %vm201_vm5, %v6012_v14, %v2497_v25  ;;  %v2503_v44 = vsel %vm201_vm5, %v2497_v25, %v2499_v34  ;;  %v2125_v34 = vsel %vm411_vm3, %v5513_v6, %v5500_v42  ;;  %v2705_v42 = vsel %vm411_vm3, %v5519_v43, %v5511_v15  ;;  %v6023_v6 = vld [vmem:[#allocation19_spill] sm:$0xff] }
 0x4f3   :  { %3258 = vmatprep.subr.bf16.mxu1 %v2503_v44 }
 0x4f4   :  { %v5569_v40 = vpop.permute.xlu1 %2332  ;;  %3155 = vmatpush1.bf16.msra.mxu0 %v1968_v31  ;;  %3259 = vmatpush1.bf16.msra.mxu1 %v2502_v8  ;;  %v6022_v8 = vld [vmem:[#allocation20_spill] sm:$0xff] }
 0x4f5   :  { %3156 = vmatprep.subr.bf16.mxu0 %v1971_v51  ;;  %3260 = vmatprep.subr.bf16.mxu1 %v2549_v60  ;;  %v5575_v12 = vpop.permute.xlu0 %2914  ;;  %v2704_v44 = vsel %vm411_vm3, %v6022_v8, %v5519_v43  ;;  %v6024_v60 = vld [vmem:[#allocation26_spill] sm:$0xff] }
 0x4f8   :  { %v2045_v39 = vpop.permute.xlu1 %2044  ;;  %3157 = vmatpush1.bf16.msra.mxu0 %v1970_v16  ;;  %3261 = vmatpush1.bf16.msra.mxu1 %v2548_v54 }
 0x4f9   :  { %3158 = vmatprep.subr.bf16.mxu0 %v2047_v53  ;;  %3262 = vmatprep.subr.bf16.mxu1 %v2551_v9  ;;  %v2043_v24 = vpop.permute.xlu0 %2042  ;;  %v6027_v9 = vld [vmem:[#allocation23_spill] sm:$0xff] }
 0x4fa   :  { %v2049_v4 = vsel %vm331_vm4, %v2043_v24, %v2045_v39  ;;  %v2048_v22 = vsel %vm331_vm4, %v6019_v59, %v2043_v24  ;;  %v6026_v39 = vld [vmem:[#allocation24_spill] sm:$0xff] }
 0x4fb   :  { %v2219_v53 = vsel %vm370_vm2, %v5521_v56, %v6026_v39 }
 0x4fc   :  { %v2625_v0 = vpop.permute.xlu1 %2624  ;;  %3159 = vmatpush1.bf16.msra.mxu0 %v2046_v37  ;;  %3263 = vmatpush1.bf16.msra.mxu1 %v2550_v35 }
 0x4fd   :  { %3160 = vmatprep.subr.bf16.mxu0 %v2049_v4  ;;  %3264 = vmatprep.subr.bf16.mxu1 %v2627_v28  ;;  %v2623_v30 = vpop.permute.xlu0 %2622 }
 0x4fe   :  { %v2629_v3 = vsel %vm331_vm4, %v2623_v30, %v2625_v0  ;;  %v2628_v61 = vsel %vm331_vm4, %v6021_v1, %v2623_v30  ;;  %v3724_v1 = vld [vmem:[%s5952_s6 + $0x18] ss:$12 sps:$4 sm:$0xff]  }
 0x500   :  { %v2123_v58 = vpop.permute.xlu1 %2122  ;;  %3161 = vmatpush1.bf16.msra.mxu0 %v2048_v22  ;;  %3265 = vmatpush1.bf16.msra.mxu1 %v2626_v27 }
 0x501   :  { %3162 = vmatprep.subr.bf16.mxu0 %v2125_v34  ;;  %3266 = vmatprep.subr.bf16.mxu1 %v2629_v3  ;;  %v2121_v7 = vpop.permute.xlu0 %2120 }
 0x502   :  { %v2127_v25 = vsel %vm411_vm3, %v2121_v7, %v2123_v58  ;;  %v2126_v13 = vsel %vm411_vm3, %v6023_v6, %v2121_v7 }
 0x504   :  { %v2703_v33 = vpop.permute.xlu1 %2702  ;;  %3163 = vmatpush1.bf16.msra.mxu0 %v2124_v32  ;;  %3267 = vmatpush1.bf16.msra.mxu1 %v2628_v61 }
 0x505   :  { %3164 = vmatprep.subr.bf16.mxu0 %v2127_v25  ;;  %3268 = vmatprep.subr.bf16.mxu1 %v2705_v42  ;;  %v2701_v14 = vpop.permute.xlu0 %2700  ;;  %v6030_v42 = vmov 0  }
 0x506   :  { %v2707_v51 = vsel %vm411_vm3, %v2701_v14, %v2703_v33  ;;  %v2706_v54 = vsel %vm411_vm3, %v6025_v52, %v2701_v14 }
 0x508   :  { %v5618_v31 = vpop.permute.xlu1 %2916  ;;  %3165 = vmatpush1.bf16.msra.mxu0 %v2126_v13  ;;  %3269 = vmatpush1.bf16.msra.mxu1 %v2704_v44 }
 0x509   :  { %3166 = vmatprep.subr.bf16.mxu0 %v6024_v60  ;;  %3270 = vmatprep.subr.bf16.mxu1 %v2707_v51  ;;  %v2341_v15 = vpop.permute.xlu0 %2340  ;;  %v3725_v51 = vld [vmem:[%s5952_s6 + $0x8] ss:$12 sps:$4 sm:$0xff]  }
 0x50c   :  { %v2343_v20 = vpop.permute.xlu1 %2342  ;;  %3167 = vmatpush1.bf16.msra.mxu0 %v4962_v26  ;;  %3271 = vmatpush1.bf16.msra.mxu1 %v2706_v54 }
 0x50d   :  { %3168 = vmatprep.subr.bf16.mxu0 %v5223_v10  ;;  %3272 = vmatprep.subr.bf16.mxu1 %v4984_v21  ;;  %v5627_v43 = vpop.permute.xlu0 %2912  ;;  %v2218_v10 = vsel %vm370_vm2, %v5536_v49, %v5521_v56  ;;  %v6029_v49 = vld [vmem:[#allocation25_spill] sm:$0xff] }
 0x50e   :  { %v2924_v3 = vsel %vm636_vm7, %v5627_v43, %v5575_v12  ;;  %v3726_v43 = vld [vmem:[%s5952_s6 + $0x20] ss:$12 sps:$4 sm:$0xff]  }
 0x510   :  { %v2213_v16 = vpop.permute.xlu1 %2212  ;;  %3169 = vmatpush1.bf16.msra.mxu0 %v5253_v48  ;;  %3273 = vmatpush1.bf16.msra.mxu1 %v4990_v23  ;;  %v6028_v23 = vld [vmem:[#allocation21_spill] sm:$0xff] }
 0x511   :  { %3170 = vmatprep.subr.bf16.mxu0 %v2219_v53  ;;  %3274 = vmatprep.subr.bf16.mxu1 %v5242_v45  ;;  %v2215_v26 = vpop.permute.xlu0 %2214  ;;  %v2799_v24 = vsel %vm370_vm2, %v5527_v62, %v6028_v23  ;;  %v2296_v62 = vsel %vm290_vm1, %v5547_v41, %v5545_v17 }
 0x512   :  { %v2221_v48 = vsel %vm370_vm2, %v2215_v26, %v6027_v9  ;;  %v2220_v45 = vsel %vm370_vm2, %v2213_v16, %v2215_v26 }
 0x514   :  { %v2339_v21 = vpop.permute.xlu1 %2338  ;;  %3171 = vmatpush1.bf16.msra.mxu0 %v2218_v10  ;;  %3275 = vmatpush1.bf16.msra.mxu1 %v5287_v5  ;;  %v2297_v5 = vsel %vm290_vm1, %v5545_v17, %v5395_v50  ;;  %v2877_v50 = vsel %vm290_vm1, %v5549_v19, %v5408_v38  ;;  %v2345_v17 = vsel %vm636_vm7, %v5463_v57, %v5558_v47  ;;  %v3719_v47 = vld [vmem:[%s5952_s6] ss:$12 sps:$4 sm:$0xff]  }
 0x515   :  { %3172 = vmatprep.subr.bf16.mxu0 %v2221_v48  ;;  %3276 = vmatprep.subr.bf16.mxu1 %v2799_v24  ;;  %v2921_v55 = vpop.permute.xlu0 %2920  ;;  %v2344_v38 = vsel %vm636_vm7, %v5569_v40, %v5463_v57  ;;  %v2347_v19 = vsel %vm636_vm7, %v2341_v15, %v2343_v20  ;;  %v2346_v59 = vsel %vm636_vm7, %v2339_v21, %v2341_v15  ;;  %v3722_v57 = vld [vmem:[%s5952_s6 + $0x1c] ss:$12 sps:$4 sm:$0xff]  }
 0x518   :  { %v2291_v37 = vpop.permute.xlu1 %2290  ;;  %3173 = vmatpush1.bf16.msra.mxu0 %v2220_v45  ;;  %3277 = vmatpush1.bf16.msra.mxu1 %v5540_v63 }
 0x519   :  { %3174 = vmatprep.subr.bf16.mxu0 %v2297_v5  ;;  %v2795_v56 = vpop.permute.xlu0 %2794 }
 0x51a   :  { %v2801_v29 = vsel %vm370_vm2, %v2795_v56, %v6029_v49 }
 0x51b   :  { %3278 = vmatprep.subr.bf16.mxu1 %v2801_v29  ;;  %v3744_v29 = vld [vmem:[%s5947_s0 + $0x8] sm:$0xff] }
 0x51c   :  { %3175 = vmatpush1.bf16.msra.mxu0 %v2296_v62  ;;  %v2923_v35 = vpop.permute.xlu1 %2922 }
 0x51d   :  { %v2793_v0 = vpop.permute.xlu0 %2792  ;;  %v2927_v32 = vsel %vm636_vm7, %v2921_v55, %v2923_v35 }
 0x51e   :  { %v2800_v4 = vsel %vm370_vm2, %v2793_v0, %v2795_v56 }
 0x51f   :  { %3279 = vmatpush1.bf16.msra.mxu1 %v2800_v4 }
 0x520   :  { %3280 = vmatprep.subr.bf16.mxu1 %v2877_v50  ;;  %v2413_v46 = vpop.permute.xlu1 %2412 }
 0x521   :  { %v2293_v63 = vpop.permute.xlu0 %2292 }
 0x522   :  { %v2298_v28 = vsel %vm290_vm1, %v2291_v37, %v2293_v63  ;;  %v2299_v30 = vsel %vm290_vm1, %v2293_v63, %v5423_v18  ;;  %v3743_v37 = vld [vmem:[%s5947_s0] sm:$0xff] }
 0x523   :  { %3176 = vmatprep.subr.bf16.mxu0 %v2299_v30  ;;  %3281 = vmatpush1.bf16.msra.mxu1 %v5553_v2 }
 0x524   :  { %3177 = vmatpush1.bf16.msra.mxu0 %v2298_v28  ;;  %v2411_v27 = vpop.permute.xlu1 %2410 }
 0x525   :  { %3178 = vmatprep.subr.bf16.mxu0 %v2345_v17  ;;  %v2919_v41 = vpop.permute.xlu0 %2918  ;;  %v2422_v36 = vsel %vm160_vm0, %v2411_v27, %v2413_v46 }
 0x526   :  { %v2926_v25 = vsel %vm636_vm7, %v2919_v41, %v2921_v55  ;;  %v3579_v41 = vld [vmem:[%s5947_s0 + $0x40] sm:$0xff] }
 0x528   :  { %3179 = vmatpush1.bf16.msra.mxu0 %v2344_v38  ;;  %v2995_v58 = vpop.permute.xlu1 %2994 }
 0x529   :  { %3180 = vmatprep.subr.bf16.mxu0 %v2347_v19  ;;  %v2873_v18 = vpop.permute.xlu0 %2872 }
 0x52a   :  { %v2879_v2 = vsel %vm290_vm1, %v2873_v18, %v5431_v11  ;;  %v2925_v11 = vsel %vm636_vm7, %v5575_v12, %v5618_v31 }
 0x52b   :  { %3282 = vmatprep.subr.bf16.mxu1 %v2879_v2  ;;  %v3746_v2 = vld [vmem:[%s5947_s0 + $0x18] sm:$0xff] }
 0x52c   :  { %3181 = vmatpush1.bf16.msra.mxu0 %v2346_v59  ;;  %v2421_v61 = vpop.permute.xlu1 %2420 }
 0x52d   :  { %v2871_v40 = vpop.permute.xlu0 %2870 }
 0x52e   :  { %v2878_v22 = vsel %vm290_vm1, %v2871_v40, %v2873_v18 }
 0x52f   :  { %3283 = vmatpush1.bf16.msra.mxu1 %v2878_v22  ;;  %3183 = vmatmul.mubr.bf16.vlgmr.msra.gmra.mrb[8].mxu0 %v3719_v47 }
 0x530   :  { %3284 = vmatprep.subr.bf16.mxu1 %v2925_v11  ;;  %3192 = vmatprep.mubr.bf16.mxu0 %v3722_v57  ;;  %v2417_v44 = vpop.permute.xlu1 %2416 }
 0x531   :  { %v2415_v34 = vpop.permute.xlu0 %2414 }
 0x532   :  { %v2423_v7 = vsel %vm160_vm0, %v2413_v46, %v2415_v34  ;;  %v3745_v46 = vld [vmem:[%s5947_s0 + $0x10] sm:$0xff] }
 0x533   :  { %3203 = vmatprep.subr.bf16.mxu0 %v2423_v7  ;;  %3285 = vmatpush1.bf16.msra.mxu1 %v2924_v3  ;;  %v3581_v7 = vld [vmem:[%s5947_s0 + $0x50] sm:$0xff] }
 0x534   :  { %3204 = vmatpush1.bf16.msra.mxu0 %v2422_v36  ;;  %3286 = vmatprep.subr.bf16.mxu1 %v2927_v32  ;;  %v3001_v60 = vpop.permute.xlu1 %3000 }
 0x535   :  { %v2993_v33 = vpop.permute.xlu0 %2992 }
 0x536   :  { %v3003_v12 = vsel %vm160_vm0, %v2993_v33, %v2995_v58 }
 0x537   :  { %3287 = vmatpush1.bf16.msra.mxu1 %v2926_v25  ;;  %3193 = vmatmul.mubr.bf16.gmra.mrb[12].mxu0 %v3724_v1 }
 0x538   :  { %3309 = vmatprep.subr.bf16.mxu1 %v3003_v12  ;;  %3235 = vmatprep.mubr.bf16.mxu0 %v6030_v42  ;;  %v3582_v12 = vld [vmem:[%s5947_s0 + $0x58] sm:$0xff] }
 0x539   :  { %v2991_v14 = vpop.permute.xlu0 %2990 }
 0x53a   :  { %v3002_v8 = vsel %vm160_vm0, %v2991_v14, %v2993_v33  ;;  %3289 = vmatmul.mubr.bf16.vlgmr.msra.gmra.mrb[8].mxu1 %v3719_v47 }
 0x53b   :  { %3310 = vmatpush1.bf16.msra.mxu1 %v3002_v8  ;;  %3298 = vmatprep.mubr.bf16.mxu1 %v3722_v57  ;;  %v3580_v57 = vld [vmem:[%s5947_s0 + $0x48] sm:$0xff] }
 0x53d   :  { %v2419_v6 = vpop.permute.xlu0 %2418 }
 0x53e   :  { %v2424_v13 = vsel %vm160_vm0, %v2417_v44, %v2419_v6  ;;  %v2425_v31 = vsel %vm160_vm0, %v2419_v6, %v2421_v61 }
 0x53f   :  { %3205 = vmatprep.subr.bf16.mxu0 %v2425_v31 }
 0x540   :  { %3206 = vmatpush1.bf16.msra.mxu0 %v2424_v13 }
 0x541   :  { %v2999_v15 = vpop.permute.xlu0 %2998 }
 0x542   :  { %3299 = vmatmul.mubr.bf16.gmra.mrb[12].mxu1 %v3724_v1  ;;  %v3005_v52 = vsel %vm160_vm0, %v2999_v15, %v3001_v60 }
 0x543   :  { %3623 = vmatmul.mubr.msk.bf16.vlgmr.msra.gmra.mrb[8].mxu0 %vm1439_vm8, %v3725_v51  ;;  %3311 = vmatprep.subr.bf16.mxu1 %v3005_v52  ;;  %v3747_v52 = vld [vmem:[%s5947_s0 + $0x20] sm:$0xff] }
 0x544   :  { %3341 = vmatprep.mubr.bf16.mxu1 %v6030_v42  ;;  %3245 = vmatprep.mubr.bf16.mxu0 %v6030_v42 }
 0x545   :  { %v2997_v54 = vpop.permute.xlu0 %2996  ;;  %v3097_v16 = vpop.permute.xlu1 %3096 }
 0x546   :  { %v3004_v20 = vsel %vm160_vm0, %v2997_v54, %v2999_v15 }
 0x547   :  { %3312 = vmatpush1.bf16.msra.mxu1 %v3004_v20  ;;  %v3748_v20 = vld [vmem:[%s5947_s0 + $0x28] sm:$0xff] }
 0x549   :  { %v3107_v49 = vpop.permute.xlu1 %3106 }
 0x54a   :  { %3625 = vmatmul.mubr.msk.bf16.vlgmr.msra.gmra.mrb[8].mxu1 %vm1439_vm8, %v3725_v51 }
 0x54b   :  { %3624 = vmatmul.mubr.msk.bf16.gmra.mrb[12].mxu0 %vm1439_vm8, %v3726_v43  ;;  %3351 = vmatprep.mubr.bf16.mxu1 %v6030_v42 }
 0x552   :  { %3626 = vmatmul.mubr.msk.bf16.gmra.mrb[12].mxu1 %vm1439_vm8, %v3726_v43 }
 0x556   :  { %v3102_v53 = vpop.permute.xlu0 %3101 }
 0x55a   :  { %v5722_v0 = vpop.permute.xlu0 %3111 }
 0x616   :  { %v3237_v39 = vpop.f32.mrb[8].mxu0 }
 0x617   :  { %v3651_v26 = vadd.f32 %v3237_v39, %v3097_v16  ;;  %v3239_v10 = vpop.f32.mrb[9].mxu0 }
 0x618   :  { %v3652_v21 = vadd.f32 %v3239_v10, %v3097_v16  ;;  %v3241_v9 = vpop.f32.mrb[10].mxu0 }
 0x619   :  { %v3362_v48 = vmax.f32 %v3651_v26, 0.0  ;;  %v3653_v23 = vadd.f32 %v3241_v9, %v3102_v53  ;;  %v3243_v24 = vpop.f32.mrb[11].mxu0  ;;  %v3749_v26 = vld [vmem:[%s5947_s0 + $0x30] sm:$0xff] }
 0x61a   :  { %v3363_v55 = vmax.f32 %v3652_v21, 0.0  ;;  %v3654_v45 = vadd.f32 %v3243_v24, %v3102_v53  ;;  %v3583_v21 = vld [vmem:[%s5947_s0 + $0x60] sm:$0xff]  ;;  %v3750_v24 = vld [vmem:[%s5947_s0 + $0x38] sm:$0xff] }
 0x61b   :  { %v5715_v5 = vadd.f32 %v3743_v37, %v3362_v48  ;;  %v3366_v56 = vmax.f32 %v3653_v23, 0.0  ;;  %v3584_v37 = vld [vmem:[%s5947_s0 + $0x68] sm:$0xff] }
 0x61c   :  { %v5720_v62 = vadd.f32 %v3744_v29, %v3363_v55  ;;  %v3367_v35 = vmax.f32 %v3654_v45, 0.0 }
 0x61d   :  { %v3343_v4 = vpop.f32.mrb[8].mxu1  ;;  %v5729_v17 = vadd.f32 %v3745_v46, %v3366_v56  ;;  %v3586_v46 = vld [vmem:[%s5947_s0 + $0x78] sm:$0xff] }
 0x61e   :  { %v3659_v50 = vadd.f32 %v3343_v4, %v3097_v16  ;;  %v3247_v63 = vpop.f32.mrb[12].mxu0  ;;  %v3345_v28 = vpop.f32.mrb[9].mxu1  ;;  %v3394_v30 = vadd.f32 %v5720_v62, %v5715_v5  ;;  %v5737_v59 = vadd.f32 %v3746_v2, %v3367_v35 }
 0x61f   :  { %v3655_v38 = vadd.f32 %v3247_v63, %v3107_v49  ;;  %v3660_v19 = vadd.f32 %v3345_v28, %v3097_v16  ;;  %v3249_v27 = vpop.f32.mrb[13].mxu0  ;;  %v3347_v18 = vpop.f32.mrb[10].mxu1 }
 0x620   :  { %v3364_v47 = vmax.f32 %v3659_v50, 0.0  ;;  %v3656_v40 = vadd.f32 %v3249_v27, %v3107_v49  ;;  %v3661_v22 = vadd.f32 %v3347_v18, %v3102_v53  ;;  %v3251_v58 = vpop.f32.mrb[14].mxu0  ;;  %v3349_v11 = vpop.f32.mrb[11].mxu1  ;;  %v3399_v6 = vadd.f32 %v5737_v59, %v5729_v17 }
 0x621   :  { %v3370_v34 = vmax.f32 %v3655_v38, 0.0  ;;  %v3365_v3 = vmax.f32 %v3660_v19, 0.0  ;;  %v3657_v36 = vadd.f32 %v3251_v58, %v5722_v0  ;;  %v3662_v32 = vadd.f32 %v3349_v11, %v3102_v53  ;;  %v3253_v1 = vpop.f32.mrb[15].mxu0 }
 0x622   :  { %v3380_v61 = vadd.f32 %v3579_v41, %v3364_v47  ;;  %v3371_v33 = vmax.f32 %v3656_v40, 0.0  ;;  %v3368_v25 = vmax.f32 %v3661_v22, 0.0  ;;  %v3658_v42 = vadd.f32 %v3253_v1, %v5722_v0 }
 0x623   :  { %v3381_v14 = vadd.f32 %v3580_v57, %v3365_v3  ;;  %v3374_v8 = vmax.f32 %v3657_v36, 0.0  ;;  %v3369_v44 = vmax.f32 %v3662_v32, 0.0  ;;  %v5755_v54 = vadd.f32 %v3747_v52, %v3370_v34 }
 0x624   :  { %v3395_v13 = vadd.f32 %v3394_v30, %v3380_v61  ;;  %v3384_v31 = vadd.f32 %v3581_v7, %v3368_v25  ;;  %v3375_v51 = vmax.f32 %v3658_v42, 0.0  ;;  %v5760_v43 = vadd.f32 %v3748_v20, %v3371_v33 }
 0x625   :  { %v3385_v60 = vadd.f32 %v3582_v12, %v3369_v44  ;;  %v3353_v15 = vpop.f32.mrb[12].mxu1  ;;  %v5765_v10 = vadd.f32 %v3749_v26, %v3374_v8 }
 0x626   :  { %v3400_v16 = vadd.f32 %v3399_v6, %v3384_v31  ;;  %v3663_v39 = vadd.f32 %v3353_v15, %v3107_v49  ;;  %v3355_v53 = vpop.f32.mrb[13].mxu1  ;;  %v3396_v23 = vadd.f32 %v3395_v13, %v3381_v14  ;;  %v3391_v55 = vadd.f32 %v3750_v24, %v3375_v51 }
 0x627   :  { %v3664_v9 = vadd.f32 %v3355_v53, %v3107_v49  ;;  %v3357_v48 = vpop.f32.mrb[14].mxu1  ;;  %v3585_v49 = vld [vmem:[%s5947_s0 + $0x70] sm:$0xff]  ;;  %v3404_v63 = vadd.f32 %v5760_v43, %v5755_v54 }
 0x628   :  { %v3372_v45 = vmax.f32 %v3663_v39, 0.0  ;;  %v3665_v56 = vadd.f32 %v3357_v48, %v5722_v0  ;;  %v3359_v29 = vpop.f32.mrb[15].mxu1  ;;  %v3401_v35 = vadd.f32 %v3400_v16, %v3385_v60  ;;  %3397 = vadd.xlane.f32.xlu1 %v3396_v23  ;;  %v3409_v19 = vadd.f32 %v3391_v55, %v5765_v10 }
 0x629   :  { %v3373_v4 = vmax.f32 %v3664_v9, 0.0  ;;  %v3666_v50 = vadd.f32 %v3359_v29, %v5722_v0 }
 0x62a   :  { %v3388_v28 = vadd.f32 %v3583_v21, %v3372_v45  ;;  %v3376_v30 = vmax.f32 %v3665_v56, 0.0  ;;  %3402 = vadd.xlane.f32.xlu0 %v3401_v35 }
 0x62b   :  { %v3389_v41 = vadd.f32 %v3584_v37, %v3373_v4  ;;  %v3377_v38 = vmax.f32 %v3666_v50, 0.0 }
 0x62c   :  { %v3405_v27 = vadd.f32 %v3404_v63, %v3388_v28  ;;  %v3392_v18 = vadd.f32 %v3585_v49, %v3376_v30  ;;  %v57_v30 = vld [vmem:[%s5954_s9 + $0x8] sm:$0xff] }
 0x62d   :  { %v3393_v2 = vadd.f32 %v3586_v46, %v3377_v38 }
 0x62e   :  { %v3410_v47 = vadd.f32 %v3409_v19, %v3392_v18  ;;  %v3406_v0 = vadd.f32 %v3405_v27, %v3389_v41 }
 0x630   :  { %3407 = vadd.xlane.f32.xlu0 %v3406_v0  ;;  %v3411_v57 = vadd.f32 %v3410_v47, %v3393_v2 }
 0x632   :  { %3412 = vadd.xlane.f32.xlu1 %v3411_v57 }
 0x6b5   :  { %v3398_v40 = vpop.xlane.xlu1 %3397 }
 0x6b6   :  { %v3414_v22 = vmul.f32 0.001953125, %v3398_v40 }
 0x6b7   :  { %v3403_v58 = vpop.xlane.xlu0 %3402 }
 0x6b8   :  { %v3415_v11 = vmul.f32 0.001953125, %v3403_v58  ;;  %v5788_v34 = vsub.f32 %v5715_v5, %v3414_v22  ;;  %v5791_v3 = vsub.f32 %v5720_v62, %v3414_v22  ;;  %v5793_v7 = vsub.f32 %v3380_v61, %v3414_v22  ;;  %v52_v58 = vld [vmem:[%s5955_s8] sm:$0xff] }
 0x6b9   :  { %v5803_v33 = vsub.f32 %v3381_v14, %v3414_v22 }
 0x6ba   :  { %v5796_v36 = vsub.f32 %v5729_v17, %v3415_v11  ;;  %v5799_v32 = vsub.f32 %v5737_v59, %v3415_v11  ;;  %v5801_v1 = vsub.f32 %v3384_v31, %v3415_v11  ;;  %v3434_v25 = vmul.f32 %v5788_v34, %v5788_v34 }
 0x6bb   :  { %v3435_v5 = vmul.f32 %v5791_v3, %v5791_v3  ;;  %v3436_v59 = vmul.f32 %v5793_v7, %v5793_v7  ;;  %v5815_v42 = vsub.f32 %v3385_v60, %v3415_v11  ;;  %v3437_v6 = vmul.f32 %v5803_v33, %v5803_v33 }
 0x6bc   :  { %v3438_v62 = vmul.f32 %v5796_v36, %v5796_v36  ;;  %v3439_v17 = vmul.f32 %v5799_v32, %v5799_v32  ;;  %v3440_v31 = vmul.f32 %v5801_v1, %v5801_v1 }
 0x6bd   :  { %v3408_v61 = vpop.xlane.xlu0 %3407  ;;  %v3450_v12 = vadd.f32 %v3435_v5, %v3434_v25  ;;  %v3441_v16 = vmul.f32 %v5815_v42, %v5815_v42  ;;  %v53_v25 = vld [vmem:[%s5955_s8 + $0x8] sm:$0xff] }
 0x6be   :  { %v3416_v14 = vmul.f32 0.001953125, %v3408_v61  ;;  %v3455_v8 = vadd.f32 %v3439_v17, %v3438_v62  ;;  %v54_v61 = vld [vmem:[%s5955_s8 + $0x10] sm:$0xff] }
 0x6bf   :  { %v3413_v44 = vpop.xlane.xlu1 %3412  ;;  %v3451_v13 = vadd.f32 %v3450_v12, %v3436_v59  ;;  %v55_v59 = vld [vmem:[%s5955_s8 + $0x18] sm:$0xff] }
 0x6c0   :  { %v5822_v51 = vsub.f32 %v5755_v54, %v3416_v14  ;;  %v5825_v15 = vsub.f32 %v5760_v43, %v3416_v14  ;;  %v3417_v52 = vmul.f32 0.001953125, %v3413_v44  ;;  %v5827_v20 = vsub.f32 %v3388_v28, %v3416_v14  ;;  %v56_v28 = vld [vmem:[%s5954_s9] sm:$0xff] }
 0x6c1   :  { %v3452_v60 = vadd.f32 %v3451_v13, %v3437_v6  ;;  %v3456_v39 = vadd.f32 %v3455_v8, %v3440_v31  ;;  %v5840_v9 = vsub.f32 %v3389_v41, %v3416_v14  ;;  %v58_v6 = vld [vmem:[%s5954_s9 + $0x10] sm:$0xff]  ;;  %v59_v13 = vld [vmem:[%s5954_s9 + $0x18] sm:$0xff] }
 0x6c2   :  { %v5832_v53 = vsub.f32 %v5765_v10, %v3417_v52  ;;  %v5834_v26 = vsub.f32 %v3391_v55, %v3417_v52  ;;  %v5836_v21 = vsub.f32 %v3392_v18, %v3417_v52  ;;  %v3442_v54 = vmul.f32 %v5822_v51, %v5822_v51 }
 0x6c3   :  { %3453 = vadd.xlane.f32.xlu0 %v3452_v60  ;;  %v3457_v43 = vadd.f32 %v3456_v39, %v3441_v16  ;;  %v3443_v48 = vmul.f32 %v5825_v15, %v5825_v15  ;;  %v5844_v23 = vsub.f32 %v3393_v2, %v3417_v52  ;;  %v3444_v55 = vmul.f32 %v5827_v20, %v5827_v20 }
 0x6c4   :  { %v3446_v10 = vmul.f32 %v5832_v53, %v5832_v53  ;;  %v3447_v24 = vmul.f32 %v5834_v26, %v5834_v26  ;;  %v3448_v37 = vmul.f32 %v5836_v21, %v5836_v21  ;;  %v3445_v29 = vmul.f32 %v5840_v9, %v5840_v9 }
 0x6c5   :  { %3458 = vadd.xlane.f32.xlu1 %v3457_v43  ;;  %v3460_v45 = vadd.f32 %v3443_v48, %v3442_v54  ;;  %v3449_v4 = vmul.f32 %v5844_v23, %v5844_v23 }
 0x6c6   :  { %v3465_v56 = vadd.f32 %v3447_v24, %v3446_v10 }
 0x6c7   :  { %v3461_v35 = vadd.f32 %v3460_v45, %v3444_v55 }
 0x6c8   :  { %v3466_v49 = vadd.f32 %v3465_v56, %v3448_v37 }
 0x6c9   :  { %v3462_v50 = vadd.f32 %v3461_v35, %v3445_v29 }
 0x6ca   :  { %v3467_v63 = vadd.f32 %v3466_v49, %v3449_v4 }
 0x6cb   :  { %3463 = vadd.xlane.f32.xlu0 %v3462_v50 }
 0x6cc   :  { %3468 = vadd.xlane.f32.xlu1 %v3467_v63 }
 0x6dd   :  { %3524 = vperm.xlu1 %3710, %v56_v28  }
 0x6e1   :  { %3529 = vperm.xlu0 %3709, %v57_v30  }
 0x750   :  { %v3454_v46 = vpop.xlane.xlu0 %3453 }
 0x751   :  { %v3470_v41 = vmul.f32 0.001953125, %v3454_v46 }
 0x752   :  { %v3459_v38 = vpop.xlane.xlu1 %3458 }
 0x753   :  { %v3474_v19 = vadd.f32 1e-05, %v3470_v41  ;;  %v3471_v27 = vmul.f32 0.001953125, %v3459_v38 }
 0x755   :  { %3735 = vrsqrt.f32 %v3474_v19  ;;  %v3475_v18 = vadd.f32 1e-05, %v3471_v27 }
 0x757   :  { %3737 = vrsqrt.f32 %v3475_v18 }
 0x758   :  { %v3464_v2 = vpop.xlane.xlu0 %3463 }
 0x759   :  { %v3472_v47 = vmul.f32 0.001953125, %v3464_v2  ;;  %v3469_v0 = vpop.xlane.xlu1 %3468 }
 0x75a   :  { %v3473_v57 = vmul.f32 0.001953125, %v3469_v0 }
 0x75b   :  { %v3476_v40 = vadd.f32 1e-05, %v3472_v47 }
 0x75c   :  { %v3477_v22 = vadd.f32 1e-05, %v3473_v57 }
 0x75d   :  { %3739 = vrsqrt.f32 %v3476_v40  ;;  %v3525_v52 = vpop.permute.xlu1 %3524 }
 0x75e   :  { %3741 = vrsqrt.f32 %v3477_v22 }
 0x75f   :  { %v3736_v11 = vpop.eup %3735 }
 0x760   :  { %v3482_v5 = vmul.f32 %v3736_v11, %v52_v58  ;;  %v3530_v31 = vpop.permute.xlu0 %3529 }
 0x761   :  { %v3738_v62 = vpop.eup %3737 }
 0x762   :  { %3488 = vperm.xlu0 %3709, %v3482_v5   ;;  %v3483_v17 = vmul.f32 %v3738_v62, %v53_v25 }
 0x764   :  { %3493 = vperm.xlu1 %3710, %v3483_v17  }
 0x767   :  { %v3740_v12 = vpop.eup %3739 }
 0x768   :  { %v3742_v14 = vpop.eup %3741  ;;  %v3484_v8 = vmul.f32 %v3740_v12, %v54_v61 }
 0x769   :  { %v3485_v44 = vmul.f32 %v3742_v14, %v55_v59 }
 0x76a   :  { %3498 = vperm.xlu1 %3710, %v3484_v8  }
 0x76b   :  { %3503 = vperm.xlu0 %3709, %v3485_v44  }
 0x76e   :  { %3534 = vperm.xlu1 %3710, %v58_v6  }
 0x76f   :  { %3539 = vperm.xlu0 %3709, %v59_v13  }
 0x7e1   :  { %v3489_v60 = vpop.permute.xlu0 %3488 }
 0x7e2   :  { %v3506_v16 = vmul.f32 %v3489_v60, %v5788_v34  ;;  %v3507_v39 = vmul.f32 %v3489_v60, %v5791_v3  ;;  %v3508_v54 = vmul.f32 %v3489_v60, %v5793_v7  ;;  %v3509_v43 = vmul.f32 %v3489_v60, %v5803_v33 }
 0x7e3   :  { %v3494_v48 = vpop.permute.xlu1 %3493 }
 0x7e4   :  { %v3542_v10 = vadd.f32 %v3525_v52, %v3506_v16  ;;  %v3543_v24 = vadd.f32 %v3525_v52, %v3507_v39  ;;  %v3544_v55 = vadd.f32 %v3525_v52, %v3508_v54  ;;  %v3545_v45 = vadd.f32 %v3525_v52, %v3509_v43 }
 0x7e5   :  { %v3510_v37 = vmul.f32 %v3494_v48, %v5796_v36  ;;  %v3511_v56 = vmul.f32 %v3494_v48, %v5799_v32  ;;  %v3512_v29 = vmul.f32 %v3494_v48, %v5801_v1  ;;  %v3513_v35 = vmul.f32 %v3494_v48, %v5815_v42 }
 0x7e6   :  { %3558 = vst [vmem:[%s5956_s10] sm:$0xff] %v3542_v10  ;;  %3559 = vst [vmem:[%s5956_s10 + $0x8] sm:$0xff] %v3543_v24 }
 0x7e7   :  { %3627 = vst [vmem:[%s5956_s10 + $0x40] sm:$0xff] %v3544_v55  ;;  %3628 = vst [vmem:[%s5956_s10 + $0x48] sm:$0xff] %v3545_v45  ;;  %v3546_v34 = vadd.f32 %v3530_v31, %v3510_v37  ;;  %v3547_v3 = vadd.f32 %v3530_v31, %v3511_v56  ;;  %v3548_v7 = vadd.f32 %v3530_v31, %v3512_v29 }
 0x7e8   :  { %v3549_v36 = vadd.f32 %v3530_v31, %v3513_v35 }
 0x7e9   :  { %3560 = vst [vmem:[%s5956_s10 + $0x10] sm:$0xff] %v3546_v34  ;;  %3561 = vst [vmem:[%s5956_s10 + $0x18] sm:$0xff] %v3547_v3  ;;  %v3499_v32 = vpop.permute.xlu1 %3498 }
 0x7ea   :  { %3629 = vst [vmem:[%s5956_s10 + $0x50] sm:$0xff] %v3548_v7  ;;  %3630 = vst [vmem:[%s5956_s10 + $0x58] sm:$0xff] %v3549_v36  ;;  %v3504_v1 = vpop.permute.xlu0 %3503  ;;  %v3514_v33 = vmul.f32 %v3499_v32, %v5822_v51  ;;  %v3515_v42 = vmul.f32 %v3499_v32, %v5825_v15  ;;  %v3516_v4 = vmul.f32 %v3499_v32, %v5827_v20 }
 0x7eb   :  { %v3517_v49 = vmul.f32 %v3499_v32, %v5840_v9  ;;  %v3518_v63 = vmul.f32 %v3504_v1, %v5832_v53  ;;  %v3519_v28 = vmul.f32 %v3504_v1, %v5834_v26  ;;  %v3520_v30 = vmul.f32 %v3504_v1, %v5836_v21 }
 0x7ec   :  { %v3521_v46 = vmul.f32 %v3504_v1, %v5844_v23 }
 0x7ed   :  { %v3535_v50 = vpop.permute.xlu1 %3534 }
 0x7ee   :  { %v3550_v41 = vadd.f32 %v3535_v50, %v3514_v33  ;;  %v3551_v38 = vadd.f32 %v3535_v50, %v3515_v42  ;;  %v3552_v19 = vadd.f32 %v3535_v50, %v3516_v4  ;;  %v3553_v27 = vadd.f32 %v3535_v50, %v3517_v49  ;;  %v3540_v51 = vpop.permute.xlu0 %3539 }
 0x7ef   :  { %v3554_v18 = vadd.f32 %v3540_v51, %v3518_v63  ;;  %v3555_v15 = vadd.f32 %v3540_v51, %v3519_v28  ;;  %v3556_v2 = vadd.f32 %v3540_v51, %v3520_v30  ;;  %v3557_v20 = vadd.f32 %v3540_v51, %v3521_v46 }
 0x7f0   :  { %3562 = vst [vmem:[%s5956_s10 + $0x20] sm:$0xff] %v3550_v41  ;;  %3563 = vst [vmem:[%s5956_s10 + $0x28] sm:$0xff] %v3551_v38 }
 0x7f1   :  { %3631 = vst [vmem:[%s5956_s10 + $0x60] sm:$0xff] %v3552_v19  ;;  %3632 = vst [vmem:[%s5956_s10 + $0x68] sm:$0xff] %v3553_v27 }
 0x7f2   :  { %3564 = vst [vmem:[%s5956_s10 + $0x30] sm:$0xff] %v3554_v18  ;;  %3565 = vst [vmem:[%s5956_s10 + $0x38] sm:$0xff] %v3555_v15 }
 0x7f3   :  { %3633 = vst [vmem:[%s5956_s10 + $0x70] sm:$0xff] %v3556_v2  ;;  %3634 = vst [vmem:[%s5956_s10 + $0x78] sm:$0xff] %v3557_v20 }

</bundles_post_ra>
